<compile_context>
chip_gen: v7x
topology: tpu7x:2x2x1
jax: 0.10.0
libtpu: 0.0.40
codegen_flags: <defaults>
</compile_context>

<pallas_src>
import jax
import jax.numpy as jnp
from jax import lax
from jax.experimental import pallas as pl
from jax.experimental.pallas import tpu as pltpu

# ---- small config consistent with the module (GPT-Neo style layers) ----
L = 16          # sequence length (FPGA kernel hard-codes 64; small here)
D = 64          # hidden size
H = 4           # attention heads
HD = D // H     # head dim
FF = 4 * D      # mlp intermediate
VOCAB = 256
MAXPOS = 32
NLAYERS = 2
EPS = 1e-5
NEG = -1e30


def _layernorm(x, w, b):
    mu = jnp.mean(x, axis=-1, keepdims=True)
    var = jnp.mean((x - mu) ** 2, axis=-1, keepdims=True)
    return (x - mu) * lax.rsqrt(var + EPS) * w + b


# ----------------------- fused full-forward kernel -----------------------
def _forward_kernel(alen_ref,                               # SMEM prefetch (1,) i32
                    h_ref,
                    ln1w_ref, ln1b_ref, wqkv_ref, wo_ref, bo_ref,
                    ln2w_ref, ln2b_ref, wfc_ref, bfc_ref, wpr_ref, bpr_ref,
                    lnfw_ref, lnfb_ref, wlm_ref,
                    out_ref):
    h = h_ref[...]                                          # [L, D] f32

    # causal + valid-length mask: built once, reused for every layer & head
    alen = alen_ref[0]
    qi = lax.broadcasted_iota(jnp.int32, (L, L), 0)
    ki = lax.broadcasted_iota(jnp.int32, (L, L), 1)
    mask = ((ki <= qi) & (ki < alen))[None, :, :]           # [1, L, L]

    for li in range(NLAYERS):                               # static unroll
        # --- LayerNorm 1 (f32) ---
        x = _layernorm(h, ln1w_ref[li], ln1b_ref[li])

        # --- fused QKV projection (bf16 MXU operands, f32 accumulate) ---
        qkv = jnp.dot(x.astype(jnp.bfloat16), wqkv_ref[li],
                      preferred_element_type=jnp.float32)   # [L, 3D] f32
        q3 = jnp.transpose(qkv[:, 0 * D:1 * D].reshape(L, H, HD), (1, 0, 2))
        k3 = jnp.transpose(qkv[:, 1 * D:2 * D].reshape(L, H, HD), (1, 0, 2))
        v3 = jnp.transpose(qkv[:, 2 * D:3 * D].reshape(L, H, HD), (1, 0, 2))

        # --- head-batched attention (GPT-Neo: no 1/sqrt(d) scaling) ---
        s = jnp.einsum('hqd,hkd->hqk',
                       q3.astype(jnp.bfloat16), k3.astype(jnp.bfloat16),
                       preferred_element_type=jnp.float32)  # [H, L, L] f32
        s = jnp.where(mask, s, NEG)
        s = s - jnp.max(s, axis=-1, keepdims=True)
        p = jnp.exp(s)                                      # f32, unnormalized
        denom = jnp.sum(p, axis=-1, keepdims=True)          # [H, L, 1]
        ctx = jnp.einsum('hqk,hkd->hqd',
                         p.astype(jnp.bfloat16), v3.astype(jnp.bfloat16),
                         preferred_element_type=jnp.float32)   # [H, L, HD]
        ctx = ctx * pl.reciprocal(denom, approx=True)       # EUP divide, small tensor
        ctx2 = jnp.transpose(ctx, (1, 0, 2)).reshape(L, D)

        attn = jnp.dot(ctx2.astype(jnp.bfloat16), wo_ref[li],
                       preferred_element_type=jnp.float32) + bo_ref[li]
        h = h + attn                                        # residual 1

        # --- LayerNorm 2 + MLP (gelu_new, f32 elementwise) ---
        y = _layernorm(h, ln2w_ref[li], ln2b_ref[li])
        f = jnp.dot(y.astype(jnp.bfloat16), wfc_ref[li],
                    preferred_element_type=jnp.float32) + bfc_ref[li]
        g = 0.5 * f * (1.0 + jnp.tanh(0.7978845608028654 *
                                      (f + 0.044715 * f * f * f)))
        m = jnp.dot(g.astype(jnp.bfloat16), wpr_ref[li],
                    preferred_element_type=jnp.float32) + bpr_ref[li]
        h = h + m                                           # residual 2

    # --- final LayerNorm + lm_head (only HBM output: [L, VOCAB]) ---
    xf = _layernorm(h, lnfw_ref[...], lnfb_ref[...])
    out_ref[...] = jnp.dot(xf.astype(jnp.bfloat16), wlm_ref[...],
                           preferred_element_type=jnp.float32)


def _full_spec(shape):
    nd = len(shape)
    return pl.BlockSpec(shape, lambda i, _alen, _nd=nd: (0,) * _nd)


def gptneo_fused_forward(h, params, actual_len):
    in_arrays = (h,
                 params['ln1_w'], params['ln1_b'], params['wqkv'],
                 params['wo'], params['bo'],
                 params['ln2_w'], params['ln2_b'],
                 params['wfc'], params['bfc'], params['wpr'], params['bpr'],
                 params['ln_f_w'], params['ln_f_b'], params['lm_head'])
    in_specs = [_full_spec(a.shape) for a in in_arrays]
    return pl.pallas_call(
        _forward_kernel,
        out_shape=jax.ShapeDtypeStruct((L, VOCAB), jnp.float32),
        grid_spec=pltpu.PrefetchScalarGridSpec(
            num_scalar_prefetch=1,
            grid=(1,),
            in_specs=in_specs,
            out_specs=_full_spec((L, VOCAB)),
        ),
        compiler_params=pltpu.CompilerParams(
            dimension_semantics=("arbitrary",)),
    )(actual_len, *in_arrays)


# ------------------------------ parameters ------------------------------
def init_params(key):
    ks = jax.random.split(key, 3 + NLAYERS)
    wqkv, wo, wfc, wpr = [], [], [], []
    for li in range(NLAYERS):
        lk = jax.random.split(ks[3 + li], 6)
        wq = 0.02 * jax.random.normal(lk[0], (D, D), jnp.float32)
        wk = 0.02 * jax.random.normal(lk[1], (D, D), jnp.float32)
        wv = 0.02 * jax.random.normal(lk[2], (D, D), jnp.float32)
        wqkv.append(jnp.concatenate([wq, wk, wv], axis=1))          # [D, 3D]
        wo.append(0.02 * jax.random.normal(lk[3], (D, D), jnp.float32))
        wfc.append(0.02 * jax.random.normal(lk[4], (D, FF), jnp.float32))
        wpr.append(0.02 * jax.random.normal(lk[5], (FF, D), jnp.float32))
    return {
        'wte': 0.02 * jax.random.normal(ks[0], (VOCAB, D), jnp.float32),
        'wpe': 0.02 * jax.random.normal(ks[1], (MAXPOS, D), jnp.float32),
        # per-layer weights stacked on a leading NLAYERS axis
        'ln1_w': jnp.ones((NLAYERS, 1, D), jnp.float32),
        'ln1_b': jnp.zeros((NLAYERS, 1, D), jnp.float32),
        'wqkv': jnp.stack(wqkv).astype(jnp.bfloat16),                # [NL, D, 3D]
        'wo': jnp.stack(wo).astype(jnp.bfloat16),                    # [NL, D, D]
        'bo': jnp.zeros((NLAYERS, 1, D), jnp.float32),
        'ln2_w': jnp.ones((NLAYERS, 1, D), jnp.float32),
        'ln2_b': jnp.zeros((NLAYERS, 1, D), jnp.float32),
        'wfc': jnp.stack(wfc).astype(jnp.bfloat16),                  # [NL, D, FF]
        'bfc': jnp.zeros((NLAYERS, 1, FF), jnp.float32),
        'wpr': jnp.stack(wpr).astype(jnp.bfloat16),                  # [NL, FF, D]
        'bpr': jnp.zeros((NLAYERS, 1, D), jnp.float32),
        # final LN + lm_head (pre-transposed to [D, V])
        'ln_f_w': jnp.ones((1, D), jnp.float32),
        'ln_f_b': jnp.zeros((1, D), jnp.float32),
        'lm_head': (0.02 * jax.random.normal(ks[2], (D, VOCAB), jnp.float32)
                    ).astype(jnp.bfloat16),
    }


# ------------------------------- forward --------------------------------
@jax.jit
def gptneo_forward(params, input_ids, attention_mask):
    # embeddings + position ids (plain-JAX glue, mirrors the PyTorch code)
    ids = input_ids.reshape(-1, input_ids.shape[-1])
    pos = jnp.cumsum(attention_mask.astype(jnp.int32), axis=-1) - 1
    pos = jnp.where(attention_mask == 0, 1, pos)
    emb = jnp.take(params['wte'], ids, axis=0) + jnp.take(params['wpe'], pos, axis=0)
    h = emb[0].astype(jnp.float32)                           # module uses batch 0 only
    actual_len = jnp.sum(attention_mask).astype(jnp.int32).reshape(1)

    logits = gptneo_fused_forward(h, params, actual_len)     # single pallas_call
    return logits[None]                                      # [1, L, VOCAB]


if __name__ == "__main__":
    key = jax.random.PRNGKey(0)
    kp, ki = jax.random.split(key)
    params = init_params(kp)

    input_ids = jax.random.randint(ki, (1, L), 0, VOCAB, dtype=jnp.int32)
    attention_mask = jnp.concatenate(
        [jnp.ones((1, 12), jnp.int32), jnp.zeros((1, L - 12), jnp.int32)], axis=-1)

    logits = gptneo_forward(params, input_ids, attention_mask)
    logits = jax.block_until_ready(logits)
    assert logits.shape == (1, L, VOCAB)
    assert bool(jnp.all(jnp.isfinite(logits)))
    print("KERNEL_OK")
</pallas_src>

<mosaic_0001>
module attributes {stable_mosaic.version = 11 : i64} {
  func.func @_forward_kernel(%arg0: i32, %arg1: memref<1xi32, #tpu.memory_space<smem>>, %arg2: memref<16x64xf32, #tpu.memory_space<vmem>>, %arg3: memref<2x1x64xf32, #tpu.memory_space<vmem>>, %arg4: memref<2x1x64xf32, #tpu.memory_space<vmem>>, %arg5: memref<2x64x192xbf16, #tpu.memory_space<vmem>>, %arg6: memref<2x64x64xbf16, #tpu.memory_space<vmem>>, %arg7: memref<2x1x64xf32, #tpu.memory_space<vmem>>, %arg8: memref<2x1x64xf32, #tpu.memory_space<vmem>>, %arg9: memref<2x1x64xf32, #tpu.memory_space<vmem>>, %arg10: memref<2x64x256xbf16, #tpu.memory_space<vmem>>, %arg11: memref<2x1x256xf32, #tpu.memory_space<vmem>>, %arg12: memref<2x256x64xbf16, #tpu.memory_space<vmem>>, %arg13: memref<2x1x64xf32, #tpu.memory_space<vmem>>, %arg14: memref<1x64xf32, #tpu.memory_space<vmem>>, %arg15: memref<1x64xf32, #tpu.memory_space<vmem>>, %arg16: memref<64x256xbf16, #tpu.memory_space<vmem>>, %arg17: memref<16x256xf32, #tpu.memory_space<vmem>>) attributes {dimension_semantics = [#tpu.dimension_semantics<arbitrary>], iteration_bounds = array<i64: 1>, scalar_prefetch = 1 : i64, scratch_operands = 0 : i64, tpu.core_type = #tpu.core_type<tc>, window_params = [{pipeline_mode = #tpu.pipeline_mode<synchronous>, transform_indices = @transform_0, window_bounds = array<i64: 16, 64>}, {pipeline_mode = #tpu.pipeline_mode<synchronous>, transform_indices = @transform_1, window_bounds = array<i64: 2, 1, 64>}, {pipeline_mode = #tpu.pipeline_mode<synchronous>, transform_indices = @transform_2, window_bounds = array<i64: 2, 1, 64>}, {pipeline_mode = #tpu.pipeline_mode<synchronous>, transform_indices = @transform_3, window_bounds = array<i64: 2, 64, 192>}, {pipeline_mode = #tpu.pipeline_mode<synchronous>, transform_indices = @transform_4, window_bounds = array<i64: 2, 64, 64>}, {pipeline_mode = #tpu.pipeline_mode<synchronous>, transform_indices = @transform_5, window_bounds = array<i64: 2, 1, 64>}, {pipeline_mode = #tpu.pipeline_mode<synchronous>, transform_indices = @transform_6, window_bounds = array<i64: 2, 1, 64>}, {pipeline_mode = #tpu.pipeline_mode<synchronous>, transform_indices = @transform_7, window_bounds = array<i64: 2, 1, 64>}, {pipeline_mode = #tpu.pipeline_mode<synchronous>, transform_indices = @transform_8, window_bounds = array<i64: 2, 64, 256>}, {pipeline_mode = #tpu.pipeline_mode<synchronous>, transform_indices = @transform_9, window_bounds = array<i64: 2, 1, 256>}, {pipeline_mode = #tpu.pipeline_mode<synchronous>, transform_indices = @transform_10, window_bounds = array<i64: 2, 256, 64>}, {pipeline_mode = #tpu.pipeline_mode<synchronous>, transform_indices = @transform_11, window_bounds = array<i64: 2, 1, 64>}, {pipeline_mode = #tpu.pipeline_mode<synchronous>, transform_indices = @transform_12, window_bounds = array<i64: 1, 64>}, {pipeline_mode = #tpu.pipeline_mode<synchronous>, transform_indices = @transform_13, window_bounds = array<i64: 1, 64>}, {pipeline_mode = #tpu.pipeline_mode<synchronous>, transform_indices = @transform_14, window_bounds = array<i64: 64, 256>}, {pipeline_mode = #tpu.pipeline_mode<synchronous>, transform_indices = @transform_15, window_bounds = array<i64: 16, 256>}]} {
    %c0 = arith.constant 0 : index
    %c0_0 = arith.constant 0 : index
    %0 = vector.load %arg2[%c0, %c0_0] : memref<16x64xf32, #tpu.memory_space<vmem>>, vector<16x64xf32>
    %c0_1 = arith.constant 0 : index
    %1 = memref.load %arg1[%c0_1] : memref<1xi32, #tpu.memory_space<smem>>
    %2 = tpu.iota {dimensions = array<i32: 0>} : vector<16x16xi32>
    %3 = tpu.iota {dimensions = array<i32: 1>} : vector<16x16xi32>
    %4 = arith.cmpi sle, %3, %2 : vector<16x16xi32>
    %5 = vector.broadcast %1 : i32 to vector<16x16xi32>
    %6 = arith.cmpi slt, %3, %5 : vector<16x16xi32>
    %7 = arith.andi %4, %6 : vector<16x16xi1>
    %8 = vector.shape_cast %7 : vector<16x16xi1> to vector<1x16x16xi1>
    %c0_2 = arith.constant 0 : index
    %c0_3 = arith.constant 0 : index
    %c0_4 = arith.constant 0 : index
    %9 = vector.load %arg3[%c0_2, %c0_3, %c0_4] : memref<2x1x64xf32, #tpu.memory_space<vmem>>, vector<1x1x64xf32>
    %10 = vector.shape_cast %9 : vector<1x1x64xf32> to vector<1x64xf32>
    %c0_5 = arith.constant 0 : index
    %c0_6 = arith.constant 0 : index
    %c0_7 = arith.constant 0 : index
    %11 = vector.load %arg4[%c0_5, %c0_6, %c0_7] : memref<2x1x64xf32, #tpu.memory_space<vmem>>, vector<1x1x64xf32>
    %12 = vector.shape_cast %11 : vector<1x1x64xf32> to vector<1x64xf32>
    %cst = arith.constant dense<0.000000e+00> : vector<16xf32>
    %13 = vector.multi_reduction <add>, %0, %cst [1] : vector<16x64xf32> to vector<16xf32>
    %14 = vector.shape_cast %13 : vector<16xf32> to vector<16x1xf32>
    %cst_8 = arith.constant 6.400000e+01 : f32
    %15 = vector.broadcast %cst_8 : f32 to vector<16x1xf32>
    %16 = arith.divf %14, %15 : vector<16x1xf32>
    %17 = vector.broadcast %16 : vector<16x1xf32> to vector<16x64xf32>
    %18 = arith.subf %0, %17 : vector<16x64xf32>
    %19 = arith.mulf %18, %18 : vector<16x64xf32>
    %cst_9 = arith.constant dense<0.000000e+00> : vector<16xf32>
    %20 = vector.multi_reduction <add>, %19, %cst_9 [1] : vector<16x64xf32> to vector<16xf32>
    %21 = vector.shape_cast %20 : vector<16xf32> to vector<16x1xf32>
    %cst_10 = arith.constant 6.400000e+01 : f32
    %22 = vector.broadcast %cst_10 : f32 to vector<16x1xf32>
    %23 = arith.divf %21, %22 : vector<16x1xf32>
    %24 = vector.broadcast %16 : vector<16x1xf32> to vector<16x64xf32>
    %25 = arith.subf %0, %24 : vector<16x64xf32>
    %cst_11 = arith.constant 9.99999974E-6 : f32
    %26 = vector.broadcast %cst_11 : f32 to vector<16x1xf32>
    %27 = arith.addf %23, %26 : vector<16x1xf32>
    %28 = math.rsqrt %27 : vector<16x1xf32>
    %29 = vector.broadcast %28 : vector<16x1xf32> to vector<16x64xf32>
    %30 = arith.mulf %25, %29 : vector<16x64xf32>
    %31 = vector.broadcast %10 : vector<1x64xf32> to vector<16x64xf32>
    %32 = arith.mulf %30, %31 : vector<16x64xf32>
    %33 = vector.broadcast %12 : vector<1x64xf32> to vector<16x64xf32>
    %34 = arith.addf %32, %33 : vector<16x64xf32>
    %35 = arith.truncf %34 : vector<16x64xf32> to vector<16x64xbf16>
    %c0_12 = arith.constant 0 : index
    %c0_13 = arith.constant 0 : index
    %c0_14 = arith.constant 0 : index
    %36 = vector.load %arg5[%c0_12, %c0_13, %c0_14] : memref<2x64x192xbf16, #tpu.memory_space<vmem>>, vector<1x64x192xbf16>
    %37 = vector.shape_cast %36 : vector<1x64x192xbf16> to vector<64x192xbf16>
    %cst_15 = arith.constant dense<0.000000e+00> : vector<16x192xf32>
    %38 = tpu.matmul %35, %37, %cst_15 {dimension_numbers = #tpu.dot_dimension_numbers<[1], [0], [0], [1], [0, 0, 1, 1], [], []>} : vector<16x64xbf16>, vector<64x192xbf16>, vector<16x192xf32> -> vector<16x192xf32>
    %39 = vector.extract_strided_slice %38 {offsets = [0, 0], sizes = [16, 64], strides = [1, 1]} : vector<16x192xf32> to vector<16x64xf32>
    %40 = vector.shape_cast %39 : vector<16x64xf32> to vector<16x4x16xf32>
    %41 = tpu.transpose %40, [1, 0, 2] : vector<16x4x16xf32> -> vector<4x16x16xf32>
    %42 = vector.extract_strided_slice %38 {offsets = [0, 64], sizes = [16, 64], strides = [1, 1]} : vector<16x192xf32> to vector<16x64xf32>
    %43 = vector.shape_cast %42 : vector<16x64xf32> to vector<16x4x16xf32>
    %44 = tpu.transpose %43, [1, 0, 2] : vector<16x4x16xf32> -> vector<4x16x16xf32>
    %45 = vector.extract_strided_slice %38 {offsets = [0, 128], sizes = [16, 64], strides = [1, 1]} : vector<16x192xf32> to vector<16x64xf32>
    %46 = vector.shape_cast %45 : vector<16x64xf32> to vector<16x4x16xf32>
    %47 = tpu.transpose %46, [1, 0, 2] : vector<16x4x16xf32> -> vector<4x16x16xf32>
    %48 = arith.truncf %41 : vector<4x16x16xf32> to vector<4x16x16xbf16>
    %49 = arith.truncf %44 : vector<4x16x16xf32> to vector<4x16x16xbf16>
    "tpu.trace_start"() <{level = 10 : i32, message = "hqd,hkd->hqk"}> : () -> ()
    %cst_16 = arith.constant dense<0.000000e+00> : vector<4x16x16xf32>
    %50 = tpu.matmul %48, %49, %cst_16 {dimension_numbers = #tpu.dot_dimension_numbers<[2], [2], [1], [1], [0, 0, 0, 1, 1, 1], [0], [0]>} : vector<4x16x16xbf16>, vector<4x16x16xbf16>, vector<4x16x16xf32> -> vector<4x16x16xf32>
    %cst_17 = arith.constant -1.000000e+30 : f32
    "tpu.trace_stop"() : () -> ()
    %51 = vector.shape_cast %8 : vector<1x16x16xi1> to vector<1x16x16xi1>
    %52 = vector.broadcast %51 : vector<1x16x16xi1> to vector<4x16x16xi1>
    %53 = vector.broadcast %cst_17 : f32 to vector<4x16x16xf32>
    %54 = arith.select %52, %50, %53 : vector<4x16x16xi1>, vector<4x16x16xf32>
    %cst_18 = arith.constant dense<0xFF800000> : vector<4x16xf32>
    %55 = vector.multi_reduction <maximumf>, %54, %cst_18 [2] : vector<4x16x16xf32> to vector<4x16xf32>
    %56 = vector.shape_cast %55 : vector<4x16xf32> to vector<4x16x1xf32>
    %57 = vector.broadcast %56 : vector<4x16x1xf32> to vector<4x16x16xf32>
    %58 = arith.subf %54, %57 : vector<4x16x16xf32>
    %59 = math.exp %58 : vector<4x16x16xf32>
    %cst_19 = arith.constant dense<0.000000e+00> : vector<4x16xf32>
    %60 = vector.multi_reduction <add>, %59, %cst_19 [2] : vector<4x16x16xf32> to vector<4x16xf32>
    %61 = vector.shape_cast %60 : vector<4x16xf32> to vector<4x16x1xf32>
    %62 = arith.truncf %59 : vector<4x16x16xf32> to vector<4x16x16xbf16>
    %63 = arith.truncf %47 : vector<4x16x16xf32> to vector<4x16x16xbf16>
    "tpu.trace_start"() <{level = 10 : i32, message = "hqk,hkd->hqd"}> : () -> ()
    %cst_20 = arith.constant dense<0.000000e+00> : vector<4x16x16xf32>
    %64 = tpu.matmul %62, %63, %cst_20 {dimension_numbers = #tpu.dot_dimension_numbers<[2], [1], [1], [2], [0, 0, 0, 1, 1, 2], [0], [0]>} : vector<4x16x16xbf16>, vector<4x16x16xbf16>, vector<4x16x16xf32> -> vector<4x16x16xf32>
    "tpu.trace_stop"() : () -> ()
    %65 = tpu.reciprocal %61 {approx = true} : vector<4x16x1xf32> -> vector<4x16x1xf32>
    %66 = vector.broadcast %65 : vector<4x16x1xf32> to vector<4x16x16xf32>
    %67 = arith.mulf %64, %66 : vector<4x16x16xf32>
    %68 = tpu.transpose %67, [1, 0, 2] : vector<4x16x16xf32> -> vector<16x4x16xf32>
    %69 = vector.shape_cast %68 : vector<16x4x16xf32> to vector<16x64xf32>
    %70 = arith.truncf %69 : vector<16x64xf32> to vector<16x64xbf16>
    %c0_21 = arith.constant 0 : index
    %c0_22 = arith.constant 0 : index
    %c0_23 = arith.constant 0 : index
    %71 = vector.load %arg6[%c0_21, %c0_22, %c0_23] : memref<2x64x64xbf16, #tpu.memory_space<vmem>>, vector<1x64x64xbf16>
    %72 = vector.shape_cast %71 : vector<1x64x64xbf16> to vector<64x64xbf16>
    %cst_24 = arith.constant dense<0.000000e+00> : vector<16x64xf32>
    %73 = tpu.matmul %70, %72, %cst_24 {dimension_numbers = #tpu.dot_dimension_numbers<[1], [0], [0], [1], [0, 0, 1, 1], [], []>} : vector<16x64xbf16>, vector<64x64xbf16>, vector<16x64xf32> -> vector<16x64xf32>
    %c0_25 = arith.constant 0 : index
    %c0_26 = arith.constant 0 : index
    %c0_27 = arith.constant 0 : index
    %74 = vector.load %arg7[%c0_25, %c0_26, %c0_27] : memref<2x1x64xf32, #tpu.memory_space<vmem>>, vector<1x1x64xf32>
    %75 = vector.shape_cast %74 : vector<1x1x64xf32> to vector<1x64xf32>
    %76 = vector.broadcast %75 : vector<1x64xf32> to vector<16x64xf32>
    %77 = arith.addf %73, %76 : vector<16x64xf32>
    %78 = arith.addf %0, %77 : vector<16x64xf32>
    %c0_28 = arith.constant 0 : index
    %c0_29 = arith.constant 0 : index
    %c0_30 = arith.constant 0 : index
    %79 = vector.load %arg8[%c0_28, %c0_29, %c0_30] : memref<2x1x64xf32, #tpu.memory_space<vmem>>, vector<1x1x64xf32>
    %80 = vector.shape_cast %79 : vector<1x1x64xf32> to vector<1x64xf32>
    %c0_31 = arith.constant 0 : index
    %c0_32 = arith.constant 0 : index
    %c0_33 = arith.constant 0 : index
    %81 = vector.load %arg9[%c0_31, %c0_32, %c0_33] : memref<2x1x64xf32, #tpu.memory_space<vmem>>, vector<1x1x64xf32>
    %82 = vector.shape_cast %81 : vector<1x1x64xf32> to vector<1x64xf32>
    %cst_34 = arith.constant dense<0.000000e+00> : vector<16xf32>
    %83 = vector.multi_reduction <add>, %78, %cst_34 [1] : vector<16x64xf32> to vector<16xf32>
    %84 = vector.shape_cast %83 : vector<16xf32> to vector<16x1xf32>
    %cst_35 = arith.constant 6.400000e+01 : f32
    %85 = vector.broadcast %cst_35 : f32 to vector<16x1xf32>
    %86 = arith.divf %84, %85 : vector<16x1xf32>
    %87 = vector.broadcast %86 : vector<16x1xf32> to vector<16x64xf32>
    %88 = arith.subf %78, %87 : vector<16x64xf32>
    %89 = arith.mulf %88, %88 : vector<16x64xf32>
    %cst_36 = arith.constant dense<0.000000e+00> : vector<16xf32>
    %90 = vector.multi_reduction <add>, %89, %cst_36 [1] : vector<16x64xf32> to vector<16xf32>
    %91 = vector.shape_cast %90 : vector<16xf32> to vector<16x1xf32>
    %cst_37 = arith.constant 6.400000e+01 : f32
    %92 = vector.broadcast %cst_37 : f32 to vector<16x1xf32>
    %93 = arith.divf %91, %92 : vector<16x1xf32>
    %94 = vector.broadcast %86 : vector<16x1xf32> to vector<16x64xf32>
    %95 = arith.subf %78, %94 : vector<16x64xf32>
    %cst_38 = arith.constant 9.99999974E-6 : f32
    %96 = vector.broadcast %cst_38 : f32 to vector<16x1xf32>
    %97 = arith.addf %93, %96 : vector<16x1xf32>
    %98 = math.rsqrt %97 : vector<16x1xf32>
    %99 = vector.broadcast %98 : vector<16x1xf32> to vector<16x64xf32>
    %100 = arith.mulf %95, %99 : vector<16x64xf32>
    %101 = vector.broadcast %80 : vector<1x64xf32> to vector<16x64xf32>
    %102 = arith.mulf %100, %101 : vector<16x64xf32>
    %103 = vector.broadcast %82 : vector<1x64xf32> to vector<16x64xf32>
    %104 = arith.addf %102, %103 : vector<16x64xf32>
    %105 = arith.truncf %104 : vector<16x64xf32> to vector<16x64xbf16>
    %c0_39 = arith.constant 0 : index
    %c0_40 = arith.constant 0 : index
    %c0_41 = arith.constant 0 : index
    %106 = vector.load %arg10[%c0_39, %c0_40, %c0_41] : memref<2x64x256xbf16, #tpu.memory_space<vmem>>, vector<1x64x256xbf16>
    %107 = vector.shape_cast %106 : vector<1x64x256xbf16> to vector<64x256xbf16>
    %cst_42 = arith.constant dense<0.000000e+00> : vector<16x256xf32>
    %108 = tpu.matmul %105, %107, %cst_42 {dimension_numbers = #tpu.dot_dimension_numbers<[1], [0], [0], [1], [0, 0, 1, 1], [], []>} : vector<16x64xbf16>, vector<64x256xbf16>, vector<16x256xf32> -> vector<16x256xf32>
    %c0_43 = arith.constant 0 : index
    %c0_44 = arith.constant 0 : index
    %c0_45 = arith.constant 0 : index
    %109 = vector.load %arg11[%c0_43, %c0_44, %c0_45] : memref<2x1x256xf32, #tpu.memory_space<vmem>>, vector<1x1x256xf32>
    %110 = vector.shape_cast %109 : vector<1x1x256xf32> to vector<1x256xf32>
    %111 = vector.broadcast %110 : vector<1x256xf32> to vector<16x256xf32>
    %112 = arith.addf %108, %111 : vector<16x256xf32>
    %cst_46 = arith.constant 5.000000e-01 : f32
    %113 = vector.broadcast %cst_46 : f32 to vector<16x256xf32>
    %114 = arith.mulf %113, %112 : vector<16x256xf32>
    %cst_47 = arith.constant 4.471500e-02 : f32
    %115 = vector.broadcast %cst_47 : f32 to vector<16x256xf32>
    %116 = arith.mulf %115, %112 : vector<16x256xf32>
    %117 = arith.mulf %116, %112 : vector<16x256xf32>
    %118 = arith.mulf %117, %112 : vector<16x256xf32>
    %119 = arith.addf %112, %118 : vector<16x256xf32>
    %cst_48 = arith.constant 0.797884583 : f32
    %120 = vector.broadcast %cst_48 : f32 to vector<16x256xf32>
    %121 = arith.mulf %120, %119 : vector<16x256xf32>
    %122 = math.tanh %121 : vector<16x256xf32>
    %cst_49 = arith.constant 1.000000e+00 : f32
    %123 = vector.broadcast %cst_49 : f32 to vector<16x256xf32>
    %124 = arith.addf %123, %122 : vector<16x256xf32>
    %125 = arith.mulf %114, %124 : vector<16x256xf32>
    %126 = arith.truncf %125 : vector<16x256xf32> to vector<16x256xbf16>
    %c0_50 = arith.constant 0 : index
    %c0_51 = arith.constant 0 : index
    %c0_52 = arith.constant 0 : index
    %127 = vector.load %arg12[%c0_50, %c0_51, %c0_52] : memref<2x256x64xbf16, #tpu.memory_space<vmem>>, vector<1x256x64xbf16>
    %128 = vector.shape_cast %127 : vector<1x256x64xbf16> to vector<256x64xbf16>
    %cst_53 = arith.constant dense<0.000000e+00> : vector<16x64xf32>
    %129 = tpu.matmul %126, %128, %cst_53 {dimension_numbers = #tpu.dot_dimension_numbers<[1], [0], [0], [1], [0, 0, 1, 1], [], []>} : vector<16x256xbf16>, vector<256x64xbf16>, vector<16x64xf32> -> vector<16x64xf32>
    %c0_54 = arith.constant 0 : index
    %c0_55 = arith.constant 0 : index
    %c0_56 = arith.constant 0 : index
    %130 = vector.load %arg13[%c0_54, %c0_55, %c0_56] : memref<2x1x64xf32, #tpu.memory_space<vmem>>, vector<1x1x64xf32>
    %131 = vector.shape_cast %130 : vector<1x1x64xf32> to vector<1x64xf32>
    %132 = vector.broadcast %131 : vector<1x64xf32> to vector<16x64xf32>
    %133 = arith.addf %129, %132 : vector<16x64xf32>
    %134 = arith.addf %78, %133 : vector<16x64xf32>
    %c1 = arith.constant 1 : index
    %c0_57 = arith.constant 0 : index
    %c0_58 = arith.constant 0 : index
    %135 = vector.load %arg3[%c1, %c0_57, %c0_58] : memref<2x1x64xf32, #tpu.memory_space<vmem>>, vector<1x1x64xf32>
    %136 = vector.shape_cast %135 : vector<1x1x64xf32> to vector<1x64xf32>
    %c1_59 = arith.constant 1 : index
    %c0_60 = arith.constant 0 : index
    %c0_61 = arith.constant 0 : index
    %137 = vector.load %arg4[%c1_59, %c0_60, %c0_61] : memref<2x1x64xf32, #tpu.memory_space<vmem>>, vector<1x1x64xf32>
    %138 = vector.shape_cast %137 : vector<1x1x64xf32> to vector<1x64xf32>
    %cst_62 = arith.constant dense<0.000000e+00> : vector<16xf32>
    %139 = vector.multi_reduction <add>, %134, %cst_62 [1] : vector<16x64xf32> to vector<16xf32>
    %140 = vector.shape_cast %139 : vector<16xf32> to vector<16x1xf32>
    %cst_63 = arith.constant 6.400000e+01 : f32
    %141 = vector.broadcast %cst_63 : f32 to vector<16x1xf32>
    %142 = arith.divf %140, %141 : vector<16x1xf32>
    %143 = vector.broadcast %142 : vector<16x1xf32> to vector<16x64xf32>
    %144 = arith.subf %134, %143 : vector<16x64xf32>
    %145 = arith.mulf %144, %144 : vector<16x64xf32>
    %cst_64 = arith.constant dense<0.000000e+00> : vector<16xf32>
    %146 = vector.multi_reduction <add>, %145, %cst_64 [1] : vector<16x64xf32> to vector<16xf32>
    %147 = vector.shape_cast %146 : vector<16xf32> to vector<16x1xf32>
    %cst_65 = arith.constant 6.400000e+01 : f32
    %148 = vector.broadcast %cst_65 : f32 to vector<16x1xf32>
    %149 = arith.divf %147, %148 : vector<16x1xf32>
    %150 = vector.broadcast %142 : vector<16x1xf32> to vector<16x64xf32>
    %151 = arith.subf %134, %150 : vector<16x64xf32>
    %cst_66 = arith.constant 9.99999974E-6 : f32
    %152 = vector.broadcast %cst_66 : f32 to vector<16x1xf32>
    %153 = arith.addf %149, %152 : vector<16x1xf32>
    %154 = math.rsqrt %153 : vector<16x1xf32>
    %155 = vector.broadcast %154 : vector<16x1xf32> to vector<16x64xf32>
    %156 = arith.mulf %151, %155 : vector<16x64xf32>
    %157 = vector.broadcast %136 : vector<1x64xf32> to vector<16x64xf32>
    %158 = arith.mulf %156, %157 : vector<16x64xf32>
    %159 = vector.broadcast %138 : vector<1x64xf32> to vector<16x64xf32>
    %160 = arith.addf %158, %159 : vector<16x64xf32>
    %161 = arith.truncf %160 : vector<16x64xf32> to vector<16x64xbf16>
    %c1_67 = arith.constant 1 : index
    %c0_68 = arith.constant 0 : index
    %c0_69 = arith.constant 0 : index
    %162 = vector.load %arg5[%c1_67, %c0_68, %c0_69] : memref<2x64x192xbf16, #tpu.memory_space<vmem>>, vector<1x64x192xbf16>
    %163 = vector.shape_cast %162 : vector<1x64x192xbf16> to vector<64x192xbf16>
    %cst_70 = arith.constant dense<0.000000e+00> : vector<16x192xf32>
    %164 = tpu.matmul %161, %163, %cst_70 {dimension_numbers = #tpu.dot_dimension_numbers<[1], [0], [0], [1], [0, 0, 1, 1], [], []>} : vector<16x64xbf16>, vector<64x192xbf16>, vector<16x192xf32> -> vector<16x192xf32>
    %165 = vector.extract_strided_slice %164 {offsets = [0, 0], sizes = [16, 64], strides = [1, 1]} : vector<16x192xf32> to vector<16x64xf32>
    %166 = vector.shape_cast %165 : vector<16x64xf32> to vector<16x4x16xf32>
    %167 = tpu.transpose %166, [1, 0, 2] : vector<16x4x16xf32> -> vector<4x16x16xf32>
    %168 = vector.extract_strided_slice %164 {offsets = [0, 64], sizes = [16, 64], strides = [1, 1]} : vector<16x192xf32> to vector<16x64xf32>
    %169 = vector.shape_cast %168 : vector<16x64xf32> to vector<16x4x16xf32>
    %170 = tpu.transpose %169, [1, 0, 2] : vector<16x4x16xf32> -> vector<4x16x16xf32>
    %171 = vector.extract_strided_slice %164 {offsets = [0, 128], sizes = [16, 64], strides = [1, 1]} : vector<16x192xf32> to vector<16x64xf32>
    %172 = vector.shape_cast %171 : vector<16x64xf32> to vector<16x4x16xf32>
    %173 = tpu.transpose %172, [1, 0, 2] : vector<16x4x16xf32> -> vector<4x16x16xf32>
    %174 = arith.truncf %167 : vector<4x16x16xf32> to vector<4x16x16xbf16>
    %175 = arith.truncf %170 : vector<4x16x16xf32> to vector<4x16x16xbf16>
    "tpu.trace_start"() <{level = 10 : i32, message = "hqd,hkd->hqk"}> : () -> ()
    %cst_71 = arith.constant dense<0.000000e+00> : vector<4x16x16xf32>
    %176 = tpu.matmul %174, %175, %cst_71 {dimension_numbers = #tpu.dot_dimension_numbers<[2], [2], [1], [1], [0, 0, 0, 1, 1, 1], [0], [0]>} : vector<4x16x16xbf16>, vector<4x16x16xbf16>, vector<4x16x16xf32> -> vector<4x16x16xf32>
    %cst_72 = arith.constant -1.000000e+30 : f32
    "tpu.trace_stop"() : () -> ()
    %177 = vector.shape_cast %8 : vector<1x16x16xi1> to vector<1x16x16xi1>
    %178 = vector.broadcast %177 : vector<1x16x16xi1> to vector<4x16x16xi1>
    %179 = vector.broadcast %cst_72 : f32 to vector<4x16x16xf32>
    %180 = arith.select %178, %176, %179 : vector<4x16x16xi1>, vector<4x16x16xf32>
    %cst_73 = arith.constant dense<0xFF800000> : vector<4x16xf32>
    %181 = vector.multi_reduction <maximumf>, %180, %cst_73 [2] : vector<4x16x16xf32> to vector<4x16xf32>
    %182 = vector.shape_cast %181 : vector<4x16xf32> to vector<4x16x1xf32>
    %183 = vector.broadcast %182 : vector<4x16x1xf32> to vector<4x16x16xf32>
    %184 = arith.subf %180, %183 : vector<4x16x16xf32>
    %185 = math.exp %184 : vector<4x16x16xf32>
    %cst_74 = arith.constant dense<0.000000e+00> : vector<4x16xf32>
    %186 = vector.multi_reduction <add>, %185, %cst_74 [2] : vector<4x16x16xf32> to vector<4x16xf32>
    %187 = vector.shape_cast %186 : vector<4x16xf32> to vector<4x16x1xf32>
    %188 = arith.truncf %185 : vector<4x16x16xf32> to vector<4x16x16xbf16>
    %189 = arith.truncf %173 : vector<4x16x16xf32> to vector<4x16x16xbf16>
    "tpu.trace_start"() <{level = 10 : i32, message = "hqk,hkd->hqd"}> : () -> ()
    %cst_75 = arith.constant dense<0.000000e+00> : vector<4x16x16xf32>
    %190 = tpu.matmul %188, %189, %cst_75 {dimension_numbers = #tpu.dot_dimension_numbers<[2], [1], [1], [2], [0, 0, 0, 1, 1, 2], [0], [0]>} : vector<4x16x16xbf16>, vector<4x16x16xbf16>, vector<4x16x16xf32> -> vector<4x16x16xf32>
    "tpu.trace_stop"() : () -> ()
    %191 = tpu.reciprocal %187 {approx = true} : vector<4x16x1xf32> -> vector<4x16x1xf32>
    %192 = vector.broadcast %191 : vector<4x16x1xf32> to vector<4x16x16xf32>
    %193 = arith.mulf %190, %192 : vector<4x16x16xf32>
    %194 = tpu.transpose %193, [1, 0, 2] : vector<4x16x16xf32> -> vector<16x4x16xf32>
    %195 = vector.shape_cast %194 : vector<16x4x16xf32> to vector<16x64xf32>
    %196 = arith.truncf %195 : vector<16x64xf32> to vector<16x64xbf16>
    %c1_76 = arith.constant 1 : index
    %c0_77 = arith.constant 0 : index
    %c0_78 = arith.constant 0 : index
    %197 = vector.load %arg6[%c1_76, %c0_77, %c0_78] : memref<2x64x64xbf16, #tpu.memory_space<vmem>>, vector<1x64x64xbf16>
    %198 = vector.shape_cast %197 : vector<1x64x64xbf16> to vector<64x64xbf16>
    %cst_79 = arith.constant dense<0.000000e+00> : vector<16x64xf32>
    %199 = tpu.matmul %196, %198, %cst_79 {dimension_numbers = #tpu.dot_dimension_numbers<[1], [0], [0], [1], [0, 0, 1, 1], [], []>} : vector<16x64xbf16>, vector<64x64xbf16>, vector<16x64xf32> -> vector<16x64xf32>
    %c1_80 = arith.constant 1 : index
    %c0_81 = arith.constant 0 : index
    %c0_82 = arith.constant 0 : index
    %200 = vector.load %arg7[%c1_80, %c0_81, %c0_82] : memref<2x1x64xf32, #tpu.memory_space<vmem>>, vector<1x1x64xf32>
    %201 = vector.shape_cast %200 : vector<1x1x64xf32> to vector<1x64xf32>
    %202 = vector.broadcast %201 : vector<1x64xf32> to vector<16x64xf32>
    %203 = arith.addf %199, %202 : vector<16x64xf32>
    %204 = arith.addf %134, %203 : vector<16x64xf32>
    %c1_83 = arith.constant 1 : index
    %c0_84 = arith.constant 0 : index
    %c0_85 = arith.constant 0 : index
    %205 = vector.load %arg8[%c1_83, %c0_84, %c0_85] : memref<2x1x64xf32, #tpu.memory_space<vmem>>, vector<1x1x64xf32>
    %206 = vector.shape_cast %205 : vector<1x1x64xf32> to vector<1x64xf32>
    %c1_86 = arith.constant 1 : index
    %c0_87 = arith.constant 0 : index
    %c0_88 = arith.constant 0 : index
    %207 = vector.load %arg9[%c1_86, %c0_87, %c0_88] : memref<2x1x64xf32, #tpu.memory_space<vmem>>, vector<1x1x64xf32>
    %208 = vector.shape_cast %207 : vector<1x1x64xf32> to vector<1x64xf32>
    %cst_89 = arith.constant dense<0.000000e+00> : vector<16xf32>
    %209 = vector.multi_reduction <add>, %204, %cst_89 [1] : vector<16x64xf32> to vector<16xf32>
    %210 = vector.shape_cast %209 : vector<16xf32> to vector<16x1xf32>
    %cst_90 = arith.constant 6.400000e+01 : f32
    %211 = vector.broadcast %cst_90 : f32 to vector<16x1xf32>
    %212 = arith.divf %210, %211 : vector<16x1xf32>
    %213 = vector.broadcast %212 : vector<16x1xf32> to vector<16x64xf32>
    %214 = arith.subf %204, %213 : vector<16x64xf32>
    %215 = arith.mulf %214, %214 : vector<16x64xf32>
    %cst_91 = arith.constant dense<0.000000e+00> : vector<16xf32>
    %216 = vector.multi_reduction <add>, %215, %cst_91 [1] : vector<16x64xf32> to vector<16xf32>
    %217 = vector.shape_cast %216 : vector<16xf32> to vector<16x1xf32>
    %cst_92 = arith.constant 6.400000e+01 : f32
    %218 = vector.broadcast %cst_92 : f32 to vector<16x1xf32>
    %219 = arith.divf %217, %218 : vector<16x1xf32>
    %220 = vector.broadcast %212 : vector<16x1xf32> to vector<16x64xf32>
    %221 = arith.subf %204, %220 : vector<16x64xf32>
    %cst_93 = arith.constant 9.99999974E-6 : f32
    %222 = vector.broadcast %cst_93 : f32 to vector<16x1xf32>
    %223 = arith.addf %219, %222 : vector<16x1xf32>
    %224 = math.rsqrt %223 : vector<16x1xf32>
    %225 = vector.broadcast %224 : vector<16x1xf32> to vector<16x64xf32>
    %226 = arith.mulf %221, %225 : vector<16x64xf32>
    %227 = vector.broadcast %206 : vector<1x64xf32> to vector<16x64xf32>
    %228 = arith.mulf %226, %227 : vector<16x64xf32>
    %229 = vector.broadcast %208 : vector<1x64xf32> to vector<16x64xf32>
    %230 = arith.addf %228, %229 : vector<16x64xf32>
    %231 = arith.truncf %230 : vector<16x64xf32> to vector<16x64xbf16>
    %c1_94 = arith.constant 1 : index
    %c0_95 = arith.constant 0 : index
    %c0_96 = arith.constant 0 : index
    %232 = vector.load %arg10[%c1_94, %c0_95, %c0_96] : memref<2x64x256xbf16, #tpu.memory_space<vmem>>, vector<1x64x256xbf16>
    %233 = vector.shape_cast %232 : vector<1x64x256xbf16> to vector<64x256xbf16>
    %cst_97 = arith.constant dense<0.000000e+00> : vector<16x256xf32>
    %234 = tpu.matmul %231, %233, %cst_97 {dimension_numbers = #tpu.dot_dimension_numbers<[1], [0], [0], [1], [0, 0, 1, 1], [], []>} : vector<16x64xbf16>, vector<64x256xbf16>, vector<16x256xf32> -> vector<16x256xf32>
    %c1_98 = arith.constant 1 : index
    %c0_99 = arith.constant 0 : index
    %c0_100 = arith.constant 0 : index
    %235 = vector.load %arg11[%c1_98, %c0_99, %c0_100] : memref<2x1x256xf32, #tpu.memory_space<vmem>>, vector<1x1x256xf32>
    %236 = vector.shape_cast %235 : vector<1x1x256xf32> to vector<1x256xf32>
    %237 = vector.broadcast %236 : vector<1x256xf32> to vector<16x256xf32>
    %238 = arith.addf %234, %237 : vector<16x256xf32>
    %cst_101 = arith.constant 5.000000e-01 : f32
    %239 = vector.broadcast %cst_101 : f32 to vector<16x256xf32>
    %240 = arith.mulf %239, %238 : vector<16x256xf32>
    %cst_102 = arith.constant 4.471500e-02 : f32
    %241 = vector.broadcast %cst_102 : f32 to vector<16x256xf32>
    %242 = arith.mulf %241, %238 : vector<16x256xf32>
    %243 = arith.mulf %242, %238 : vector<16x256xf32>
    %244 = arith.mulf %243, %238 : vector<16x256xf32>
    %245 = arith.addf %238, %244 : vector<16x256xf32>
    %cst_103 = arith.constant 0.797884583 : f32
    %246 = vector.broadcast %cst_103 : f32 to vector<16x256xf32>
    %247 = arith.mulf %246, %245 : vector<16x256xf32>
    %248 = math.tanh %247 : vector<16x256xf32>
    %cst_104 = arith.constant 1.000000e+00 : f32
    %249 = vector.broadcast %cst_104 : f32 to vector<16x256xf32>
    %250 = arith.addf %249, %248 : vector<16x256xf32>
    %251 = arith.mulf %240, %250 : vector<16x256xf32>
    %252 = arith.truncf %251 : vector<16x256xf32> to vector<16x256xbf16>
    %c1_105 = arith.constant 1 : index
    %c0_106 = arith.constant 0 : index
    %c0_107 = arith.constant 0 : index
    %253 = vector.load %arg12[%c1_105, %c0_106, %c0_107] : memref<2x256x64xbf16, #tpu.memory_space<vmem>>, vector<1x256x64xbf16>
    %254 = vector.shape_cast %253 : vector<1x256x64xbf16> to vector<256x64xbf16>
    %cst_108 = arith.constant dense<0.000000e+00> : vector<16x64xf32>
    %255 = tpu.matmul %252, %254, %cst_108 {dimension_numbers = #tpu.dot_dimension_numbers<[1], [0], [0], [1], [0, 0, 1, 1], [], []>} : vector<16x256xbf16>, vector<256x64xbf16>, vector<16x64xf32> -> vector<16x64xf32>
    %c1_109 = arith.constant 1 : index
    %c0_110 = arith.constant 0 : index
    %c0_111 = arith.constant 0 : index
    %256 = vector.load %arg13[%c1_109, %c0_110, %c0_111] : memref<2x1x64xf32, #tpu.memory_space<vmem>>, vector<1x1x64xf32>
    %257 = vector.shape_cast %256 : vector<1x1x64xf32> to vector<1x64xf32>
    %258 = vector.broadcast %257 : vector<1x64xf32> to vector<16x64xf32>
    %259 = arith.addf %255, %258 : vector<16x64xf32>
    %260 = arith.addf %204, %259 : vector<16x64xf32>
    %c0_112 = arith.constant 0 : index
    %c0_113 = arith.constant 0 : index
    %261 = vector.load %arg14[%c0_112, %c0_113] : memref<1x64xf32, #tpu.memory_space<vmem>>, vector<1x64xf32>
    %c0_114 = arith.constant 0 : index
    %c0_115 = arith.constant 0 : index
    %262 = vector.load %arg15[%c0_114, %c0_115] : memref<1x64xf32, #tpu.memory_space<vmem>>, vector<1x64xf32>
    %cst_116 = arith.constant dense<0.000000e+00> : vector<16xf32>
    %263 = vector.multi_reduction <add>, %260, %cst_116 [1] : vector<16x64xf32> to vector<16xf32>
    %264 = vector.shape_cast %263 : vector<16xf32> to vector<16x1xf32>
    %cst_117 = arith.constant 6.400000e+01 : f32
    %265 = vector.broadcast %cst_117 : f32 to vector<16x1xf32>
    %266 = arith.divf %264, %265 : vector<16x1xf32>
    %267 = vector.broadcast %266 : vector<16x1xf32> to vector<16x64xf32>
    %268 = arith.subf %260, %267 : vector<16x64xf32>
    %269 = arith.mulf %268, %268 : vector<16x64xf32>
    %cst_118 = arith.constant dense<0.000000e+00> : vector<16xf32>
    %270 = vector.multi_reduction <add>, %269, %cst_118 [1] : vector<16x64xf32> to vector<16xf32>
    %271 = vector.shape_cast %270 : vector<16xf32> to vector<16x1xf32>
    %cst_119 = arith.constant 6.400000e+01 : f32
    %272 = vector.broadcast %cst_119 : f32 to vector<16x1xf32>
    %273 = arith.divf %271, %272 : vector<16x1xf32>
    %274 = vector.broadcast %266 : vector<16x1xf32> to vector<16x64xf32>
    %275 = arith.subf %260, %274 : vector<16x64xf32>
    %cst_120 = arith.constant 9.99999974E-6 : f32
    %276 = vector.broadcast %cst_120 : f32 to vector<16x1xf32>
    %277 = arith.addf %273, %276 : vector<16x1xf32>
    %278 = math.rsqrt %277 : vector<16x1xf32>
    %279 = vector.broadcast %278 : vector<16x1xf32> to vector<16x64xf32>
    %280 = arith.mulf %275, %279 : vector<16x64xf32>
    %281 = vector.broadcast %261 : vector<1x64xf32> to vector<16x64xf32>
    %282 = arith.mulf %280, %281 : vector<16x64xf32>
    %283 = vector.broadcast %262 : vector<1x64xf32> to vector<16x64xf32>
    %284 = arith.addf %282, %283 : vector<16x64xf32>
    %285 = arith.truncf %284 : vector<16x64xf32> to vector<16x64xbf16>
    %c0_121 = arith.constant 0 : index
    %c0_122 = arith.constant 0 : index
    %286 = vector.load %arg16[%c0_121, %c0_122] : memref<64x256xbf16, #tpu.memory_space<vmem>>, vector<64x256xbf16>
    %cst_123 = arith.constant dense<0.000000e+00> : vector<16x256xf32>
    %287 = tpu.matmul %285, %286, %cst_123 {dimension_numbers = #tpu.dot_dimension_numbers<[1], [0], [0], [1], [0, 0, 1, 1], [], []>} : vector<16x64xbf16>, vector<64x256xbf16>, vector<16x256xf32> -> vector<16x256xf32>
    %c0_124 = arith.constant 0 : index
    %c0_125 = arith.constant 0 : index
    %288 = vector.load %arg17[%c0_124, %c0_125] : memref<16x256xf32, #tpu.memory_space<vmem>>, vector<16x256xf32>
    tpu.vector_store %arg17[%c0_124, %c0_125], %287 {strides = array<i32>} : memref<16x256xf32, #tpu.memory_space<vmem>>, vector<16x256xf32>,
    return
  }
  func.func @transform_0(%arg0: i32, %arg1: memref<1xi32, #tpu.memory_space<smem>>) -> (i32, i32) {
    %c0_i32 = arith.constant 0 : i32
    %c0_i32_0 = arith.constant 0 : i32
    %c0_i32_1 = arith.constant 0 : i32
    return %c0_i32, %c0_i32_0 : i32, i32
  }
  func.func @transform_1(%arg0: i32, %arg1: memref<1xi32, #tpu.memory_space<smem>>) -> (i32, i32, i32) {
    %c0_i32 = arith.constant 0 : i32
    %c0_i32_0 = arith.constant 0 : i32
    %c0_i32_1 = arith.constant 0 : i32
    %c0_i32_2 = arith.constant 0 : i32
    return %c0_i32, %c0_i32_0, %c0_i32_1 : i32, i32, i32
  }
  func.func @transform_2(%arg0: i32, %arg1: memref<1xi32, #tpu.memory_space<smem>>) -> (i32, i32, i32) {
    %c0_i32 = arith.constant 0 : i32
    %c0_i32_0 = arith.constant 0 : i32
    %c0_i32_1 = arith.constant 0 : i32
    %c0_i32_2 = arith.constant 0 : i32
    return %c0_i32, %c0_i32_0, %c0_i32_1 : i32, i32, i32
  }
  func.func @transform_3(%arg0: i32, %arg1: memref<1xi32, #tpu.memory_space<smem>>) -> (i32, i32, i32) {
    %c0_i32 = arith.constant 0 : i32
    %c0_i32_0 = arith.constant 0 : i32
    %c0_i32_1 = arith.constant 0 : i32
    %c0_i32_2 = arith.constant 0 : i32
    return %c0_i32, %c0_i32_0, %c0_i32_1 : i32, i32, i32
  }
  func.func @transform_4(%arg0: i32, %arg1: memref<1xi32, #tpu.memory_space<smem>>) -> (i32, i32, i32) {
    %c0_i32 = arith.constant 0 : i32
    %c0_i32_0 = arith.constant 0 : i32
    %c0_i32_1 = arith.constant 0 : i32
    %c0_i32_2 = arith.constant 0 : i32
    return %c0_i32, %c0_i32_0, %c0_i32_1 : i32, i32, i32
  }
  func.func @transform_5(%arg0: i32, %arg1: memref<1xi32, #tpu.memory_space<smem>>) -> (i32, i32, i32) {
    %c0_i32 = arith.constant 0 : i32
    %c0_i32_0 = arith.constant 0 : i32
    %c0_i32_1 = arith.constant 0 : i32
    %c0_i32_2 = arith.constant 0 : i32
    return %c0_i32, %c0_i32_0, %c0_i32_1 : i32, i32, i32
  }
  func.func @transform_6(%arg0: i32, %arg1: memref<1xi32, #tpu.memory_space<smem>>) -> (i32, i32, i32) {
    %c0_i32 = arith.constant 0 : i32
    %c0_i32_0 = arith.constant 0 : i32
    %c0_i32_1 = arith.constant 0 : i32
    %c0_i32_2 = arith.constant 0 : i32
    return %c0_i32, %c0_i32_0, %c0_i32_1 : i32, i32, i32
  }
  func.func @transform_7(%arg0: i32, %arg1: memref<1xi32, #tpu.memory_space<smem>>) -> (i32, i32, i32) {
    %c0_i32 = arith.constant 0 : i32
    %c0_i32_0 = arith.constant 0 : i32
    %c0_i32_1 = arith.constant 0 : i32
    %c0_i32_2 = arith.constant 0 : i32
    return %c0_i32, %c0_i32_0, %c0_i32_1 : i32, i32, i32
  }
  func.func @transform_8(%arg0: i32, %arg1: memref<1xi32, #tpu.memory_space<smem>>) -> (i32, i32, i32) {
    %c0_i32 = arith.constant 0 : i32
    %c0_i32_0 = arith.constant 0 : i32
    %c0_i32_1 = arith.constant 0 : i32
    %c0_i32_2 = arith.constant 0 : i32
    return %c0_i32, %c0_i32_0, %c0_i32_1 : i32, i32, i32
  }
  func.func @transform_9(%arg0: i32, %arg1: memref<1xi32, #tpu.memory_space<smem>>) -> (i32, i32, i32) {
    %c0_i32 = arith.constant 0 : i32
    %c0_i32_0 = arith.constant 0 : i32
    %c0_i32_1 = arith.constant 0 : i32
    %c0_i32_2 = arith.constant 0 : i32
    return %c0_i32, %c0_i32_0, %c0_i32_1 : i32, i32, i32
  }
  func.func @transform_10(%arg0: i32, %arg1: memref<1xi32, #tpu.memory_space<smem>>) -> (i32, i32, i32) {
    %c0_i32 = arith.constant 0 : i32
    %c0_i32_0 = arith.constant 0 : i32
    %c0_i32_1 = arith.constant 0 : i32
    %c0_i32_2 = arith.constant 0 : i32
    return %c0_i32, %c0_i32_0, %c0_i32_1 : i32, i32, i32
  }
  func.func @transform_11(%arg0: i32, %arg1: memref<1xi32, #tpu.memory_space<smem>>) -> (i32, i32, i32) {
    %c0_i32 = arith.constant 0 : i32
    %c0_i32_0 = arith.constant 0 : i32
    %c0_i32_1 = arith.constant 0 : i32
    %c0_i32_2 = arith.constant 0 : i32
    return %c0_i32, %c0_i32_0, %c0_i32_1 : i32, i32, i32
  }
  func.func @transform_12(%arg0: i32, %arg1: memref<1xi32, #tpu.memory_space<smem>>) -> (i32, i32) {
    %c0_i32 = arith.constant 0 : i32
    %c0_i32_0 = arith.constant 0 : i32
    %c0_i32_1 = arith.constant 0 : i32
    return %c0_i32, %c0_i32_0 : i32, i32
  }
  func.func @transform_13(%arg0: i32, %arg1: memref<1xi32, #tpu.memory_space<smem>>) -> (i32, i32) {
    %c0_i32 = arith.constant 0 : i32
    %c0_i32_0 = arith.constant 0 : i32
    %c0_i32_1 = arith.constant 0 : i32
    return %c0_i32, %c0_i32_0 : i32, i32
  }
  func.func @transform_14(%arg0: i32, %arg1: memref<1xi32, #tpu.memory_space<smem>>) -> (i32, i32) {
    %c0_i32 = arith.constant 0 : i32
    %c0_i32_0 = arith.constant 0 : i32
    %c0_i32_1 = arith.constant 0 : i32
    return %c0_i32, %c0_i32_0 : i32, i32
  }
  func.func @transform_15(%arg0: i32, %arg1: memref<1xi32, #tpu.memory_space<smem>>) -> (i32, i32) {
    %c0_i32 = arith.constant 0 : i32
    %c0_i32_0 = arith.constant 0 : i32
    %c0_i32_1 = arith.constant 0 : i32
    return %c0_i32, %c0_i32_0 : i32, i32
  }
}

</mosaic_0001>

<bundles_post_ra>
// kernel: gptneo_forward.1
= control target key start
LH: loop header
LB: loop body
LE: loop exit
PB: predicated region body
PF: predicated region fallthrough
CT: control target
= control target key end

     0   :  { %s6532_s0 = inlined_call_operand.<no memory space> [shape: s32[1], index: 0, kind: input, shape index: {}]   ;;  %s6533_s1 = inlined_call_operand.vmem [shape: f32[16,64], index: 1, kind: input, shape index: {}]   ;;  %s6534_s2 = inlined_call_operand.vmem [shape: f32[2,1,64], index: 2, kind: input, shape index: {}]   ;;  %s6535_s3 = inlined_call_operand.vmem [shape: f32[2,1,64], index: 3, kind: input, shape index: {}]   ;;  %s6536_s4 = inlined_call_operand.vmem [shape: bf16[2,64,192], index: 4, kind: input, shape index: {}]   ;;  %s6537_s5 = inlined_call_operand.vmem [shape: bf16[2,64,64], index: 5, kind: input, shape index: {}]   ;;  %s6538_s6 = inlined_call_operand.vmem [shape: f32[2,1,64], index: 6, kind: input, shape index: {}]   ;;  %s6539_s7 = inlined_call_operand.vmem [shape: f32[2,1,64], index: 7, kind: input, shape index: {}]   ;;  %s6540_s8 = inlined_call_operand.vmem [shape: f32[2,1,64], index: 8, kind: input, shape index: {}]   ;;  %s6541_s9 = inlined_call_operand.vmem [shape: bf16[2,64,256], index: 9, kind: input, shape index: {}]   ;;  %s6542_s10 = inlined_call_operand.vmem [shape: f32[2,1,256], index: 10, kind: input, shape index: {}]   ;;  %s6543_s11 = inlined_call_operand.vmem [shape: bf16[2,256,64], index: 11, kind: input, shape index: {}]   ;;  %s6544_s12 = inlined_call_operand.vmem [shape: f32[2,1,64], index: 12, kind: input, shape index: {}]   ;;  %s6545_s13 = inlined_call_operand.vmem [shape: f32[1,64], index: 13, kind: input, shape index: {}]   ;;  %s6546_s14 = inlined_call_operand.vmem [shape: f32[1,64], index: 14, kind: input, shape index: {}]   ;;  %s6547_s15 = inlined_call_operand.vmem [shape: bf16[64,256], index: 15, kind: input, shape index: {}]   ;;  %s6548_s16 = inlined_call_operand.hbm [shape: f32[16,256], index: 16, kind: output, shape index: {}]  }
   0x1   :  { %6550 = sst [smem:[#allocation7_spill]] %s6532_s0 }
   0x2   :  { %v54_v0 = vld [vmem:[%s6533_s1] sm:$0xff]  ;;  %vm70_vm0 = vcmask 523264   ;;  %v55_v1 = vld [vmem:[%s6533_s1 + $0x8] sm:$0xff] }
   0x3   :  { %v71_v2 = vsel %vm70_vm0, %v54_v0, 0.0  ;;  %v74_v3 = vsel %vm70_vm0, %v55_v1, 0.0 }
   0x4   :  { %72 = vadd.xlane.f32.xlu0 %v71_v2 }
   0x8   :  { %75 = vadd.xlane.f32.xlu0 %v74_v3 }
   0x9   :  { %22 = vsyncpa [#allocation5], 0  ;;  %v5209_v14 = vld [vmem:[%s6536_s4 + $0x4] ss:$8 sps:$4 sm:$0xff]   ;;  %v5211_v15 = vld [vmem:[%s6536_s4] ss:$8 sps:$4 sm:$0xff]   ;;  %v57_v44 = vlaneseq }
   0xa   :  { %166 = vmatprep.subr.bf16.mxu0 %v5209_v14  ;;  %v5212_v16 = vld [vmem:[%s6536_s4 + $0x14] ss:$8 sps:$4 sm:$0xff]   ;;  %v5214_v17 = vld [vmem:[%s6536_s4 + $0x10] ss:$8 sps:$4 sm:$0xff]   ;;  %v5215_v18 = vld [vmem:[%s6536_s4 + $0x24] ss:$8 sps:$4 sm:$0xff]  }
   0xb   :  { %167 = vmatpush1.bf16.msra.mxu0 %v5211_v15  ;;  %v5217_v19 = vld [vmem:[%s6536_s4 + $0x20] ss:$8 sps:$4 sm:$0xff]   ;;  %v5218_v20 = vld [vmem:[%s6536_s4 + $0x34] ss:$8 sps:$4 sm:$0xff]   ;;  %v5220_v21 = vld [vmem:[%s6536_s4 + $0x30] ss:$8 sps:$4 sm:$0xff]  }
   0xc   :  { %168 = vmatprep.subr.bf16.mxu0 %v5212_v16  ;;  %v5435_v22 = vmov 0   ;;  %v4747_v31 = vld [vmem:[%s6534_s2] ss:$0 sm:$0xff]  ;;  %s5436_s30 = smov 96   ;;  %s5437_s0 = smov 112   ;;  %v5595_v49 = vshrl.u32 %v57_v44, 7 }
   0xd   :  { %198 = vmatprep.mubr.bf16.mxu0 %v5435_v22  ;;  %v4748_v35 = vld [vmem:[%s6535_s3] ss:$0 sm:$0xff]  ;;  %s5438_s17 = smov 80   ;;  %s5439_s18 = smov 64   ;;  %v5440_v45 = vmov 1983009808  }
   0xe   :  { %v232_v46 = vunpack.c.l.s4 %v5440_v45  ;;  %v5441_v47 = vmov 1934713408   ;;  %vm5443_vm1 = vmmov 0   ;;  %vm1097_vm2 = vcmask 130048   ;;  %s6551_s21 = sld [smem:[#allocation7_spill]]  ;;  %s5444_s19 = smov 32  }
   0xf   :  { %169 = vmatpush1.bf16.msra.mxu0 %v5214_v17  ;;  %v264_v48 = vunpack.c.l.s4 %v5441_v47  ;;  %s5445_s20 = smov 16   ;;  %vm1868_vm8 = vcmask 261120   ;;  %vm1871_vm9 = vcmask 392192   ;;  %s6556_s25 = smov 48  }
  0x10   :  { %170 = vmatprep.subr.bf16.mxu0 %v5215_v18  ;;  %v233_v50 = vunpack.c.0.s8 %v232_v46 }
  0x11   :  { %v265_v55 = vunpack.c.0.s8 %v264_v48 }
  0x12   :  { %v5599_v56 = vsub.s32 %v233_v50, %v5595_v49 }
  0x13   :  { %171 = vmatpush1.bf16.msra.mxu0 %v5217_v19  ;;  %v5604_v61 = vsub.s32 %v265_v55, %v5595_v49  ;;  %v5442_v55 = vmov 0.0  }
  0x14   :  { %172 = vmatprep.subr.bf16.mxu0 %v5218_v20  ;;  %5045 = vmatprep.subr.bf16.mxu1 %v5442_v55 }
  0x15   :  { %5047 = vmatprep.mubr.msk.bf16.mxu1 %vm5443_vm1, %v5442_v55 }
  0x17   :  { %173 = vmatpush1.bf16.msra.mxu0 %v5220_v21 }
  0x18   :  { %5069 = vmatprep.subr.bf16.mxu0 %v5442_v55 }
  0x91   :  { %v73_v4 = vpop.xlane.xlu0 %72 }
  0x92   :  { %v78_v5 = vmul.f32 0.015625, %v73_v4 }
  0x94   :  { %v80_v6 = vsub.f32 %v54_v0, %v78_v5 }
  0x95   :  { %v76_v7 = vpop.xlane.xlu0 %75 }
  0x96   :  { %v79_v8 = vmul.f32 0.015625, %v76_v7  ;;  %v82_v9 = vmul.f32 %v80_v6, %v80_v6 }
  0x98   :  { %v81_v10 = vsub.f32 %v55_v1, %v79_v8  ;;  %v84_v11 = vsel %vm70_vm0, %v82_v9, 0.0 }
  0x99   :  { %85 = vadd.xlane.f32.xlu1 %v84_v11 }
  0x9a   :  { %v83_v12 = vmul.f32 %v81_v10, %v81_v10 }
  0x9c   :  { %v87_v13 = vsel %vm70_vm0, %v83_v12, 0.0 }
  0x9d   :  { %88 = vadd.xlane.f32.xlu1 %v87_v13 }
 0x126   :  { %v86_v23 = vpop.xlane.xlu1 %85 }
 0x127   :  { %v90_v24 = vmul.f32 0.015625, %v86_v23 }
 0x129   :  { %v92_v25 = vadd.f32 1e-05, %v90_v24 }
 0x12a   :  { %v89_v26 = vpop.xlane.xlu1 %88 }
 0x12b   :  { %5309 = vrsqrt.f32 %v92_v25  ;;  %v91_v27 = vmul.f32 0.015625, %v89_v26 }
 0x12d   :  { %v93_v28 = vadd.f32 1e-05, %v91_v27 }
 0x12f   :  { %5311 = vrsqrt.f32 %v93_v28 }
 0x135   :  { %v5310_v29 = vpop.eup %5309 }
 0x136   :  { %v96_v30 = vmul.f32 %v5310_v29, %v80_v6 }
 0x138   :  { %v104_v34 = vmul.f32 %v4747_v31, %v96_v30 }
 0x139   :  { %v5312_v32 = vpop.eup %5311 }
 0x13a   :  { %v97_v33 = vmul.f32 %v5312_v32, %v81_v10  ;;  %v112_v37 = vadd.f32 %v4748_v35, %v104_v34 }
 0x13c   :  { %v105_v36 = vmul.f32 %v4747_v31, %v97_v33 }
 0x13e   :  { %v113_v38 = vadd.f32 %v4748_v35, %v105_v36 }
 0x140   :  { %v114_v39 = vpack.c.bf16 %v113_v38, %v112_v37 }
 0x142   :  { %4757 = vmatmul.mubr.msk.bf16.vlgmr.msra.gmra.mrb[0].mxu0 %vm70_vm0, %v114_v39 }
 0x143   :  { %5071 = vmatprep.mubr.msk.bf16.mxu0 %vm5443_vm1, %v5442_v55 }
 0x215   :  { %v200_v40 = vpop.f32.mrb[0].mxu0 }
 0x216   :  { %217 = vrot.lane.b32.xlu1 %v200_v40, %s5436_s30  ;;  %211 = vrot.lane.b32.xlu0 %v200_v40, %s5437_s0  ;;  %v5578_v41 = vpop.f32.mrb[1].mxu0 }
 0x217   :  { %v5580_v42 = vpop.f32.mrb[2].mxu0 }
 0x218   :  { %v5582_v43 = vpop.f32.mrb[3].mxu0 }
 0x21a   :  { %223 = vrot.lane.b32.xlu0 %v200_v40, %s5438_s17  ;;  %213 = vrot.lane.b32.xlu1 %v5580_v42, %s5437_s0 }
 0x21e   :  { %501 = vrot.lane.b32.xlu0 %v200_v40, %s5439_s18  ;;  %219 = vrot.lane.b32.xlu1 %v5580_v42, %s5436_s30 }
 0x222   :  { %225 = vrot.lane.b32.xlu1 %v5580_v42, %s5438_s17 }
 0x226   :  { %503 = vrot.lane.b32.xlu1 %v5580_v42, %s5439_s18 }
 0x288   :  { %v218_v51 = vpop.permute.xlu1 %217  ;;  %v212_v52 = vpop.permute.xlu0 %211 }
 0x289   :  { %v229_v53 = vcombine.low %v200_v40, %v218_v51  ;;  %v230_v54 = vcombine.high %v200_v40, %v218_v51  ;;  %505 = vrot.lane.b32.xlu0 %v212_v52, %s5439_s18 }
 0x28b   :  { %v237_v62 = vrot.slane %v229_v53, %v5599_v56  ;;  %v244_v63 = vrot.slane %v230_v54, %v5599_v56 }
 0x28c   :  { %v224_v57 = vpop.permute.xlu0 %223  ;;  %v214_v58 = vpop.permute.xlu1 %213 }
 0x28d   :  { %v245_v59 = vcombine.low %v212_v52, %v224_v57  ;;  %v246_v60 = vcombine.high %v212_v52, %v224_v57  ;;  %509 = vrot.lane.b32.xlu0 %v218_v51, %s5439_s18  ;;  %507 = vrot.lane.b32.xlu1 %v214_v58, %s5439_s18 }
 0x28f   :  { %v253_v0 = vrot.slane %v245_v59, %v5599_v56  ;;  %v260_v1 = vrot.slane %v246_v60, %v5599_v56 }
 0x290   :  { %v220_v2 = vpop.permute.xlu1 %219 }
 0x291   :  { %v261_v3 = vcombine.low %v237_v62, %v253_v0  ;;  %v262_v4 = vcombine.high %v237_v62, %v253_v0  ;;  %v277_v5 = vcombine.low %v244_v63, %v260_v1  ;;  %v278_v6 = vcombine.high %v244_v63, %v260_v1  ;;  %513 = vrot.lane.b32.xlu0 %v224_v57, %s5439_s18 }
 0x292   :  { %v297_v7 = vcombine.low %v5580_v42, %v220_v2  ;;  %v298_v8 = vcombine.high %v5580_v42, %v220_v2  ;;  %511 = vrot.lane.b32.xlu1 %v220_v2, %s5439_s18 }
 0x293   :  { %v269_v9 = vrot.slane %v261_v3, %v5604_v61  ;;  %v276_v10 = vrot.slane %v262_v4, %v5604_v61  ;;  %v285_v11 = vrot.slane %v277_v5, %v5604_v61  ;;  %v292_v12 = vrot.slane %v278_v6, %v5604_v61 }
 0x294   :  { %v226_v13 = vpop.permute.xlu1 %225  ;;  %v305_v25 = vrot.slane %v297_v7, %v5599_v56  ;;  %v312_v26 = vrot.slane %v298_v8, %v5599_v56 }
 0x295   :  { %v365_v14 = vcombine.low %v269_v9, %v276_v10  ;;  %v4758_v15 = vcombine.high %v269_v9, %v276_v10  ;;  %v381_v16 = vcombine.low %v285_v11, %v292_v12  ;;  %v4759_v17 = vcombine.high %v285_v11, %v292_v12  ;;  %799 = vrot.lane.b32.xlu0 %v5578_v41, %s5437_s0 }
 0x296   :  { %v313_v18 = vcombine.low %v214_v58, %v226_v13  ;;  %v314_v19 = vcombine.high %v214_v58, %v226_v13  ;;  %515 = vrot.lane.b32.xlu1 %v226_v13, %s5439_s18 }
 0x297   :  { %v372_v20 = vrot.slane %v365_v14, %v5599_v56  ;;  %v380_v21 = vrot.slane %v4758_v15, %v5599_v56  ;;  %v388_v23 = vrot.slane %v381_v16, %v5599_v56  ;;  %v396_v24 = vrot.slane %v4759_v17, %v5599_v56  ;;  %v502_v16 = vpop.permute.xlu0 %501 }
 0x298   :  { %v321_v27 = vrot.slane %v313_v18, %v5599_v56  ;;  %v328_v28 = vrot.slane %v314_v19, %v5599_v56  ;;  %v504_v17 = vpop.permute.xlu1 %503 }
 0x299   :  { %v398_v29 = vcombine.high %v372_v20, %v380_v21  ;;  %v414_v30 = vcombine.high %v388_v23, %v396_v24  ;;  %811 = vrot.lane.b32.xlu0 %v5578_v41, %s5438_s17  ;;  %v397_v31 = vcombine.low %v372_v20, %v380_v21  ;;  %v413_v32 = vcombine.low %v388_v23, %v396_v24 }
 0x29a   :  { %v329_v33 = vcombine.low %v305_v25, %v321_v27  ;;  %v330_v34 = vcombine.high %v305_v25, %v321_v27  ;;  %v345_v35 = vcombine.low %v312_v26, %v328_v28  ;;  %v346_v36 = vcombine.high %v312_v26, %v328_v28  ;;  %801 = vrot.lane.b32.xlu1 %v5582_v43, %s5437_s0 }
 0x29b   :  { %v405_v37 = vrot.slane %v397_v31, %v5604_v61  ;;  %v421_v38 = vrot.slane %v413_v32, %v5604_v61  ;;  %v412_v39 = vrot.slane %v398_v29, %v5604_v61  ;;  %v428_v40 = vrot.slane %v414_v30, %v5604_v61 }
 0x29c   :  { %v337_v42 = vrot.slane %v329_v33, %v5604_v61  ;;  %v344_v45 = vrot.slane %v330_v34, %v5604_v61  ;;  %v353_v46 = vrot.slane %v345_v35, %v5604_v61  ;;  %v360_v47 = vrot.slane %v346_v36, %v5604_v61 }
 0x29d   :  { %v429_v48 = vcombine.low %v405_v37, %v421_v38  ;;  %v430_v50 = vcombine.high %v405_v37, %v421_v38  ;;  %v431_v57 = vcombine.low %v412_v39, %v428_v40  ;;  %v432_v58 = vcombine.high %v412_v39, %v428_v40 }
 0x29e   :  { %v433_v51 = vcombine.low %v337_v42, %v344_v45  ;;  %v4760_v52 = vcombine.high %v337_v42, %v344_v45  ;;  %v449_v53 = vcombine.low %v353_v46, %v360_v47  ;;  %v4761_v54 = vcombine.high %v353_v46, %v360_v47  ;;  %805 = vrot.lane.b32.xlu1 %v5578_v41, %s5436_s30 }
 0x2a0   :  { %v440_v59 = vrot.slane %v433_v51, %v5599_v56  ;;  %v448_v60 = vrot.slane %v4760_v52, %v5599_v56  ;;  %v456_v62 = vrot.slane %v449_v53, %v5599_v56  ;;  %v464_v63 = vrot.slane %v4761_v54, %v5599_v56 }
 0x2a2   :  { %v466_v0 = vcombine.high %v440_v59, %v448_v60  ;;  %v482_v1 = vcombine.high %v456_v62, %v464_v63  ;;  %807 = vrot.lane.b32.xlu1 %v5582_v43, %s5436_s30  ;;  %v465_v2 = vcombine.low %v440_v59, %v448_v60  ;;  %v481_v3 = vcombine.low %v456_v62, %v464_v63 }
 0x2a4   :  { %v473_v4 = vrot.slane %v465_v2, %v5604_v61  ;;  %v480_v5 = vrot.slane %v466_v0, %v5604_v61  ;;  %v496_v6 = vrot.slane %v482_v1, %v5604_v61  ;;  %v489_v7 = vrot.slane %v481_v3, %v5604_v61 }
 0x2a6   :  { %v499_v8 = vcombine.low %v480_v5, %v496_v6  ;;  %v500_v9 = vcombine.high %v480_v5, %v496_v6  ;;  %v497_v10 = vcombine.low %v473_v4, %v489_v7  ;;  %v498_v11 = vcombine.high %v473_v4, %v489_v7 }
 0x2a8   :  { %v5659_v12 = vpack.c.bf16 %v499_v8, %v431_v57  ;;  %v5661_v13 = vpack.c.bf16 %v500_v9, %v432_v58  ;;  %v5663_v14 = vpack.c.bf16 %v497_v10, %v429_v48  ;;  %v5665_v15 = vpack.c.bf16 %v498_v11, %v430_v50 }
 0x2fb   :  { %v506_v18 = vpop.permute.xlu0 %505 }
 0x2ff   :  { %v510_v19 = vpop.permute.xlu0 %509  ;;  %v508_v20 = vpop.permute.xlu1 %507 }
 0x300   :  { %v525_v21 = vcombine.low %v502_v16, %v510_v19  ;;  %v526_v23 = vcombine.high %v502_v16, %v510_v19 }
 0x302   :  { %v533_v28 = vrot.slane %v525_v21, %v5599_v56  ;;  %v540_v29 = vrot.slane %v526_v23, %v5599_v56 }
 0x303   :  { %v514_v24 = vpop.permute.xlu0 %513 }
 0x304   :  { %v541_v25 = vcombine.low %v506_v18, %v514_v24  ;;  %v542_v26 = vcombine.high %v506_v18, %v514_v24  ;;  %v512_v27 = vpop.permute.xlu1 %511 }
 0x305   :  { %v593_v32 = vcombine.low %v504_v17, %v512_v27  ;;  %v594_v33 = vcombine.high %v504_v17, %v512_v27 }
 0x306   :  { %v549_v30 = vrot.slane %v541_v25, %v5599_v56  ;;  %v556_v31 = vrot.slane %v542_v26, %v5599_v56 }
 0x307   :  { %v601_v48 = vrot.slane %v593_v32, %v5599_v56  ;;  %v608_v50 = vrot.slane %v594_v33, %v5599_v56 }
 0x308   :  { %v557_v34 = vcombine.low %v533_v28, %v549_v30  ;;  %v558_v35 = vcombine.high %v533_v28, %v549_v30  ;;  %v573_v36 = vcombine.low %v540_v29, %v556_v31  ;;  %v574_v37 = vcombine.high %v540_v29, %v556_v31  ;;  %v516_v38 = vpop.permute.xlu1 %515 }
 0x309   :  { %v609_v39 = vcombine.low %v508_v20, %v516_v38  ;;  %v610_v40 = vcombine.high %v508_v20, %v516_v38 }
 0x30a   :  { %v565_v42 = vrot.slane %v557_v34, %v5604_v61  ;;  %v572_v45 = vrot.slane %v558_v35, %v5604_v61  ;;  %v581_v46 = vrot.slane %v573_v36, %v5604_v61  ;;  %v588_v47 = vrot.slane %v574_v37, %v5604_v61 }
 0x30b   :  { %v617_v51 = vrot.slane %v609_v39, %v5599_v56  ;;  %v624_v52 = vrot.slane %v610_v40, %v5599_v56 }
 0x30c   :  { %v661_v53 = vcombine.low %v565_v42, %v572_v45  ;;  %v4762_v54 = vcombine.high %v565_v42, %v572_v45  ;;  %v677_v57 = vcombine.low %v581_v46, %v588_v47  ;;  %v4763_v58 = vcombine.high %v581_v46, %v588_v47 }
 0x30d   :  { %v625_v59 = vcombine.low %v601_v48, %v617_v51  ;;  %v626_v60 = vcombine.high %v601_v48, %v617_v51  ;;  %v641_v62 = vcombine.low %v608_v50, %v624_v52  ;;  %v642_v63 = vcombine.high %v608_v50, %v624_v52 }
 0x30e   :  { %v668_v0 = vrot.slane %v661_v53, %v5599_v56  ;;  %v676_v1 = vrot.slane %v4762_v54, %v5599_v56  ;;  %v684_v6 = vrot.slane %v677_v57, %v5599_v56  ;;  %v692_v7 = vrot.slane %v4763_v58, %v5599_v56 }
 0x30f   :  { %v633_v2 = vrot.slane %v625_v59, %v5604_v61  ;;  %v640_v3 = vrot.slane %v626_v60, %v5604_v61  ;;  %v649_v4 = vrot.slane %v641_v62, %v5604_v61  ;;  %v656_v5 = vrot.slane %v642_v63, %v5604_v61 }
 0x310   :  { %v693_v16 = vcombine.low %v668_v0, %v676_v1  ;;  %v709_v17 = vcombine.low %v684_v6, %v692_v7  ;;  %v694_v37 = vcombine.high %v668_v0, %v676_v1  ;;  %v710_v38 = vcombine.high %v684_v6, %v692_v7 }
 0x311   :  { %v729_v8 = vcombine.low %v633_v2, %v640_v3  ;;  %v4764_v9 = vcombine.high %v633_v2, %v640_v3  ;;  %v745_v10 = vcombine.low %v649_v4, %v656_v5  ;;  %v4765_v11 = vcombine.high %v649_v4, %v656_v5 }
 0x312   :  { %v701_v25 = vrot.slane %v693_v16, %v5604_v61  ;;  %v717_v26 = vrot.slane %v709_v17, %v5604_v61  ;;  %v708_v45 = vrot.slane %v694_v37, %v5604_v61  ;;  %v724_v46 = vrot.slane %v710_v38, %v5604_v61 }
 0x313   :  { %v736_v18 = vrot.slane %v729_v8, %v5599_v56  ;;  %v744_v19 = vrot.slane %v4764_v9, %v5599_v56  ;;  %v752_v20 = vrot.slane %v745_v10, %v5599_v56  ;;  %v760_v21 = vrot.slane %v4765_v11, %v5599_v56 }
 0x314   :  { %v725_v29 = vcombine.low %v701_v25, %v717_v26  ;;  %v726_v36 = vcombine.high %v701_v25, %v717_v26  ;;  %v727_v50 = vcombine.low %v708_v45, %v724_v46  ;;  %v59_v58 = vadd.s32 8, %v5595_v49 }
 0x315   :  { %v761_v23 = vcombine.low %v736_v18, %v744_v19  ;;  %v777_v24 = vcombine.low %v752_v20, %v760_v21  ;;  %v762_v34 = vcombine.high %v736_v18, %v744_v19  ;;  %v778_v35 = vcombine.high %v752_v20, %v760_v21 }
 0x317   :  { %v769_v27 = vrot.slane %v761_v23, %v5604_v61  ;;  %v785_v28 = vrot.slane %v777_v24, %v5604_v61  ;;  %v776_v40 = vrot.slane %v762_v34, %v5604_v61  ;;  %v792_v42 = vrot.slane %v778_v35, %v5604_v61  ;;  %v800_v34 = vpop.permute.xlu0 %799 }
 0x319   :  { %v793_v30 = vcombine.low %v769_v27, %v785_v28  ;;  %v794_v33 = vcombine.high %v769_v27, %v785_v28  ;;  %v795_v48 = vcombine.low %v776_v40, %v792_v42  ;;  %v796_v53 = vcombine.high %v776_v40, %v792_v42 }
 0x31b   :  { %v1093_v31 = vpack.c.bf16 %v793_v30, %v725_v29  ;;  %v1094_v39 = vpack.c.bf16 %v794_v33, %v726_v36  ;;  %v1095_v51 = vpack.c.bf16 %v795_v48, %v727_v50  ;;  %v802_v33 = vpop.permute.xlu1 %801  ;;  %v812_v36 = vpop.permute.xlu0 %811 }
 0x31c   :  { %v833_v38 = vcombine.low %v800_v34, %v812_v36  ;;  %v834_v40 = vcombine.high %v800_v34, %v812_v36 }
 0x31d   :  { %v1102_v32 = vsel %vm1097_vm2, %v1093_v31, 0  ;;  %v1149_v47 = vsel %vm1097_vm2, %v1094_v39, 0  ;;  %v1196_v52 = vsel %vm1097_vm2, %v1095_v51, 0 }
 0x31e   :  { %5046 = vmatpush3.bf16.xpose.msra.mxu1 %v1102_v32 }
 0x31f   :  { %5051 = vmatprep.subr.bf16.mxu1 %v5442_v55  ;;  %v806_v35 = vpop.permute.xlu1 %805 }
 0x320   :  { %v817_v37 = vcombine.low %v5578_v41, %v806_v35  ;;  %v818_v39 = vcombine.high %v5578_v41, %v806_v35 }
 0x322   :  { %v825_v42 = vrot.slane %v817_v37, %v5599_v56 }
 0x325   :  { %5048 = vmatmul.mubr.msk.bf16.vlgmr.msra.gmra.mrb[0].mxu1 %vm1097_vm2, %v5663_v14  ;;  %v728_v14 = vcombine.high %v708_v45, %v724_v46  ;;  %v841_v45 = vrot.slane %v833_v38, %v5599_v56  ;;  %v832_v46 = vrot.slane %v818_v39, %v5599_v56 }
 0x326   :  { %5052 = vmatpush3.bf16.xpose.msra.mxu1 %v1149_v47  ;;  %5053 = vmatprep.mubr.msk.bf16.mxu1 %vm5443_vm1, %v5442_v55  ;;  %v848_v47 = vrot.slane %v834_v40, %v5599_v56 }
 0x327   :  { %5057 = vmatprep.subr.bf16.mxu1 %v5442_v55  ;;  %v1096_v54 = vpack.c.bf16 %v796_v53, %v728_v14  ;;  %v849_v48 = vcombine.low %v825_v42, %v841_v45  ;;  %v850_v50 = vcombine.high %v825_v42, %v841_v45  ;;  %v808_v53 = vpop.permute.xlu1 %807 }
 0x328   :  { %v865_v51 = vcombine.low %v832_v46, %v848_v47 }
 0x329   :  { %v1243_v57 = vsel %vm1097_vm2, %v1096_v54, 0  ;;  %v857_v14 = vrot.slane %v849_v48, %v5604_v61  ;;  %v864_v54 = vrot.slane %v850_v50, %v5604_v61 }
 0x32d   :  { %5054 = vmatmul.mubr.msk.bf16.vlgmr.msra.gmra.mrb[4].mxu1 %vm1097_vm2, %v5665_v15  ;;  %v61_v15 = vand.u32 127, %v57_v44 }
 0x32e   :  { %5058 = vmatpush3.bf16.xpose.msra.mxu1 %v1196_v52  ;;  %5059 = vmatprep.mubr.msk.bf16.mxu1 %vm5443_vm1, %v5442_v55  ;;  %v866_v52 = vcombine.high %v832_v46, %v848_v47 }
 0x32f   :  { %5063 = vmatprep.subr.bf16.mxu1 %v5442_v55  ;;  %vm62_vm3 = vcmp.le.s32.totalorder %v61_v15, %v5595_v49  ;;  %vm63_vm5 = vcmp.le.s32.totalorder %v61_v15, %v59_v58 }
 0x335   :  { %5060 = vmatmul.mubr.msk.bf16.vlgmr.msra.gmra.mrb[8].mxu1 %vm1097_vm2, %v5659_v12  ;;  %v64_v12 = vstv %s6551_s21  ;;  %s6549_s21 = smov 48  }
 0x336   :  { %5064 = vmatpush3.bf16.xpose.msra.mxu1 %v1243_v57  ;;  %5065 = vmatprep.mubr.msk.bf16.mxu1 %vm5443_vm1, %v5442_v55  ;;  %vm65_vm4 = vcmp.lt.s32.totalorder %v61_v15, %v64_v12  ;;  %v873_v15 = vrot.slane %v865_v51, %v5604_v61  ;;  %v880_v12 = vrot.slane %v866_v52, %v5604_v61 }
 0x337   :  { %5075 = vmatprep.subr.bf16.mxu1 %v5442_v55  ;;  %vm5729_vm6 = vmand %vm62_vm3, %vm65_vm4 }
 0x338   :  { %vm5733_vm7 = vmand %vm63_vm5, %vm65_vm4 }
 0x33d   :  { %5066 = vmatmul.mubr.msk.bf16.vlgmr.msra.gmra.mrb[12].mxu1 %vm1097_vm2, %v5661_v13 }
 0x33e   :  { %5077 = vmatprep.mubr.msk.bf16.mxu1 %vm5443_vm1, %v5442_v55 }
 0x3f8   :  { %v1138_v13 = vpop.f32.mrb[0].mxu1 }
 0x3f9   :  { %v5739_v44 = vsel %vm5729_vm6, %v1138_v13, -1e+30  ;;  %v5049_v62 = vpop.f32.mrb[1].mxu1 }
 0x3fa   :  { %v1141_v63 = vpop.f32.mrb[2].mxu1  ;;  %v1298_v0 = vsel %vm1097_vm2, %v5739_v44, -inf }
 0x3fb   :  { %v5745_v1 = vsel %vm5733_vm7, %v1141_v63, -1e+30  ;;  %1299 = vmax.xlane.f32.xlu0 %v1298_v0  ;;  %v5050_v2 = vpop.f32.mrb[3].mxu1  ;;  %v953_v63 = vcombine.low %v857_v14, %v864_v54  ;;  %v4766_v0 = vcombine.high %v857_v14, %v864_v54 }
 0x3fc   :  { %v1301_v3 = vsel %vm1097_vm2, %v5745_v1, -inf  ;;  %v885_v2 = vcombine.low %v5582_v43, %v808_v53 }
 0x3fd   :  { %1302 = vmax.xlane.f32.xlu1 %v1301_v3  ;;  %v886_v3 = vcombine.high %v5582_v43, %v808_v53 }
 0x400   :  { %v1185_v4 = vpop.f32.mrb[4].mxu1 }
 0x401   :  { %v5751_v5 = vsel %vm5729_vm6, %v1185_v4, -1e+30  ;;  %v5055_v6 = vpop.f32.mrb[5].mxu1 }
 0x402   :  { %v1188_v7 = vpop.f32.mrb[6].mxu1  ;;  %v1304_v8 = vsel %vm1097_vm2, %v5751_v5, -inf  ;;  %v969_v6 = vcombine.low %v873_v15, %v880_v12 }
 0x403   :  { %v5757_v9 = vsel %vm5733_vm7, %v1188_v7, -1e+30  ;;  %1305 = vmax.xlane.f32.xlu0 %v1304_v8  ;;  %v5056_v10 = vpop.f32.mrb[7].mxu1  ;;  %v4767_v7 = vcombine.high %v873_v15, %v880_v12 }
 0x404   :  { %v1307_v11 = vsel %vm1097_vm2, %v5757_v9, -inf }
 0x407   :  { %1308 = vmax.xlane.f32.xlu0 %v1307_v11  ;;  %v960_v11 = vrot.slane %v953_v63, %v5599_v56 }
 0x408   :  { %v1232_v16 = vpop.f32.mrb[8].mxu1 }
 0x409   :  { %v5763_v17 = vsel %vm5729_vm6, %v1232_v16, -1e+30  ;;  %v5061_v18 = vpop.f32.mrb[9].mxu1  ;;  %v968_v16 = vrot.slane %v4766_v0, %v5599_v56 }
 0x40a   :  { %v1235_v19 = vpop.f32.mrb[10].mxu1  ;;  %v1310_v20 = vsel %vm1097_vm2, %v5763_v17, -inf }
 0x40b   :  { %1311 = vmax.xlane.f32.xlu0 %v1310_v20  ;;  %v5062_v21 = vpop.f32.mrb[11].mxu1  ;;  %v5783_v31 = vsel %vm5733_vm7, %v1235_v19, -1e+30  ;;  %v900_v19 = vrot.slane %v886_v3, %v5599_v56  ;;  %v985_v34 = vcombine.low %v960_v11, %v968_v16  ;;  %v986_v40 = vcombine.high %v960_v11, %v968_v16 }
 0x40c   :  { %v1313_v32 = vsel %vm1097_vm2, %v5783_v31, -inf }
 0x40d   :  { %v993_v53 = vrot.slane %v985_v34, %v5604_v61 }
 0x40e   :  { %813 = vrot.lane.b32.xlu1 %v5582_v43, %s5438_s17 }
 0x410   :  { %v1279_v23 = vpop.f32.mrb[12].mxu1 }
 0x411   :  { %v5771_v24 = vsel %vm5729_vm6, %v1279_v23, -1e+30  ;;  %v5067_v25 = vpop.f32.mrb[13].mxu1  ;;  %v976_v23 = vrot.slane %v969_v6, %v5599_v56 }
 0x412   :  { %v1282_v26 = vpop.f32.mrb[14].mxu1  ;;  %v1316_v27 = vsel %vm1097_vm2, %v5771_v24, -inf  ;;  %v984_v25 = vrot.slane %v4767_v7, %v5599_v56 }
 0x413   :  { %v5777_v28 = vsel %vm5733_vm7, %v1282_v26, -1e+30  ;;  %1317 = vmax.xlane.f32.xlu0 %v1316_v27  ;;  %v5068_v29 = vpop.f32.mrb[15].mxu1 }
 0x414   :  { %v1319_v30 = vsel %vm1097_vm2, %v5777_v28, -inf  ;;  %v1001_v39 = vcombine.low %v976_v23, %v984_v25  ;;  %v1002_v14 = vcombine.high %v976_v23, %v984_v25 }
 0x416   :  { %v1016_v6 = vrot.slane %v1002_v14, %v5604_v61 }
 0x417   :  { %1320 = vmax.xlane.f32.xlu0 %v1319_v30 }
 0x432   :  { %1314 = vmax.xlane.f32.xlu1 %v1313_v32 }
 0x488   :  { %v1300_v57 = vpop.xlane.xlu0 %1299 }
 0x489   :  { %v1322_v41 = vsub.f32 %v5739_v44, %v1300_v57 }
 0x48a   :  { %v1303_v58 = vpop.xlane.xlu1 %1302 }
 0x48b   :  { %v1330_v13 = vmul.f32 1.442695, %v1322_v41  ;;  %v1323_v62 = vsub.f32 %v5745_v1, %v1303_v58  ;;  %v893_v1 = vrot.slane %v885_v2, %v5599_v56 }
 0x48d   :  { %5313 = vpow2.f32 %v1330_v13  ;;  %v1332_v4 = vmul.f32 1.442695, %v1323_v62  ;;  %v1009_v13 = vrot.slane %v1001_v39, %v5604_v61 }
 0x48e   :  { %v814_v8 = vpop.permute.xlu1 %813 }
 0x48f   :  { %5315 = vpow2.f32 %v1332_v4  ;;  %v901_v44 = vcombine.low %v802_v33, %v814_v8  ;;  %v902_v10 = vcombine.high %v802_v33, %v814_v8  ;;  %v1000_v4 = vrot.slane %v986_v40, %v5604_v61 }
 0x490   :  { %v1306_v18 = vpop.xlane.xlu0 %1305  ;;  %v1018_v11 = vcombine.high %v993_v53, %v1009_v13 }
 0x491   :  { %v909_v20 = vrot.slane %v901_v44, %v5599_v56  ;;  %v916_v43 = vrot.slane %v902_v10, %v5599_v56  ;;  %v1324_v21 = vsub.f32 %v5751_v5, %v1306_v18  ;;  %v1017_v10 = vcombine.low %v993_v53, %v1009_v13 }
 0x492   :  { %v1020_v23 = vcombine.high %v1000_v4, %v1016_v6 }
 0x493   :  { %v917_v26 = vcombine.low %v893_v1, %v909_v20  ;;  %v918_v27 = vcombine.high %v893_v1, %v909_v20  ;;  %v933_v29 = vcombine.low %v900_v19, %v916_v43  ;;  %v934_v30 = vcombine.high %v900_v19, %v916_v43 }
 0x494   :  { %v1334_v32 = vmul.f32 1.442695, %v1324_v21  ;;  %v1309_v33 = vpop.xlane.xlu0 %1308  ;;  %v1019_v21 = vcombine.low %v1000_v4, %v1016_v6 }
 0x495   :  { %v925_v35 = vrot.slane %v917_v26, %v5604_v61  ;;  %v932_v36 = vrot.slane %v918_v27, %v5604_v61  ;;  %v941_v37 = vrot.slane %v933_v29, %v5604_v61  ;;  %v948_v38 = vrot.slane %v934_v30, %v5604_v61 }
 0x496   :  { %5317 = vpow2.f32 %v1334_v32  ;;  %v1325_v5 = vsub.f32 %v5757_v9, %v1309_v33 }
 0x497   :  { %v5815_v42 = vpop.eup %5313  ;;  %v1021_v45 = vcombine.low %v925_v35, %v932_v36  ;;  %v4768_v46 = vcombine.high %v925_v35, %v932_v36  ;;  %v1037_v47 = vcombine.low %v941_v37, %v948_v38  ;;  %v4769_v48 = vcombine.high %v941_v37, %v948_v38 }
 0x498   :  { %v1336_v50 = vmul.f32 1.442695, %v1325_v5  ;;  %v1312_v51 = vpop.xlane.xlu0 %1311  ;;  %v1346_v52 = vsel %vm1097_vm2, %v5815_v42, 0.0 }
 0x499   :  { %v5316_v54 = vpop.eup %5315  ;;  %v1028_v57 = vrot.slane %v1021_v45, %v5599_v56  ;;  %v1036_v9 = vrot.slane %v4768_v46, %v5599_v56  ;;  %v1044_v41 = vrot.slane %v1037_v47, %v5599_v56  ;;  %v1052_v15 = vrot.slane %v4769_v48, %v5599_v56  ;;  %1347 = vadd.xlane.f32.xlu0 %v1346_v52 }
 0x49a   :  { %5319 = vpow2.f32 %v1336_v50  ;;  %v1326_v12 = vsub.f32 %v5763_v17, %v1312_v51  ;;  %v1349_v58 = vsel %vm1097_vm2, %v5316_v54, 0.0  ;;  %v1370_v36 = vpack.c.bf16 %v5316_v54, %v5815_v42  ;;  %v5221_v54 = vld [vmem:[%s6537_s5] sm:$0xff]  }
 0x49b   :  { %1350 = vadd.xlane.f32.xlu1 %v1349_v58  ;;  %v1053_v62 = vcombine.low %v1028_v57, %v1036_v9  ;;  %v1069_v63 = vcombine.low %v1044_v41, %v1052_v15  ;;  %v1054_v0 = vcombine.high %v1028_v57, %v1036_v9  ;;  %v1070_v2 = vcombine.high %v1044_v41, %v1052_v15 }
 0x49c   :  { %v1338_v3 = vmul.f32 1.442695, %v1326_v12 }
 0x49d   :  { %v1061_v7 = vrot.slane %v1053_v62, %v5604_v61  ;;  %v1077_v8 = vrot.slane %v1069_v63, %v5604_v61  ;;  %v1068_v17 = vrot.slane %v1054_v0, %v5604_v61  ;;  %v1084_v44 = vrot.slane %v1070_v2, %v5604_v61 }
 0x49e   :  { %5321 = vpow2.f32 %v1338_v3 }
 0x49f   :  { %v1085_v16 = vcombine.low %v1061_v7, %v1077_v8  ;;  %v1086_v1 = vcombine.high %v1061_v7, %v1077_v8  ;;  %v1087_v18 = vcombine.low %v1068_v17, %v1084_v44  ;;  %v1088_v19 = vcombine.high %v1068_v17, %v1084_v44 }
 0x4a0   :  { %v5318_v20 = vpop.eup %5317  ;;  %v1318_v43 = vpop.xlane.xlu0 %1317 }
 0x4a1   :  { %v1328_v25 = vsub.f32 %v5771_v24, %v1318_v43  ;;  %v1352_v26 = vsel %vm1097_vm2, %v5318_v20, 0.0  ;;  %v1374_v27 = vpack.c.bf16 %v1085_v16, %v1017_v10  ;;  %v1375_v29 = vpack.c.bf16 %v1086_v1, %v1018_v11 }
 0x4a2   :  { %1353 = vadd.xlane.f32.xlu0 %v1352_v26  ;;  %v1376_v30 = vpack.c.bf16 %v1087_v18, %v1019_v21  ;;  %v1377_v32 = vpack.c.bf16 %v1088_v19, %v1020_v23 }
 0x4a3   :  { %v1342_v33 = vmul.f32 1.442695, %v1328_v25  ;;  %5070 = vmatpush3.bf16.msra.mxu0 %v1374_v27  ;;  %5076 = vmatpush3.bf16.msra.mxu1 %v1375_v29 }
 0x4a4   :  { %v5320_v34 = vpop.eup %5319  ;;  %v1321_v35 = vpop.xlane.xlu0 %1320  ;;  %5081 = vmatprep.subr.bf16.mxu0 %v5442_v55  ;;  %5087 = vmatprep.subr.bf16.mxu1 %v5442_v55 }
 0x4a5   :  { %5323 = vpow2.f32 %v1342_v33  ;;  %v1329_v24 = vsub.f32 %v5777_v28, %v1321_v35  ;;  %v1355_v37 = vsel %vm1097_vm2, %v5320_v34, 0.0  ;;  %v1371_v38 = vpack.c.bf16 %v5320_v34, %v5318_v20 }
 0x4a6   :  { %1356 = vadd.xlane.f32.xlu1 %v1355_v37  ;;  %5072 = vmatmul.mubr.msk.bf16.vlgmr.msra.gmra.mrb[4].mxu0 %vm1097_vm2, %v1370_v36 }
 0x4a7   :  { %v1344_v5 = vmul.f32 1.442695, %v1329_v24  ;;  %5078 = vmatmul.mubr.msk.bf16.vlgmr.msra.gmra.mrb[16].mxu1 %vm1097_vm2, %v1371_v38  ;;  %5082 = vmatpush3.bf16.msra.mxu0 %v1376_v30 }
 0x4a8   :  { %v5322_v39 = vpop.eup %5321  ;;  %5088 = vmatpush3.bf16.msra.mxu1 %v1377_v32  ;;  %5089 = vmatprep.mubr.msk.bf16.mxu1 %vm5443_vm1, %v5442_v55 }
 0x4a9   :  { %5325 = vpow2.f32 %v1344_v5  ;;  %v1358_v40 = vsel %vm1097_vm2, %v5322_v39, 0.0  ;;  %5083 = vmatprep.mubr.msk.bf16.mxu0 %vm5443_vm1, %v5442_v55  ;;  %5093 = vmatprep.subr.bf16.mxu0 %v5442_v55 }
 0x4aa   :  { %1359 = vadd.xlane.f32.xlu0 %v1358_v40 }
 0x4af   :  { %v5324_v28 = vpop.eup %5323 }
 0x4b0   :  { %v1364_v42 = vsel %vm1097_vm2, %v5324_v28, 0.0 }
 0x4b1   :  { %1365 = vadd.xlane.f32.xlu0 %v1364_v42 }
 0x4b3   :  { %v5326_v45 = vpop.eup %5325 }
 0x4b4   :  { %v1373_v46 = vpack.c.bf16 %v5326_v45, %v5324_v28  ;;  %v1367_v14 = vsel %vm1097_vm2, %v5326_v45, 0.0 }
 0x4b6   :  { %5090 = vmatmul.mubr.msk.bf16.vlgmr.msra.gmra.mrb[20].mxu1 %vm1097_vm2, %v1373_v46 }
 0x4b7   :  { %2100 = vmatprep.mubr.bf16.mxu1 %v5435_v22 }
 0x4bf   :  { %v1315_v47 = vpop.xlane.xlu1 %1314 }
 0x4c0   :  { %v1327_v48 = vsub.f32 %v5783_v31, %v1315_v47  ;;  %v5222_v31 = vld [vmem:[%s6537_s5 + $0x8] sm:$0xff]  }
 0x4c2   :  { %v1340_v50 = vmul.f32 1.442695, %v1327_v48 }
 0x4c4   :  { %5327 = vpow2.f32 %v1340_v50 }
 0x4ce   :  { %v5328_v51 = vpop.eup %5327 }
 0x4cf   :  { %v1361_v52 = vsel %vm1097_vm2, %v5328_v51, 0.0  ;;  %v1372_v53 = vpack.c.bf16 %v5328_v51, %v5322_v39 }
 0x4d0   :  { %1362 = vadd.xlane.f32.xlu1 %v1361_v52 }
 0x4d1   :  { %5084 = vmatmul.mubr.msk.bf16.vlgmr.msra.gmra.mrb[8].mxu0 %vm1097_vm2, %v1372_v53 }
 0x4d2   :  { %5101 = vmatprep.mubr.msk.bf16.mxu0 %vm5443_vm1, %v5442_v55  ;;  %5094 = vmatpush3.bf16.msra.mxu0 %v5221_v54 }
 0x4d3   :  { %5095 = vmatprep.subr.bf16.mxu0 %v5442_v55 }
 0x4d4   :  { %1368 = vadd.xlane.f32.xlu1 %v1367_v14 }
 0x4d6   :  { %5096 = vmatpush3.bf16.msra.mxu0 %v5222_v31 }
 0x4d7   :  { %5097 = vmatprep.subr.bf16.mxu0 %v5442_v55 }
 0x526   :  { %v1348_v57 = vpop.xlane.xlu0 %1347 }
 0x528   :  { %v1351_v9 = vpop.xlane.xlu1 %1350 }
 0x52f   :  { %v1354_v41 = vpop.xlane.xlu0 %1353 }
 0x530   :  { %5329 = vrcp.f32 %v1354_v41 }
 0x533   :  { %v1357_v15 = vpop.xlane.xlu1 %1356 }
 0x537   :  { %v1360_v12 = vpop.xlane.xlu0 %1359 }
 0x53a   :  { %v5330_v17 = vpop.eup %5329 }
 0x53e   :  { %v1366_v13 = vpop.xlane.xlu0 %1365 }
 0x53f   :  { %5331 = vrcp.f32 %v1366_v13 }
 0x540   :  { %5333 = vrcp.f32 %v1357_v15 }
 0x549   :  { %v5332_v44 = vpop.eup %5331 }
 0x54a   :  { %v5334_v11 = vpop.eup %5333 }
 0x55d   :  { %v1363_v58 = vpop.xlane.xlu1 %1362 }
 0x561   :  { %v1369_v8 = vpop.xlane.xlu1 %1368 }
 0x562   :  { %5335 = vrcp.f32 %v1369_v8 }
 0x563   :  { %5337 = vrcp.f32 %v1348_v57 }
 0x564   :  { %5339 = vrcp.f32 %v1360_v12 }
 0x565   :  { %5341 = vrcp.f32 %v1351_v9 }
 0x566   :  { %5343 = vrcp.f32 %v1363_v58 }
 0x56c   :  { %v5336_v19 = vpop.eup %5335 }
 0x56d   :  { %v5338_v30 = vpop.eup %5337 }
 0x56e   :  { %v5340_v32 = vpop.eup %5339 }
 0x56f   :  { %v5342_v34 = vpop.eup %5341 }
 0x570   :  { %v5344_v37 = vpop.eup %5343 }
 0x579   :  { %v1415_v62 = vpop.f32.mrb[4].mxu0 }
 0x57a   :  { %v1459_v63 = vpop.f32.mrb[16].mxu1  ;;  %v5073_v0 = vpop.f32.mrb[5].mxu0  ;;  %v1562_v35 = vmul.f32 %v5338_v30, %v1415_v62 }
 0x57b   :  { %v5079_v2 = vpop.f32.mrb[17].mxu1  ;;  %v1418_v3 = vpop.f32.mrb[6].mxu0  ;;  %v1564_v16 = vmul.f32 %v5330_v17, %v1459_v63 }
 0x57c   :  { %v1462_v4 = vpop.f32.mrb[18].mxu1  ;;  %v5074_v6 = vpop.f32.mrb[7].mxu0  ;;  %v1563_v5 = vmul.f32 %v5342_v34, %v1418_v3 }
 0x57d   :  { %v5080_v7 = vpop.f32.mrb[19].mxu1  ;;  %v1565_v43 = vmul.f32 %v5334_v11, %v1462_v4 }
 0x589   :  { %v1547_v10 = vpop.f32.mrb[20].mxu1 }
 0x58a   :  { %v1568_v1 = vmul.f32 %v5332_v44, %v1547_v10  ;;  %v5091_v18 = vpop.f32.mrb[21].mxu1 }
 0x58b   :  { %v1550_v20 = vpop.f32.mrb[22].mxu1 }
 0x58c   :  { %v1586_v21 = vcombine.low %v1564_v16, %v1568_v1  ;;  %v1587_v23 = vcombine.high %v1564_v16, %v1568_v1  ;;  %v1569_v25 = vmul.f32 %v5336_v19, %v1550_v20  ;;  %v5092_v26 = vpop.f32.mrb[23].mxu1 }
 0x58e   :  { %v1654_v27 = vcombine.low %v1565_v43, %v1569_v25  ;;  %v1655_v29 = vcombine.high %v1565_v43, %v1569_v25  ;;  %v1594_v45 = vrot.slane %v1586_v21, %v5599_v56  ;;  %v1601_v46 = vrot.slane %v1587_v23, %v5599_v56 }
 0x590   :  { %v1662_v31 = vrot.slane %v1654_v27, %v5599_v56  ;;  %v1669_v57 = vrot.slane %v1655_v29, %v5599_v56  ;;  %v5223_v29 = vld [vmem:[%s6537_s5 + $0x10] sm:$0xff]  }
 0x591   :  { %5098 = vmatpush3.bf16.msra.mxu0 %v5223_v29 }
 0x592   :  { %5099 = vmatprep.subr.bf16.mxu0 %v5442_v55 }
 0x5a4   :  { %v1503_v33 = vpop.f32.mrb[8].mxu0 }
 0x5a5   :  { %v1566_v36 = vmul.f32 %v5340_v32, %v1503_v33  ;;  %v5085_v24 = vpop.f32.mrb[9].mxu0 }
 0x5a6   :  { %v1506_v38 = vpop.f32.mrb[10].mxu0 }
 0x5a7   :  { %v1570_v39 = vcombine.low %v1562_v35, %v1566_v36  ;;  %v1571_v40 = vcombine.high %v1562_v35, %v1566_v36  ;;  %v1567_v28 = vmul.f32 %v5344_v37, %v1506_v38  ;;  %v5086_v42 = vpop.f32.mrb[11].mxu0 }
 0x5a9   :  { %v1578_v47 = vrot.slane %v1570_v39, %v5599_v56  ;;  %v1585_v48 = vrot.slane %v1571_v40, %v5599_v56  ;;  %v1638_v50 = vcombine.low %v1563_v5, %v1567_v28  ;;  %v1639_v51 = vcombine.high %v1563_v5, %v1567_v28 }
 0x5ab   :  { %v1602_v52 = vcombine.low %v1578_v47, %v1594_v45  ;;  %v1603_v53 = vcombine.high %v1578_v47, %v1594_v45  ;;  %v1618_v14 = vcombine.low %v1585_v48, %v1601_v46  ;;  %v1619_v54 = vcombine.high %v1585_v48, %v1601_v46 }
 0x5ac   :  { %v1646_v9 = vrot.slane %v1638_v50, %v5599_v56  ;;  %v1653_v41 = vrot.slane %v1639_v51, %v5599_v56 }
 0x5ad   :  { %v1610_v15 = vrot.slane %v1602_v52, %v5604_v61  ;;  %v1617_v12 = vrot.slane %v1603_v53, %v5604_v61  ;;  %v1626_v58 = vrot.slane %v1618_v14, %v5604_v61  ;;  %v1633_v13 = vrot.slane %v1619_v54, %v5604_v61  ;;  %v5224_v52 = vld [vmem:[%s6537_s5 + $0x18] sm:$0xff]  }
 0x5ae   :  { %v1670_v62 = vcombine.low %v1646_v9, %v1662_v31  ;;  %v1671_v63 = vcombine.high %v1646_v9, %v1662_v31  ;;  %v1686_v0 = vcombine.low %v1653_v41, %v1669_v57  ;;  %v1687_v2 = vcombine.high %v1653_v41, %v1669_v57  ;;  %5100 = vmatpush3.bf16.msra.mxu0 %v5224_v52 }
 0x5af   :  { %v1706_v3 = vcombine.low %v1610_v15, %v1617_v12  ;;  %v4778_v4 = vcombine.high %v1610_v15, %v1617_v12  ;;  %v1722_v6 = vcombine.low %v1626_v58, %v1633_v13  ;;  %v4779_v7 = vcombine.high %v1626_v58, %v1633_v13 }
 0x5b0   :  { %v1678_v8 = vrot.slane %v1670_v62, %v5604_v61  ;;  %v1685_v17 = vrot.slane %v1671_v63, %v5604_v61  ;;  %v1694_v44 = vrot.slane %v1686_v0, %v5604_v61  ;;  %v1701_v10 = vrot.slane %v1687_v2, %v5604_v61 }
 0x5b1   :  { %v1713_v11 = vrot.slane %v1706_v3, %v5599_v56  ;;  %v1721_v16 = vrot.slane %v4778_v4, %v5599_v56  ;;  %v1729_v1 = vrot.slane %v1722_v6, %v5599_v56  ;;  %v1737_v18 = vrot.slane %v4779_v7, %v5599_v56 }
 0x5b2   :  { %v1774_v19 = vcombine.low %v1678_v8, %v1685_v17  ;;  %v4780_v20 = vcombine.high %v1678_v8, %v1685_v17  ;;  %v1790_v43 = vcombine.low %v1694_v44, %v1701_v10  ;;  %v4781_v21 = vcombine.high %v1694_v44, %v1701_v10 }
 0x5b3   :  { %v1739_v23 = vcombine.high %v1713_v11, %v1721_v16  ;;  %v1755_v25 = vcombine.high %v1729_v1, %v1737_v18  ;;  %v1738_v26 = vcombine.low %v1713_v11, %v1721_v16  ;;  %v1754_v27 = vcombine.low %v1729_v1, %v1737_v18  ;;  %v4782_v11 = vld [vmem:[%s6538_s6] ss:$0 sm:$0xff] }
 0x5b4   :  { %v1781_v30 = vrot.slane %v1774_v19, %v5599_v56  ;;  %v1789_v32 = vrot.slane %v4780_v20, %v5599_v56  ;;  %v1797_v33 = vrot.slane %v1790_v43, %v5599_v56  ;;  %v1805_v34 = vrot.slane %v4781_v21, %v5599_v56  ;;  %v5409_v20 = vld [vmem:[%s6533_s1] sm:$0xff] }
 0x5b5   :  { %v1753_v35 = vrot.slane %v1739_v23, %v5604_v61  ;;  %v1769_v36 = vrot.slane %v1755_v25, %v5604_v61  ;;  %v1746_v24 = vrot.slane %v1738_v26, %v5604_v61  ;;  %v1762_v37 = vrot.slane %v1754_v27, %v5604_v61  ;;  %v5410_v25 = vld [vmem:[%s6533_s1 + $0x8] sm:$0xff]  ;;  %s5447_s1 = smov [#allocation4]  }
 0x5b6   :  { %v1807_v38 = vcombine.high %v1781_v30, %v1789_v32  ;;  %v1823_v5 = vcombine.high %v1797_v33, %v1805_v34  ;;  %v1806_v39 = vcombine.low %v1781_v30, %v1789_v32  ;;  %v1822_v40 = vcombine.low %v1797_v33, %v1805_v34  ;;  %s4736_s28 = sshll.u32 %s5447_s1, 4  ;;  %s4737_s28 = int_to_ptr.vmem [resolvable:$true] %s4736_s28 }
 0x5b7   :  { %v1772_v28 = vcombine.low %v1753_v35, %v1769_v36  ;;  %v1770_v42 = vcombine.low %v1746_v24, %v1762_v37  ;;  %v1771_v45 = vcombine.high %v1746_v24, %v1762_v37  ;;  %v1773_v46 = vcombine.high %v1753_v35, %v1769_v36  ;;  %p5416_p1 = scmp.lt.s32.totalorder %s4737_s28, %s4737_s28 }
 0x5b8   :  { %v1821_v47 = vrot.slane %v1807_v38, %v5604_v61  ;;  %v1837_v48 = vrot.slane %v1823_v5, %v5604_v61  ;;  %v1814_v50 = vrot.slane %v1806_v39, %v5604_v61  ;;  %v1830_v51 = vrot.slane %v1822_v40, %v5604_v61  ;;  %v5227_v39 = vld [vmem:[%s6541_s9 + $0x4] ss:$8 sps:$4 sm:$0xff]   ;;  %v5225_v40 = vld [vmem:[%s6541_s9] ss:$8 sps:$4 sm:$0xff]  }
 0x5b9   :  { %2068 = vmatprep.subr.bf16.mxu1 %v5227_v39 }
 0x5ba   :  { %v1840_v53 = vcombine.low %v1821_v47, %v1837_v48  ;;  %v1839_v14 = vcombine.high %v1814_v50, %v1830_v51  ;;  %v1838_v54 = vcombine.low %v1814_v50, %v1830_v51  ;;  %v1841_v31 = vcombine.high %v1821_v47, %v1837_v48  ;;  %2069 = vmatpush1.bf16.msra.mxu1 %v5225_v40  ;;  %v5236_v47 = vld [vmem:[%s6541_s9 + $0x34] ss:$8 sps:$4 sm:$0xff]   ;;  %v5234_v48 = vld [vmem:[%s6541_s9 + $0x30] ss:$8 sps:$4 sm:$0xff]  }
 0x5bc   :  { %v5184_v57 = vpack.i.bf16 %v1840_v53, %v1772_v28  ;;  %v5179_v9 = vpack.i.bf16 %v1839_v14, %v1771_v45  ;;  %v5189_v41 = vpack.i.bf16 %v1841_v31, %v1773_v46  ;;  %v5230_v28 = vld [vmem:[%s6541_s9 + $0x14] ss:$8 sps:$4 sm:$0xff]   ;;  %v5233_v45 = vld [vmem:[%s6541_s9 + $0x24] ss:$8 sps:$4 sm:$0xff]   ;;  %v5231_v46 = vld [vmem:[%s6541_s9 + $0x20] ss:$8 sps:$4 sm:$0xff]  }
 0x5bd   :  { %2070 = vmatprep.subr.bf16.mxu1 %v5230_v28 }
 0x5be   :  { %5185 = vrot.lane.b32.xlu1 %v5184_v57, %s5444_s19  ;;  %5180 = vrot.lane.b32.xlu0 %v5179_v9, %s5445_s20  ;;  %v4788_v9 = vld [vmem:[%s6539_s7] ss:$0 sm:$0xff] }
 0x5c2   :  { %5190 = vrot.lane.b32.xlu1 %v5189_v41, %s6549_s21 }
 0x630   :  { %v5186_v15 = vpop.permute.xlu1 %5185  ;;  %v5181_v12 = vpop.permute.xlu0 %5180 }
 0x631   :  { %v5183_v58 = vunpack.i.h.bf16 %v5181_v12  ;;  %v5182_v13 = vunpack.i.l.bf16 %v5181_v12  ;;  %v5188_v62 = vunpack.i.h.bf16 %v5186_v15  ;;  %v5187_v63 = vunpack.i.l.bf16 %v5186_v15 }
 0x633   :  { %v1866_v0 = vsel %vm1097_vm2, %v1770_v42, %v5182_v13  ;;  %v1867_v2 = vsel %vm1097_vm2, %v1838_v54, %v5183_v58  ;;  %v5228_v42 = vld [vmem:[%s6541_s9 + $0x10] ss:$8 sps:$4 sm:$0xff]   ;;  %v4789_v58 = vld [vmem:[%s6540_s8] ss:$0 sm:$0xff] }
 0x634   :  { %v5191_v3 = vpop.permute.xlu1 %5190  ;;  %v1869_v7 = vsel %vm1868_vm8, %v1866_v0, %v5187_v63  ;;  %v1870_v8 = vsel %vm1868_vm8, %v1867_v2, %v5188_v62  ;;  %2071 = vmatpush1.bf16.msra.mxu1 %v5228_v42  ;;  %v5237_v2 = vld [vmem:[%s6543_s11 + $0x40] sm:$0xff]  }
 0x635   :  { %v5193_v4 = vunpack.i.h.bf16 %v5191_v3  ;;  %v5192_v6 = vunpack.i.l.bf16 %v5191_v3  ;;  %2072 = vmatprep.subr.bf16.mxu1 %v5233_v45  ;;  %v5238_v3 = vld [vmem:[%s6543_s11] sm:$0xff]   ;;  %4980 = vmatprep.subr.bf16.mxu0 %v5237_v2 }
 0x637   :  { %v1872_v17 = vsel %vm1871_vm9, %v1869_v7, %v5192_v6  ;;  %v1873_v44 = vsel %vm1871_vm9, %v1870_v8, %v5193_v4  ;;  %v5239_v4 = vld [vmem:[%s6543_s11 + $0x48] sm:$0xff]   ;;  %v5241_v7 = vld [vmem:[%s6543_s11 + $0x50] sm:$0xff]  }
 0x638   :  { %v1874_v10 = vpack.c.bf16 %v1873_v44, %v1872_v17  ;;  %2073 = vmatpush1.bf16.msra.mxu1 %v5231_v46  ;;  %v5240_v6 = vld [vmem:[%s6543_s11 + $0x8] sm:$0xff]   ;;  %v5242_v8 = vld [vmem:[%s6543_s11 + $0x10] sm:$0xff]   ;;  %v5243_v17 = vld [vmem:[%s6543_s11 + $0x58] sm:$0xff]  }
 0x639   :  { %2074 = vmatprep.subr.bf16.mxu1 %v5236_v47  ;;  %v5244_v44 = vld [vmem:[%s6543_s11 + $0x18] sm:$0xff]  }
 0x63a   :  { %5102 = vmatmul.mubr.msk.bf16.vlgmr.msra.gmra.mrb[12].mxu0 %vm70_vm0, %v1874_v10  ;;  %v5245_v10 = vld [vmem:[%s6543_s11 + $0x60] sm:$0xff]  }
 0x63b   :  { %4981 = vmatpush3.bf16.msra.mxu0 %v5238_v3 }
 0x63c   :  { %2075 = vmatpush1.bf16.msra.mxu1 %v5234_v48  ;;  %4982 = vmatprep.subr.bf16.mxu0 %v5239_v4 }
 0x63f   :  { %4983 = vmatpush3.bf16.msra.mxu0 %v5240_v6 }
 0x640   :  { %4984 = vmatprep.subr.bf16.mxu0 %v5241_v7 }
 0x643   :  { %4985 = vmatpush3.bf16.msra.mxu0 %v5242_v8 }
 0x644   :  { %4986 = vmatprep.subr.bf16.mxu0 %v5243_v17 }
 0x647   :  { %4987 = vmatpush3.bf16.msra.mxu0 %v5244_v44 }
 0x648   :  { %4988 = vmatprep.subr.bf16.mxu0 %v5245_v10 }
 0x70d   :  { %v1951_v16 = vpop.f32.mrb[12].mxu0 }
 0x70e   :  { %v1952_v1 = vadd.f32 %v4782_v11, %v1951_v16  ;;  %v5103_v18 = vpop.f32.mrb[13].mxu0  ;;  %v5247_v16 = vld [vmem:[%s6543_s11 + $0x68] sm:$0xff]  }
 0x70f   :  { %v1954_v19 = vpop.f32.mrb[14].mxu0  ;;  %v5249_v18 = vld [vmem:[%s6543_s11 + $0x70] sm:$0xff]  }
 0x710   :  { %v5920_v43 = vadd.f32 %v5409_v20, %v1952_v1  ;;  %v1955_v21 = vadd.f32 %v4782_v11, %v1954_v19  ;;  %v5104_v23 = vpop.f32.mrb[15].mxu0  ;;  %v5246_v11 = vld [vmem:[%s6543_s11 + $0x20] sm:$0xff]   ;;  %v5248_v1 = vld [vmem:[%s6543_s11 + $0x28] sm:$0xff]   ;;  %v5250_v19 = vld [vmem:[%s6543_s11 + $0x30] sm:$0xff]  }
 0x711   :  { %4989 = vmatpush3.bf16.msra.mxu0 %v5246_v11  ;;  %v5251_v20 = vld [vmem:[%s6543_s11 + $0x78] sm:$0xff]   ;;  %v2017_v23 = vsub.s32 0, %v5595_v49 }
 0x712   :  { %v5925_v26 = vadd.f32 %v5410_v25, %v1955_v21  ;;  %v1962_v27 = vsel %vm70_vm0, %v5920_v43, 0.0  ;;  %4990 = vmatprep.subr.bf16.mxu0 %v5247_v16  ;;  %v5252_v21 = vld [vmem:[%s6543_s11 + $0x38] sm:$0xff]   ;;  %v2013_v25 = vld [vmem:[%s6542_s10] sm:$0x3] }
 0x713   :  { %1963 = vadd.xlane.f32.xlu1 %v1962_v27  ;;  %v2021_v27 = vsub.s32 1, %v5595_v49 }
 0x714   :  { %v1965_v29 = vsel %vm70_vm0, %v5925_v26, 0.0 }
 0x715   :  { %1966 = vadd.xlane.f32.xlu0 %v1965_v29  ;;  %4991 = vmatpush3.bf16.msra.mxu0 %v5248_v1  ;;  %v2018_v29 = vrot.slane %v2013_v25, %v2017_v23 }
 0x716   :  { %4992 = vmatprep.subr.bf16.mxu0 %v5249_v18 }
 0x719   :  { %4993 = vmatpush3.bf16.msra.mxu0 %v5250_v19  ;;  %v4799_v19 = vld [vmem:[%s6544_s12] ss:$0 sm:$0xff] }
 0x71a   :  { %4994 = vmatprep.subr.bf16.mxu0 %v5251_v20 }
 0x71d   :  { %4995 = vmatpush3.bf16.msra.mxu0 %v5252_v21 }
 0x71e   :  { %5117 = vmatprep.subr.bf16.mxu0 %v5442_v55 }
 0x7a0   :  { %v1964_v30 = vpop.xlane.xlu1 %1963 }
 0x7a1   :  { %v1968_v32 = vmul.f32 0.015625, %v1964_v30  ;;  %v2022_v30 = vrot.slane %v2013_v25, %v2021_v27 }
 0x7a2   :  { %v1967_v33 = vpop.xlane.xlu0 %1966 }
 0x7a3   :  { %v1970_v34 = vsub.f32 %v5920_v43, %v1968_v32  ;;  %v1969_v35 = vmul.f32 0.015625, %v1967_v33 }
 0x7a5   :  { %v1971_v36 = vsub.f32 %v5925_v26, %v1969_v35  ;;  %v1972_v24 = vmul.f32 %v1970_v34, %v1970_v34 }
 0x7a7   :  { %v1974_v37 = vsel %vm70_vm0, %v1972_v24, 0.0  ;;  %v1973_v38 = vmul.f32 %v1971_v36, %v1971_v36 }
 0x7a8   :  { %1975 = vadd.xlane.f32.xlu0 %v1974_v37 }
 0x7a9   :  { %v1977_v5 = vsel %vm70_vm0, %v1973_v38, 0.0 }
 0x7ac   :  { %1978 = vadd.xlane.f32.xlu0 %v1977_v5 }
 0x835   :  { %v1976_v50 = vpop.xlane.xlu0 %1975 }
 0x836   :  { %v1980_v51 = vmul.f32 0.015625, %v1976_v50 }
 0x838   :  { %v1982_v52 = vadd.f32 1e-05, %v1980_v51 }
 0x839   :  { %v1979_v53 = vpop.xlane.xlu0 %1978 }
 0x83a   :  { %5345 = vrsqrt.f32 %v1982_v52  ;;  %v1981_v14 = vmul.f32 0.015625, %v1979_v53 }
 0x83c   :  { %v1983_v54 = vadd.f32 1e-05, %v1981_v14 }
 0x83e   :  { %5347 = vrsqrt.f32 %v1983_v54 }
 0x844   :  { %v5346_v31 = vpop.eup %5345 }
 0x845   :  { %v1986_v57 = vmul.f32 %v5346_v31, %v1970_v34 }
 0x847   :  { %v1994_v15 = vmul.f32 %v4788_v9, %v1986_v57 }
 0x848   :  { %v5348_v41 = vpop.eup %5347 }
 0x849   :  { %v1987_v12 = vmul.f32 %v5348_v41, %v1971_v36  ;;  %v2002_v62 = vadd.f32 %v4789_v58, %v1994_v15 }
 0x84b   :  { %v1995_v13 = vmul.f32 %v4788_v9, %v1987_v12 }
 0x84d   :  { %v2003_v63 = vadd.f32 %v4789_v58, %v1995_v13 }
 0x84f   :  { %v2004_v0 = vpack.c.bf16 %v2003_v63, %v2002_v62 }
 0x851   :  { %4798 = vmatmul.mubr.msk.bf16.vlgmr.msra.gmra.mrb[24].mxu1 %vm70_vm0, %v2004_v0 }
 0x852   :  { %2458 = vmatprep.mubr.bf16.mxu1 %v5435_v22 }
 0x924   :  { %v2102_v32 = vpop.f32.mrb[24].mxu1 }
 0x925   :  { %v2103_v33 = vadd.f32 %v2102_v32, %v2018_v29  ;;  %v2104_v34 = vpop.f32.mrb[25].mxu1 }
 0x926   :  { %v2105_v35 = vadd.f32 %v2104_v34, %v2022_v30  ;;  %v2106_v36 = vpop.f32.mrb[26].mxu1 }
 0x927   :  { %v2115_v24 = vmul.f32 0.044715, %v2103_v33  ;;  %v2107_v37 = vadd.f32 %v2106_v36, %v2018_v29  ;;  %v2108_v38 = vpop.f32.mrb[27].mxu1  ;;  %v2111_v2 = vmul.f32 0.5, %v2103_v33 }
 0x928   :  { %v2116_v5 = vmul.f32 0.044715, %v2105_v35  ;;  %v2109_v39 = vadd.f32 %v2108_v38, %v2022_v30  ;;  %v2112_v6 = vmul.f32 0.5, %v2105_v35 }
 0x929   :  { %v2119_v40 = vmul.f32 %v2115_v24, %v2103_v33  ;;  %v2117_v28 = vmul.f32 0.044715, %v2107_v37  ;;  %v2113_v3 = vmul.f32 0.5, %v2107_v37 }
 0x92a   :  { %v2120_v42 = vmul.f32 %v2116_v5, %v2105_v35  ;;  %v2118_v45 = vmul.f32 0.044715, %v2109_v39  ;;  %v2114_v7 = vmul.f32 0.5, %v2109_v39 }
 0x92b   :  { %v2123_v46 = vmul.f32 %v2119_v40, %v2103_v33  ;;  %v2121_v47 = vmul.f32 %v2117_v28, %v2107_v37 }
 0x92c   :  { %v2124_v48 = vmul.f32 %v2120_v42, %v2105_v35  ;;  %v2122_v50 = vmul.f32 %v2118_v45, %v2109_v39 }
 0x92d   :  { %v2127_v51 = vadd.f32 %v2123_v46, %v2103_v33  ;;  %v2125_v52 = vmul.f32 %v2121_v47, %v2107_v37  ;;  %v5255_v46 = vld [vmem:[%s6536_s4 + $0x44] ss:$8 sps:$4 sm:$0xff]   ;;  %v5253_v47 = vld [vmem:[%s6536_s4 + $0x40] ss:$8 sps:$4 sm:$0xff]  }
 0x92e   :  { %v2126_v53 = vmul.f32 %v2122_v50, %v2109_v39  ;;  %v2128_v14 = vadd.f32 %v2124_v48, %v2105_v35  ;;  %2426 = vmatprep.subr.bf16.mxu1 %v5255_v46  ;;  %v5258_v48 = vld [vmem:[%s6536_s4 + $0x54] ss:$8 sps:$4 sm:$0xff]   ;;  %v5256_v50 = vld [vmem:[%s6536_s4 + $0x50] ss:$8 sps:$4 sm:$0xff]  }
 0x92f   :  { %v2131_v54 = vmul.f32 0.7978846, %v2127_v51  ;;  %v2129_v31 = vadd.f32 %v2125_v52, %v2107_v37  ;;  %2427 = vmatpush1.bf16.msra.mxu1 %v5253_v47  ;;  %v5261_v51 = vld [vmem:[%s6536_s4 + $0x64] ss:$8 sps:$4 sm:$0xff]   ;;  %v5259_v52 = vld [vmem:[%s6536_s4 + $0x60] ss:$8 sps:$4 sm:$0xff]  }
 0x930   :  { %v2130_v57 = vadd.f32 %v2126_v53, %v2109_v39  ;;  %v2132_v9 = vmul.f32 0.7978846, %v2128_v14  ;;  %2428 = vmatprep.subr.bf16.mxu1 %v5258_v48  ;;  %v5264_v53 = vld [vmem:[%s6536_s4 + $0x74] ss:$8 sps:$4 sm:$0xff]   ;;  %v5262_v14 = vld [vmem:[%s6536_s4 + $0x70] ss:$8 sps:$4 sm:$0xff]  }
 0x931   :  { %5349 = vtanh.f32 %v2131_v54  ;;  %v2133_v41 = vmul.f32 0.7978846, %v2129_v31 }
 0x932   :  { %v2134_v15 = vmul.f32 0.7978846, %v2130_v57  ;;  %5351 = vtanh.f32 %v2132_v9 }
 0x933   :  { %5353 = vtanh.f32 %v2133_v41  ;;  %2429 = vmatpush1.bf16.msra.mxu1 %v5256_v50 }
 0x934   :  { %5355 = vtanh.f32 %v2134_v15  ;;  %2430 = vmatprep.subr.bf16.mxu1 %v5261_v51 }
 0x937   :  { %2431 = vmatpush1.bf16.msra.mxu1 %v5259_v52 }
 0x938   :  { %2432 = vmatprep.subr.bf16.mxu1 %v5264_v53 }
 0x93b   :  { %v5350_v12 = vpop.eup %5349  ;;  %2433 = vmatpush1.bf16.msra.mxu1 %v5262_v14 }
 0x93c   :  { %v5352_v58 = vpop.eup %5351  ;;  %v2139_v13 = vadd.f32 1.0, %v5350_v12  ;;  %5105 = vmatprep.subr.bf16.mxu1 %v5442_v55 }
 0x93d   :  { %v5354_v62 = vpop.eup %5353  ;;  %v2140_v63 = vadd.f32 1.0, %v5352_v58  ;;  %v4818_v58 = vld [vmem:[%s6534_s2 + $0x1] ss:$0 sm:$0xff] }
 0x93e   :  { %v5356_v0 = vpop.eup %5355  ;;  %v2141_v4 = vadd.f32 1.0, %v5354_v62  ;;  %v2143_v17 = vmul.f32 %v2139_v13, %v2111_v2  ;;  %v4819_v2 = vld [vmem:[%s6535_s3 + $0x1] ss:$0 sm:$0xff] }
 0x93f   :  { %v2142_v8 = vadd.f32 1.0, %v5356_v0  ;;  %v2144_v10 = vmul.f32 %v2140_v63, %v2112_v6 }
 0x940   :  { %v2145_v44 = vmul.f32 %v2141_v4, %v2113_v3 }
 0x941   :  { %v2146_v11 = vmul.f32 %v2142_v8, %v2114_v7 }
 0x942   :  { %v2147_v16 = vpack.c.bf16 %v2145_v44, %v2143_v17 }
 0x943   :  { %v2148_v1 = vpack.c.bf16 %v2146_v11, %v2144_v10 }
 0x945   :  { %2316 = vmatprep.mubr.bf16.mxu0 %v2148_v1 }
 0x946   :  { %2317 = vmatmul.mubr.bf16.vlgmr.msra.gmra.mrb[16].mxu0 %v2147_v16 }
 0x947   :  { %5119 = vmatprep.mubr.msk.bf16.mxu0 %vm5443_vm1, %v5442_v55 }
 0xa19   :  { %v4996_v18 = vpop.f32.mrb[16].mxu0 }
 0xa1a   :  { %v4997_v20 = vpop.f32.mrb[17].mxu0 }
 0xa1b   :  { %v4998_v21 = vadd.f32 %v4997_v20, %v4996_v18  ;;  %v4999_v25 = vpop.f32.mrb[18].mxu0 }
 0xa1c   :  { %v5000_v29 = vpop.f32.mrb[19].mxu0 }
 0xa1d   :  { %v2319_v30 = vadd.f32 %v4998_v21, %v4799_v19  ;;  %v5001_v32 = vadd.f32 %v5000_v29, %v4999_v25 }
 0xa1f   :  { %v6031_v33 = vadd.f32 %v2319_v30, %v5920_v43  ;;  %v2322_v34 = vadd.f32 %v5001_v32, %v4799_v19 }
 0xa21   :  { %v6034_v35 = vadd.f32 %v2322_v34, %v5925_v26  ;;  %v2331_v36 = vsel %vm70_vm0, %v6031_v33, 0.0 }
 0xa22   :  { %2332 = vadd.xlane.f32.xlu1 %v2331_v36 }
 0xa23   :  { %v2334_v24 = vsel %vm70_vm0, %v6034_v35, 0.0 }
 0xa24   :  { %2335 = vadd.xlane.f32.xlu0 %v2334_v24 }
 0xaaf   :  { %v2333_v37 = vpop.xlane.xlu1 %2332 }
 0xab0   :  { %v2337_v38 = vmul.f32 0.015625, %v2333_v37 }
 0xab1   :  { %v2336_v5 = vpop.xlane.xlu0 %2335 }
 0xab2   :  { %v2339_v39 = vsub.f32 %v6031_v33, %v2337_v38  ;;  %v2338_v40 = vmul.f32 0.015625, %v2336_v5 }
 0xab4   :  { %v2340_v43 = vsub.f32 %v6034_v35, %v2338_v40  ;;  %v2341_v28 = vmul.f32 %v2339_v39, %v2339_v39 }
 0xab6   :  { %v2343_v26 = vsel %vm70_vm0, %v2341_v28, 0.0  ;;  %v2342_v42 = vmul.f32 %v2340_v43, %v2340_v43 }
 0xab7   :  { %2344 = vadd.xlane.f32.xlu1 %v2343_v26 }
 0xab8   :  { %v2346_v45 = vsel %vm70_vm0, %v2342_v42, 0.0 }
 0xab9   :  { %2347 = vadd.xlane.f32.xlu0 %v2346_v45 }
 0xb44   :  { %v2345_v54 = vpop.xlane.xlu1 %2344 }
 0xb45   :  { %v2349_v31 = vmul.f32 0.015625, %v2345_v54 }
 0xb46   :  { %v2348_v57 = vpop.xlane.xlu0 %2347 }
 0xb47   :  { %v2351_v9 = vadd.f32 1e-05, %v2349_v31  ;;  %v2350_v41 = vmul.f32 0.015625, %v2348_v57 }
 0xb49   :  { %5357 = vrsqrt.f32 %v2351_v9  ;;  %v2352_v15 = vadd.f32 1e-05, %v2350_v41 }
 0xb4b   :  { %5359 = vrsqrt.f32 %v2352_v15 }
 0xb53   :  { %v5358_v12 = vpop.eup %5357 }
 0xb54   :  { %v2355_v13 = vmul.f32 %v5358_v12, %v2339_v39 }
 0xb55   :  { %v5360_v62 = vpop.eup %5359 }
 0xb56   :  { %v2363_v63 = vmul.f32 %v4818_v58, %v2355_v13  ;;  %v2356_v0 = vmul.f32 %v5360_v62, %v2340_v43 }
 0xb58   :  { %v2364_v3 = vmul.f32 %v4818_v58, %v2356_v0  ;;  %v2371_v4 = vadd.f32 %v4819_v2, %v2363_v63 }
 0xb5a   :  { %v2372_v6 = vadd.f32 %v4819_v2, %v2364_v3 }
 0xb5c   :  { %v2373_v7 = vpack.c.bf16 %v2372_v6, %v2371_v4 }
 0xb5e   :  { %4836 = vmatmul.mubr.msk.bf16.vlgmr.msra.gmra.mrb[28].mxu1 %vm70_vm0, %v2373_v7 }
 0xb5f   :  { %5107 = vmatprep.mubr.msk.bf16.mxu1 %vm5443_vm1, %v5442_v55 }
 0xc31   :  { %v2460_v8 = vpop.f32.mrb[28].mxu1 }
 0xc32   :  { %2471 = vrot.lane.b32.xlu1 %v2460_v8, %s5437_s0  ;;  %v6079_v17 = vpop.f32.mrb[29].mxu1 }
 0xc33   :  { %v2464_v44 = vpop.f32.mrb[30].mxu1 }
 0xc34   :  { %2473 = vrot.lane.b32.xlu0 %v2464_v44, %s5437_s0  ;;  %v6082_v10 = vpop.f32.mrb[31].mxu1 }
 0xc36   :  { %2477 = vrot.lane.b32.xlu1 %v2460_v8, %s5436_s30 }
 0xc38   :  { %2485 = vrot.lane.b32.xlu0 %v2464_v44, %s5438_s17 }
 0xc3a   :  { %2479 = vrot.lane.b32.xlu1 %v2464_v44, %s5436_s30 }
 0xc3c   :  { %2763 = vrot.lane.b32.xlu0 %v2464_v44, %s5439_s18 }
 0xc3e   :  { %2483 = vrot.lane.b32.xlu1 %v2460_v8, %s5438_s17 }
 0xc42   :  { %2761 = vrot.lane.b32.xlu1 %v2460_v8, %s5439_s18 }
 0xca4   :  { %v2472_v11 = vpop.permute.xlu1 %2471 }
 0xca5   :  { %2765 = vrot.lane.b32.xlu1 %v2472_v11, %s5439_s18 }
 0xca6   :  { %v2474_v16 = vpop.permute.xlu0 %2473 }
 0xca7   :  { %2767 = vrot.lane.b32.xlu0 %v2474_v16, %s5439_s18 }
 0xca8   :  { %v2478_v1 = vpop.permute.xlu1 %2477 }
 0xca9   :  { %v2489_v18 = vcombine.low %v2460_v8, %v2478_v1  ;;  %v2490_v19 = vcombine.high %v2460_v8, %v2478_v1  ;;  %2769 = vrot.lane.b32.xlu1 %v2478_v1, %s5439_s18 }
 0xcaa   :  { %v2486_v20 = vpop.permute.xlu0 %2485 }
 0xcab   :  { %v2573_v21 = vcombine.low %v2474_v16, %v2486_v20  ;;  %v2574_v25 = vcombine.high %v2474_v16, %v2486_v20  ;;  %v2497_v48 = vrot.slane %v2489_v18, %v5599_v56  ;;  %v2504_v50 = vrot.slane %v2490_v19, %v5599_v56 }
 0xcac   :  { %v2480_v29 = vpop.permute.xlu1 %2479 }
 0xcad   :  { %v2557_v30 = vcombine.low %v2464_v44, %v2480_v29  ;;  %v2558_v32 = vcombine.high %v2464_v44, %v2480_v29  ;;  %2771 = vrot.lane.b32.xlu0 %v2480_v29, %s5439_s18  ;;  %v2581_v34 = vrot.slane %v2573_v21, %v5599_v56  ;;  %v2588_v36 = vrot.slane %v2574_v25, %v5599_v56 }
 0xcaf   :  { %v2565_v24 = vrot.slane %v2557_v30, %v5599_v56  ;;  %v2572_v37 = vrot.slane %v2558_v32, %v5599_v56 }
 0xcb0   :  { %v2484_v38 = vpop.permute.xlu1 %2483 }
 0xcb1   :  { %v2589_v5 = vcombine.low %v2565_v24, %v2581_v34  ;;  %v2590_v39 = vcombine.high %v2565_v24, %v2581_v34  ;;  %v2605_v40 = vcombine.low %v2572_v37, %v2588_v36  ;;  %v2606_v43 = vcombine.high %v2572_v37, %v2588_v36  ;;  %2773 = vrot.lane.b32.xlu1 %v2484_v38, %s5439_s18 }
 0xcb2   :  { %v2505_v28 = vcombine.low %v2472_v11, %v2484_v38  ;;  %v2506_v26 = vcombine.high %v2472_v11, %v2484_v38  ;;  %2775 = vrot.lane.b32.xlu0 %v2486_v20, %s5439_s18 }
 0xcb3   :  { %v2597_v42 = vrot.slane %v2589_v5, %v5604_v61  ;;  %v2604_v45 = vrot.slane %v2590_v39, %v5604_v61  ;;  %v2613_v46 = vrot.slane %v2605_v40, %v5604_v61  ;;  %v2620_v47 = vrot.slane %v2606_v43, %v5604_v61 }
 0xcb4   :  { %v2513_v51 = vrot.slane %v2505_v28, %v5599_v56  ;;  %v2520_v52 = vrot.slane %v2506_v26, %v5599_v56 }
 0xcb5   :  { %v2693_v53 = vcombine.low %v2597_v42, %v2604_v45  ;;  %v4839_v14 = vcombine.high %v2597_v42, %v2604_v45  ;;  %v2709_v54 = vcombine.low %v2613_v46, %v2620_v47  ;;  %v4840_v31 = vcombine.high %v2613_v46, %v2620_v47  ;;  %3059 = vrot.lane.b32.xlu1 %v6079_v17, %s5437_s0 }
 0xcb6   :  { %v2521_v57 = vcombine.low %v2497_v48, %v2513_v51  ;;  %v2522_v9 = vcombine.high %v2497_v48, %v2513_v51  ;;  %v2537_v41 = vcombine.low %v2504_v50, %v2520_v52  ;;  %v2538_v15 = vcombine.high %v2504_v50, %v2520_v52  ;;  %3061 = vrot.lane.b32.xlu0 %v6082_v10, %s5437_s0 }
 0xcb7   :  { %v2700_v12 = vrot.slane %v2693_v53, %v5599_v56  ;;  %v2708_v58 = vrot.slane %v4839_v14, %v5599_v56  ;;  %v2716_v13 = vrot.slane %v2709_v54, %v5599_v56  ;;  %v2724_v62 = vrot.slane %v4840_v31, %v5599_v56  ;;  %v2762_v14 = vpop.permute.xlu1 %2761  ;;  %v2764_v54 = vpop.permute.xlu0 %2763 }
 0xcb8   :  { %v2529_v63 = vrot.slane %v2521_v57, %v5604_v61  ;;  %v2536_v0 = vrot.slane %v2522_v9, %v5604_v61  ;;  %v2545_v2 = vrot.slane %v2537_v41, %v5604_v61  ;;  %v2552_v3 = vrot.slane %v2538_v15, %v5604_v61 }
 0xcb9   :  { %v2725_v4 = vcombine.low %v2700_v12, %v2708_v58  ;;  %v2726_v6 = vcombine.high %v2700_v12, %v2708_v58  ;;  %v2741_v7 = vcombine.low %v2716_v13, %v2724_v62  ;;  %v2742_v8 = vcombine.high %v2716_v13, %v2724_v62  ;;  %3065 = vrot.lane.b32.xlu1 %v6079_v17, %s5436_s30 }
 0xcba   :  { %v2625_v44 = vcombine.low %v2529_v63, %v2536_v0  ;;  %v4837_v11 = vcombine.high %v2529_v63, %v2536_v0  ;;  %v2641_v16 = vcombine.low %v2545_v2, %v2552_v3  ;;  %v4838_v1 = vcombine.high %v2545_v2, %v2552_v3  ;;  %3073 = vrot.lane.b32.xlu0 %v6082_v10, %s5438_s17 }
 0xcbb   :  { %v2733_v18 = vrot.slane %v2725_v4, %v5604_v61  ;;  %v2749_v19 = vrot.slane %v2741_v7, %v5604_v61  ;;  %v2740_v20 = vrot.slane %v2726_v6, %v5604_v61  ;;  %v2756_v21 = vrot.slane %v2742_v8, %v5604_v61 }
 0xcbc   :  { %v2632_v25 = vrot.slane %v2625_v44, %v5599_v56  ;;  %v2640_v29 = vrot.slane %v4837_v11, %v5599_v56  ;;  %v2648_v30 = vrot.slane %v2641_v16, %v5599_v56  ;;  %v2656_v32 = vrot.slane %v4838_v1, %v5599_v56 }
 0xcbd   :  { %3067 = vrot.lane.b32.xlu1 %v6082_v10, %s5436_s30  ;;  %v2757_v34 = vcombine.low %v2733_v18, %v2749_v19  ;;  %v2759_v36 = vcombine.low %v2740_v20, %v2756_v21  ;;  %v2758_v24 = vcombine.high %v2733_v18, %v2749_v19  ;;  %v2760_v37 = vcombine.high %v2740_v20, %v2756_v21 }
 0xcbe   :  { %v2657_v38 = vcombine.low %v2632_v25, %v2640_v29  ;;  %v2658_v5 = vcombine.high %v2632_v25, %v2640_v29  ;;  %v2673_v39 = vcombine.low %v2648_v30, %v2656_v32  ;;  %v2674_v40 = vcombine.high %v2648_v30, %v2656_v32 }
 0xcc0   :  { %v2665_v43 = vrot.slane %v2657_v38, %v5604_v61  ;;  %v2681_v28 = vrot.slane %v2673_v39, %v5604_v61  ;;  %v2672_v26 = vrot.slane %v2658_v5, %v5604_v61  ;;  %v2688_v42 = vrot.slane %v2674_v40, %v5604_v61 }
 0xcc2   :  { %v2689_v45 = vcombine.low %v2665_v43, %v2681_v28  ;;  %v2691_v46 = vcombine.low %v2672_v26, %v2688_v42  ;;  %v2690_v47 = vcombine.high %v2665_v43, %v2681_v28  ;;  %v2692_v48 = vcombine.high %v2672_v26, %v2688_v42 }
 0xcc4   :  { %v6138_v50 = vpack.c.bf16 %v2757_v34, %v2689_v45  ;;  %v6140_v51 = vpack.c.bf16 %v2759_v36, %v2691_v46  ;;  %v6142_v52 = vpack.c.bf16 %v2758_v24, %v2690_v47  ;;  %v6144_v53 = vpack.c.bf16 %v2760_v37, %v2692_v48 }
 0xd17   :  { %v2766_v31 = vpop.permute.xlu1 %2765 }
 0xd19   :  { %v2768_v57 = vpop.permute.xlu0 %2767 }
 0xd1b   :  { %v2770_v9 = vpop.permute.xlu1 %2769 }
 0xd1c   :  { %v2785_v15 = vcombine.low %v2762_v14, %v2770_v9  ;;  %v2786_v12 = vcombine.high %v2762_v14, %v2770_v9 }
 0xd1e   :  { %v2793_v6 = vrot.slane %v2785_v15, %v5599_v56  ;;  %v2800_v7 = vrot.slane %v2786_v12, %v5599_v56 }
 0xd1f   :  { %v2772_v41 = vpop.permute.xlu0 %2771 }
 0xd20   :  { %v2853_v58 = vcombine.low %v2764_v54, %v2772_v41  ;;  %v2854_v13 = vcombine.high %v2764_v54, %v2772_v41 }
 0xd22   :  { %v2861_v11 = vrot.slane %v2853_v58, %v5599_v56  ;;  %v2868_v16 = vrot.slane %v2854_v13, %v5599_v56 }
 0xd23   :  { %v2774_v62 = vpop.permute.xlu1 %2773 }
 0xd24   :  { %v2801_v63 = vcombine.low %v2766_v31, %v2774_v62  ;;  %v2802_v0 = vcombine.high %v2766_v31, %v2774_v62  ;;  %v2776_v2 = vpop.permute.xlu0 %2775 }
 0xd25   :  { %v2869_v3 = vcombine.low %v2768_v57, %v2776_v2  ;;  %v2870_v4 = vcombine.high %v2768_v57, %v2776_v2 }
 0xd26   :  { %v2809_v8 = vrot.slane %v2801_v63, %v5599_v56  ;;  %v2816_v44 = vrot.slane %v2802_v0, %v5599_v56 }
 0xd27   :  { %v2877_v1 = vrot.slane %v2869_v3, %v5599_v56  ;;  %v2884_v18 = vrot.slane %v2870_v4, %v5599_v56 }
 0xd28   :  { %v2817_v19 = vcombine.low %v2793_v6, %v2809_v8  ;;  %v2818_v20 = vcombine.high %v2793_v6, %v2809_v8  ;;  %v2833_v21 = vcombine.low %v2800_v7, %v2816_v44  ;;  %v2834_v25 = vcombine.high %v2800_v7, %v2816_v44 }
 0xd29   :  { %v2885_v29 = vcombine.low %v2861_v11, %v2877_v1  ;;  %v2886_v30 = vcombine.high %v2861_v11, %v2877_v1  ;;  %v2901_v32 = vcombine.low %v2868_v16, %v2884_v18  ;;  %v2902_v34 = vcombine.high %v2868_v16, %v2884_v18 }
 0xd2a   :  { %v2825_v36 = vrot.slane %v2817_v19, %v5604_v61  ;;  %v2832_v24 = vrot.slane %v2818_v20, %v5604_v61  ;;  %v2841_v37 = vrot.slane %v2833_v21, %v5604_v61  ;;  %v2848_v38 = vrot.slane %v2834_v25, %v5604_v61 }
 0xd2b   :  { %v2893_v5 = vrot.slane %v2885_v29, %v5604_v61  ;;  %v2900_v39 = vrot.slane %v2886_v30, %v5604_v61  ;;  %v2909_v40 = vrot.slane %v2901_v32, %v5604_v61  ;;  %v2916_v43 = vrot.slane %v2902_v34, %v5604_v61 }
 0xd2c   :  { %v2921_v28 = vcombine.low %v2825_v36, %v2832_v24  ;;  %v4841_v26 = vcombine.high %v2825_v36, %v2832_v24  ;;  %v2937_v42 = vcombine.low %v2841_v37, %v2848_v38  ;;  %v4842_v45 = vcombine.high %v2841_v37, %v2848_v38 }
 0xd2d   :  { %v2989_v46 = vcombine.low %v2893_v5, %v2900_v39  ;;  %v4843_v47 = vcombine.high %v2893_v5, %v2900_v39  ;;  %v3005_v48 = vcombine.low %v2909_v40, %v2916_v43  ;;  %v4844_v14 = vcombine.high %v2909_v40, %v2916_v43 }
 0xd2e   :  { %v2928_v54 = vrot.slane %v2921_v28, %v5599_v56  ;;  %v2936_v31 = vrot.slane %v4841_v26, %v5599_v56  ;;  %v2944_v57 = vrot.slane %v2937_v42, %v5599_v56  ;;  %v2952_v9 = vrot.slane %v4842_v45, %v5599_v56 }
 0xd2f   :  { %v2996_v41 = vrot.slane %v2989_v46, %v5599_v56  ;;  %v3004_v15 = vrot.slane %v4843_v47, %v5599_v56  ;;  %v3012_v12 = vrot.slane %v3005_v48, %v5599_v56  ;;  %v3020_v58 = vrot.slane %v4844_v14, %v5599_v56 }
 0xd30   :  { %v2953_v13 = vcombine.low %v2928_v54, %v2936_v31  ;;  %v2969_v62 = vcombine.low %v2944_v57, %v2952_v9  ;;  %v2954_v4 = vcombine.high %v2928_v54, %v2936_v31  ;;  %v2970_v6 = vcombine.high %v2944_v57, %v2952_v9 }
 0xd31   :  { %v3021_v2 = vcombine.low %v2996_v41, %v3004_v15  ;;  %v3037_v3 = vcombine.low %v3012_v12, %v3020_v58  ;;  %v3022_v18 = vcombine.high %v2996_v41, %v3004_v15  ;;  %v3038_v19 = vcombine.high %v3012_v12, %v3020_v58 }
 0xd32   :  { %v2961_v63 = vrot.slane %v2953_v13, %v5604_v61  ;;  %v2977_v0 = vrot.slane %v2969_v62, %v5604_v61  ;;  %v2968_v11 = vrot.slane %v2954_v4, %v5604_v61  ;;  %v2984_v1 = vrot.slane %v2970_v6, %v5604_v61 }
 0xd33   :  { %v3029_v8 = vrot.slane %v3021_v2, %v5604_v61  ;;  %v3045_v44 = vrot.slane %v3037_v3, %v5604_v61  ;;  %v3036_v25 = vrot.slane %v3022_v18, %v5604_v61  ;;  %v3052_v29 = vrot.slane %v3038_v19, %v5604_v61  ;;  %v3062_v19 = vpop.permute.xlu0 %3061 }
 0xd34   :  { %v2985_v7 = vcombine.low %v2961_v63, %v2977_v0  ;;  %v2987_v21 = vcombine.low %v2968_v11, %v2984_v1  ;;  %v2986_v34 = vcombine.high %v2961_v63, %v2977_v0  ;;  %v2988_v39 = vcombine.high %v2968_v11, %v2984_v1  ;;  %v3060_v1 = vpop.permute.xlu1 %3059 }
 0xd35   :  { %v3053_v16 = vcombine.low %v3029_v8, %v3045_v44  ;;  %v3055_v32 = vcombine.low %v3036_v25, %v3052_v29  ;;  %v3054_v36 = vcombine.high %v3029_v8, %v3045_v44  ;;  %v3056_v40 = vcombine.high %v3036_v25, %v3052_v29 }
 0xd37   :  { %v3353_v20 = vpack.c.bf16 %v3053_v16, %v2985_v7  ;;  %v3355_v24 = vpack.c.bf16 %v3055_v32, %v2987_v21  ;;  %v3354_v38 = vpack.c.bf16 %v3054_v36, %v2986_v34  ;;  %v3356_v43 = vpack.c.bf16 %v3056_v40, %v2988_v39  ;;  %v3074_v60 = vpop.permute.xlu0 %3073 }
 0xd38   :  { %v3066_v18 = vpop.permute.xlu1 %3065  ;;  %v3161_v29 = vcombine.low %v3062_v19, %v3074_v60 }
 0xd39   :  { %v3361_v30 = vsel %vm1097_vm2, %v3353_v20, 0  ;;  %v3455_v37 = vsel %vm1097_vm2, %v3355_v24, 0  ;;  %v3408_v5 = vsel %vm1097_vm2, %v3354_v38, 0 }
 0xd3a   :  { %5106 = vmatpush3.bf16.xpose.msra.mxu1 %v3361_v30  ;;  %5118 = vmatpush3.bf16.xpose.msra.mxu0 %v3455_v37  ;;  %v3162_v30 = vcombine.high %v3062_v19, %v3074_v60  ;;  %v3169_v34 = vrot.slane %v3161_v29, %v5599_v56 }
 0xd3b   :  { %5111 = vmatprep.subr.bf16.mxu1 %v5442_v55  ;;  %5129 = vmatprep.subr.bf16.mxu0 %v5442_v55 }
 0xd3c   :  { %v3068_v20 = vpop.permute.xlu1 %3067  ;;  %v3176_v36 = vrot.slane %v3162_v30, %v5599_v56 }
 0xd3d   :  { %v3145_v21 = vcombine.low %v6082_v10, %v3068_v20  ;;  %v3146_v25 = vcombine.high %v6082_v10, %v3068_v20 }
 0xd3f   :  { %v3153_v32 = vrot.slane %v3145_v21, %v5599_v56  ;;  %v3160_v59 = vrot.slane %v3146_v25, %v5599_v56 }
 0xd41   :  { %5108 = vmatmul.mubr.msk.bf16.vlgmr.msra.gmra.mrb[32].mxu1 %vm1097_vm2, %v6138_v50  ;;  %5120 = vmatmul.mubr.msk.bf16.vlgmr.msra.gmra.mrb[20].mxu0 %vm1097_vm2, %v6140_v51  ;;  %v3502_v50 = vsel %vm1097_vm2, %v3356_v43, 0  ;;  %v3177_v24 = vcombine.low %v3153_v32, %v3169_v34  ;;  %v3178_v37 = vcombine.high %v3153_v32, %v3169_v34  ;;  %v3193_v38 = vcombine.low %v3160_v59, %v3176_v36 }
 0xd42   :  { %5112 = vmatpush3.bf16.xpose.msra.mxu1 %v3408_v5  ;;  %5113 = vmatprep.mubr.msk.bf16.mxu1 %vm5443_vm1, %v5442_v55  ;;  %v3194_v5 = vcombine.high %v3160_v59, %v3176_v36 }
 0xd43   :  { %5123 = vmatprep.subr.bf16.mxu1 %v5442_v55  ;;  %5131 = vmatprep.mubr.msk.bf16.mxu0 %vm5443_vm1, %v5442_v55  ;;  %v3185_v39 = vrot.slane %v3177_v24, %v5604_v61  ;;  %v3192_v40 = vrot.slane %v3178_v37, %v5604_v61  ;;  %v3201_v10 = vrot.slane %v3193_v38, %v5604_v61 }
 0xd44   :  { %v3208_v43 = vrot.slane %v3194_v5, %v5604_v61 }
 0xd49   :  { %5114 = vmatmul.mubr.msk.bf16.vlgmr.msra.gmra.mrb[36].mxu1 %vm1097_vm2, %v6142_v52 }
 0xd4a   :  { %5124 = vmatpush3.bf16.xpose.msra.mxu1 %v3502_v50  ;;  %5125 = vmatprep.mubr.msk.bf16.mxu1 %vm5443_vm1, %v5442_v55  ;;  %v3077_v50 = vcombine.low %v6079_v17, %v3066_v18 }
 0xd4b   :  { %5135 = vmatprep.subr.bf16.mxu1 %v5442_v55 }
 0xd51   :  { %5126 = vmatmul.mubr.msk.bf16.vlgmr.msra.gmra.mrb[40].mxu1 %vm1097_vm2, %v6144_v53 }
 0xd52   :  { %5137 = vmatprep.mubr.msk.bf16.mxu1 %vm5443_vm1, %v5442_v55 }
 0xe14   :  { %v3397_v51 = vpop.f32.mrb[32].mxu1  ;;  %v3491_v53 = vpop.f32.mrb[20].mxu0 }
 0xe15   :  { %v6204_v28 = vsel %vm5729_vm6, %v3397_v51, -1e+30  ;;  %v5109_v52 = vpop.f32.mrb[33].mxu1  ;;  %v5121_v48 = vpop.f32.mrb[21].mxu0  ;;  %v6248_v11 = vsel %vm5729_vm6, %v3491_v53, -1e+30  ;;  %v3078_v51 = vcombine.high %v6079_v17, %v3066_v18  ;;  %v3297_v53 = vcombine.low %v3201_v10, %v3208_v43 }
 0xe16   :  { %v3400_v26 = vpop.f32.mrb[34].mxu1  ;;  %v3553_v42 = vsel %vm1097_vm2, %v6204_v28, -inf  ;;  %v3494_v14 = vpop.f32.mrb[22].mxu0  ;;  %v3565_v16 = vsel %vm1097_vm2, %v6248_v11, -inf }
 0xe17   :  { %v6210_v45 = vsel %vm5733_vm7, %v3400_v26, -1e+30  ;;  %3554 = vmax.xlane.f32.xlu1 %v3553_v42  ;;  %v5110_v46 = vpop.f32.mrb[35].mxu1  ;;  %v6216_v54 = vsel %vm5733_vm7, %v3494_v14, -1e+30  ;;  %v5122_v31 = vpop.f32.mrb[23].mxu0  ;;  %v3281_v42 = vcombine.low %v3185_v39, %v3192_v40 }
 0xe18   :  { %v3556_v47 = vsel %vm1097_vm2, %v6210_v45, -inf  ;;  %v3568_v9 = vsel %vm1097_vm2, %v6216_v54, -inf  ;;  %v4847_v46 = vcombine.high %v3185_v39, %v3192_v40 }
 0xe19   :  { %3557 = vmax.xlane.f32.xlu0 %v3556_v47  ;;  %v4848_v47 = vcombine.high %v3201_v10, %v3208_v43 }
 0xe1c   :  { %v3444_v57 = vpop.f32.mrb[36].mxu1 }
 0xe1d   :  { %v6222_v41 = vsel %vm5729_vm6, %v3444_v57, -1e+30  ;;  %3569 = vmax.xlane.f32.xlu0 %v3568_v9  ;;  %v5115_v15 = vpop.f32.mrb[37].mxu1  ;;  %v3085_v57 = vrot.slane %v3077_v50, %v5599_v56  ;;  %v3092_v9 = vrot.slane %v3078_v51, %v5599_v56 }
 0xe1e   :  { %v3447_v12 = vpop.f32.mrb[38].mxu1  ;;  %v3559_v13 = vsel %vm1097_vm2, %v6222_v41, -inf }
 0xe1f   :  { %v5116_v58 = vpop.f32.mrb[39].mxu1  ;;  %v6228_v62 = vsel %vm5733_vm7, %v3447_v12, -1e+30 }
 0xe20   :  { %v3562_v0 = vsel %vm1097_vm2, %v6228_v62, -inf }
 0xe21   :  { %3560 = vmax.xlane.f32.xlu0 %v3559_v13  ;;  %v3288_v13 = vrot.slane %v3281_v42, %v5599_v56 }
 0xe24   :  { %v3538_v63 = vpop.f32.mrb[40].mxu1 }
 0xe25   :  { %v6234_v2 = vsel %vm5729_vm6, %v3538_v63, -1e+30  ;;  %3563 = vmax.xlane.f32.xlu0 %v3562_v0  ;;  %v5127_v3 = vpop.f32.mrb[41].mxu1  ;;  %v3304_v63 = vrot.slane %v3297_v53, %v5599_v56  ;;  %v3312_v0 = vrot.slane %v4848_v47, %v5599_v56 }
 0xe26   :  { %v3541_v4 = vpop.f32.mrb[42].mxu1  ;;  %v3571_v7 = vsel %vm1097_vm2, %v6234_v2, -inf }
 0xe27   :  { %v5128_v6 = vpop.f32.mrb[43].mxu1  ;;  %v6242_v8 = vsel %vm5733_vm7, %v3541_v4, -1e+30  ;;  %v3329_v60 = vcombine.low %v3304_v63, %v3312_v0  ;;  %v3330_v59 = vcombine.high %v3304_v63, %v3312_v0 }
 0xe28   :  { %3071 = vrot.lane.b32.xlu1 %v6079_v17, %s5438_s17  ;;  %v3574_v44 = vsel %vm1097_vm2, %v6242_v8, -inf }
 0xe29   :  { %3572 = vmax.xlane.f32.xlu0 %v3571_v7  ;;  %v3337_v40 = vrot.slane %v3329_v60, %v5604_v61 }
 0xe2d   :  { %3575 = vmax.xlane.f32.xlu0 %v3574_v44 }
 0xe4c   :  { %3566 = vmax.xlane.f32.xlu1 %v3565_v16 }
 0xea4   :  { %v3555_v52 = vpop.xlane.xlu1 %3554 }
 0xea5   :  { %v3577_v26 = vsub.f32 %v6204_v28, %v3555_v52  ;;  %v3296_v28 = vrot.slane %v4847_v46, %v5599_v56  ;;  %v3344_v46 = vrot.slane %v3330_v59, %v5604_v61 }
 0xea6   :  { %v3558_v48 = vpop.xlane.xlu0 %3557 }
 0xea7   :  { %v3585_v14 = vmul.f32 1.442695, %v3577_v26  ;;  %v3578_v31 = vsub.f32 %v6210_v45, %v3558_v48  ;;  %v3313_v20 = vcombine.low %v3288_v13, %v3296_v28 }
 0xea8   :  { %v3072_v15 = vpop.permute.xlu1 %3071 }
 0xea9   :  { %5361 = vpow2.f32 %v3585_v14  ;;  %v3587_v12 = vmul.f32 1.442695, %v3578_v31  ;;  %v3093_v58 = vcombine.low %v3060_v1, %v3072_v15  ;;  %v3094_v17 = vcombine.high %v3060_v1, %v3072_v15 }
 0xeaa   :  { %v3570_v3 = vpop.xlane.xlu0 %3569  ;;  %v3321_v39 = vrot.slane %v3313_v20, %v5604_v61 }
 0xeab   :  { %5363 = vpow2.f32 %v3587_v12  ;;  %v3101_v45 = vrot.slane %v3093_v58, %v5599_v56  ;;  %v3108_v4 = vrot.slane %v3094_v17, %v5599_v56  ;;  %v3582_v6 = vsub.f32 %v6216_v54, %v3570_v3 }
 0xeac   :  { %v3314_v54 = vcombine.high %v3288_v13, %v3296_v28  ;;  %v3345_v13 = vcombine.low %v3321_v39, %v3337_v40  ;;  %v3346_v3 = vcombine.high %v3321_v39, %v3337_v40 }
 0xead   :  { %v3109_v7 = vcombine.low %v3085_v57, %v3101_v45  ;;  %v3110_v44 = vcombine.high %v3085_v57, %v3101_v45  ;;  %v3125_v16 = vcombine.low %v3092_v9, %v3108_v4  ;;  %v3126_v1 = vcombine.high %v3092_v9, %v3108_v4 }
 0xeae   :  { %v3595_v18 = vmul.f32 1.442695, %v3582_v6  ;;  %v3561_v19 = vpop.xlane.xlu0 %3560  ;;  %v3328_v42 = vrot.slane %v3314_v54, %v5604_v61 }
 0xeaf   :  { %v3117_v21 = vrot.slane %v3109_v7, %v5604_v61  ;;  %v3124_v25 = vrot.slane %v3110_v44, %v5604_v61  ;;  %v3133_v29 = vrot.slane %v3125_v16, %v5604_v61  ;;  %v3140_v30 = vrot.slane %v3126_v1, %v5604_v61 }
 0xeb0   :  { %5365 = vpow2.f32 %v3595_v18  ;;  %v3579_v32 = vsub.f32 %v6222_v41, %v3561_v19  ;;  %v3347_v45 = vcombine.low %v3328_v42, %v3344_v46  ;;  %v3348_v16 = vcombine.high %v3328_v42, %v3344_v46 }
 0xeb1   :  { %v3213_v34 = vcombine.low %v3117_v21, %v3124_v25  ;;  %v4845_v36 = vcombine.high %v3117_v21, %v3124_v25  ;;  %v3229_v24 = vcombine.low %v3133_v29, %v3140_v30  ;;  %v4846_v37 = vcombine.high %v3133_v29, %v3140_v30 }
 0xeb2   :  { %v3589_v38 = vmul.f32 1.442695, %v3579_v32  ;;  %v3564_v5 = vpop.xlane.xlu0 %3563 }
 0xeb3   :  { %v5362_v10 = vpop.eup %5361  ;;  %v3220_v43 = vrot.slane %v3213_v34, %v5599_v56  ;;  %v3228_v50 = vrot.slane %v4845_v36, %v5599_v56  ;;  %v3236_v51 = vrot.slane %v3229_v24, %v5599_v56  ;;  %v3244_v41 = vrot.slane %v4846_v37, %v5599_v56 }
 0xeb4   :  { %v3580_v52 = vsub.f32 %v6228_v62, %v3564_v5  ;;  %v3601_v26 = vsel %vm1097_vm2, %v5362_v10, 0.0  ;;  %5367 = vpow2.f32 %v3589_v38 }
 0xeb5   :  { %v5364_v53 = vpop.eup %5363  ;;  %3602 = vadd.xlane.f32.xlu1 %v3601_v26  ;;  %v3245_v47 = vcombine.low %v3220_v43, %v3228_v50  ;;  %v3261_v48 = vcombine.low %v3236_v51, %v3244_v41  ;;  %v3246_v14 = vcombine.high %v3220_v43, %v3228_v50  ;;  %v3262_v31 = vcombine.high %v3236_v51, %v3244_v41  ;;  %v5266_v51 = vld [vmem:[%s6537_s5 + $0x28] sm:$0xff]  }
 0xeb6   :  { %v3591_v57 = vmul.f32 1.442695, %v3580_v52  ;;  %v3573_v9 = vpop.xlane.xlu0 %3572  ;;  %v3604_v15 = vsel %vm1097_vm2, %v5364_v53, 0.0  ;;  %v3625_v29 = vpack.c.bf16 %v5364_v53, %v5362_v10 }
 0xeb7   :  { %v3583_v12 = vsub.f32 %v6234_v2, %v3573_v9  ;;  %3605 = vadd.xlane.f32.xlu0 %v3604_v15  ;;  %v3253_v62 = vrot.slane %v3245_v47, %v5604_v61  ;;  %v3269_v58 = vrot.slane %v3261_v48, %v5604_v61  ;;  %v3260_v17 = vrot.slane %v3246_v14, %v5604_v61 }
 0xeb8   :  { %5369 = vpow2.f32 %v3591_v57  ;;  %v3276_v28 = vrot.slane %v3262_v31, %v5604_v61 }
 0xeb9   :  { %v3277_v63 = vcombine.low %v3253_v62, %v3269_v58  ;;  %v3278_v0 = vcombine.high %v3253_v62, %v3269_v58  ;;  %v3597_v6 = vmul.f32 1.442695, %v3583_v12 }
 0xeba   :  { %v5366_v4 = vpop.eup %5365  ;;  %v3576_v7 = vpop.xlane.xlu0 %3575  ;;  %v3279_v44 = vcombine.low %v3260_v17, %v3276_v28  ;;  %v3280_v2 = vcombine.high %v3260_v17, %v3276_v28 }
 0xebb   :  { %v3584_v1 = vsub.f32 %v6242_v8, %v3576_v7  ;;  %v3616_v18 = vsel %vm1097_vm2, %v5366_v4, 0.0  ;;  %v3629_v19 = vpack.c.bf16 %v3345_v13, %v3277_v63  ;;  %v3630_v20 = vpack.c.bf16 %v3346_v3, %v3278_v0 }
 0xebc   :  { %3617 = vadd.xlane.f32.xlu0 %v3616_v18  ;;  %v3631_v60 = vpack.c.bf16 %v3347_v45, %v3279_v44  ;;  %v3632_v21 = vpack.c.bf16 %v3348_v16, %v3280_v2  ;;  %5371 = vpow2.f32 %v3597_v6 }
 0xebd   :  { %v3599_v25 = vmul.f32 1.442695, %v3584_v1  ;;  %5130 = vmatpush3.bf16.msra.mxu0 %v3629_v19  ;;  %5136 = vmatpush3.bf16.msra.mxu1 %v3630_v20 }
 0xebe   :  { %5141 = vmatprep.subr.bf16.mxu0 %v5442_v55  ;;  %5147 = vmatprep.subr.bf16.mxu1 %v5442_v55  ;;  %v5368_v30 = vpop.eup %5367 }
 0xebf   :  { %5373 = vpow2.f32 %v3599_v25  ;;  %v3607_v43 = vsel %vm1097_vm2, %v5368_v30, 0.0 }
 0xec0   :  { %5132 = vmatmul.mubr.msk.bf16.vlgmr.msra.gmra.mrb[24].mxu0 %vm1097_vm2, %v3625_v29 }
 0xec1   :  { %5142 = vmatpush3.bf16.msra.mxu0 %v3631_v60  ;;  %5143 = vmatprep.mubr.msk.bf16.mxu0 %vm5443_vm1, %v5442_v55 }
 0xec2   :  { %v5370_v8 = vpop.eup %5369  ;;  %5153 = vmatprep.subr.bf16.mxu0 %v5442_v55 }
 0xec3   :  { %v3610_v32 = vsel %vm1097_vm2, %v5370_v8, 0.0  ;;  %v3626_v54 = vpack.c.bf16 %v5370_v8, %v5368_v30 }
 0xec4   :  { %3611 = vadd.xlane.f32.xlu0 %v3610_v32 }
 0xec5   :  { %5138 = vmatmul.mubr.msk.bf16.vlgmr.msra.gmra.mrb[44].mxu1 %vm1097_vm2, %v3626_v54 }
 0xec6   :  { %5148 = vmatpush3.bf16.msra.mxu1 %v3632_v21  ;;  %5149 = vmatprep.mubr.msk.bf16.mxu1 %vm5443_vm1, %v5442_v55  ;;  %v5372_v59 = vpop.eup %5371 }
 0xec7   :  { %v3619_v50 = vsel %vm1097_vm2, %v5372_v59, 0.0 }
 0xec9   :  { %v5374_v34 = vpop.eup %5373 }
 0xeca   :  { %v3622_v36 = vsel %vm1097_vm2, %v5374_v34, 0.0  ;;  %v3628_v24 = vpack.c.bf16 %v5374_v34, %v5372_v59 }
 0xecb   :  { %3623 = vadd.xlane.f32.xlu0 %v3622_v36 }
 0xecd   :  { %5150 = vmatmul.mubr.msk.bf16.vlgmr.msra.gmra.mrb[48].mxu1 %vm1097_vm2, %v3628_v24 }
 0xece   :  { %4359 = vmatprep.mubr.bf16.mxu1 %v5435_v22 }
 0xed9   :  { %v3567_v37 = vpop.xlane.xlu1 %3566 }
 0xeda   :  { %v3581_v38 = vsub.f32 %v6248_v11, %v3567_v37  ;;  %v5265_v11 = vld [vmem:[%s6537_s5 + $0x20] sm:$0xff]  }
 0xedc   :  { %v3593_v5 = vmul.f32 1.442695, %v3581_v38 }
 0xede   :  { %5375 = vpow2.f32 %v3593_v5 }
 0xee8   :  { %v5376_v39 = vpop.eup %5375 }
 0xee9   :  { %v3613_v40 = vsel %vm1097_vm2, %v5376_v39, 0.0  ;;  %v3627_v10 = vpack.c.bf16 %v5366_v4, %v5376_v39 }
 0xeea   :  { %3614 = vadd.xlane.f32.xlu1 %v3613_v40 }
 0xeeb   :  { %5144 = vmatmul.mubr.msk.bf16.vlgmr.msra.gmra.mrb[28].mxu0 %vm1097_vm2, %v3627_v10 }
 0xeec   :  { %5161 = vmatprep.mubr.msk.bf16.mxu0 %vm5443_vm1, %v5442_v55  ;;  %5154 = vmatpush3.bf16.msra.mxu0 %v5265_v11 }
 0xeed   :  { %5155 = vmatprep.subr.bf16.mxu0 %v5442_v55 }
 0xeee   :  { %3608 = vadd.xlane.f32.xlu1 %v3607_v43 }
 0xef0   :  { %5156 = vmatpush3.bf16.msra.mxu0 %v5266_v51 }
 0xef1   :  { %5157 = vmatprep.subr.bf16.mxu0 %v5442_v55 }
 0xef2   :  { %3620 = vadd.xlane.f32.xlu1 %v3619_v50 }
 0xf42   :  { %v3603_v41 = vpop.xlane.xlu1 %3602 }
 0xf44   :  { %v3606_v52 = vpop.xlane.xlu0 %3605 }
 0xf49   :  { %v3618_v42 = vpop.xlane.xlu0 %3617 }
 0xf51   :  { %v3612_v53 = vpop.xlane.xlu0 %3611 }
 0xf58   :  { %v3624_v31 = vpop.xlane.xlu0 %3623 }
 0xf77   :  { %v3615_v26 = vpop.xlane.xlu1 %3614 }
 0xf7b   :  { %v3609_v46 = vpop.xlane.xlu1 %3608 }
 0xf7c   :  { %5377 = vrcp.f32 %v3609_v46 }
 0xf7f   :  { %v3621_v47 = vpop.xlane.xlu1 %3620 }
 0xf80   :  { %5379 = vrcp.f32 %v3621_v47 }
 0xf81   :  { %5381 = vrcp.f32 %v3612_v53 }
 0xf82   :  { %5383 = vrcp.f32 %v3624_v31 }
 0xf83   :  { %5385 = vrcp.f32 %v3603_v41 }
 0xf84   :  { %5387 = vrcp.f32 %v3615_v26 }
 0xf85   :  { %5389 = vrcp.f32 %v3606_v52 }
 0xf86   :  { %v5378_v17 = vpop.eup %5377  ;;  %5391 = vrcp.f32 %v3618_v42 }
 0xf8a   :  { %v5380_v13 = vpop.eup %5379 }
 0xf8b   :  { %v5382_v63 = vpop.eup %5381 }
 0xf8c   :  { %v5384_v4 = vpop.eup %5383 }
 0xf8d   :  { %v5386_v20 = vpop.eup %5385 }
 0xf8e   :  { %v5388_v60 = vpop.eup %5387 }
 0xf8f   :  { %v5390_v25 = vpop.eup %5389 }
 0xf90   :  { %v5392_v32 = vpop.eup %5391 }
 0xf93   :  { %v3670_v48 = vpop.f32.mrb[24].mxu0 }
 0xf94   :  { %v5133_v14 = vpop.f32.mrb[25].mxu0  ;;  %v3817_v29 = vmul.f32 %v5386_v20, %v3670_v48 }
 0xf95   :  { %v3673_v57 = vpop.f32.mrb[26].mxu0 }
 0xf96   :  { %v5134_v9 = vpop.f32.mrb[27].mxu0  ;;  %v3818_v59 = vmul.f32 %v5390_v25, %v3673_v57 }
 0xf98   :  { %v3714_v15 = vpop.f32.mrb[44].mxu1 }
 0xf99   :  { %v5139_v12 = vpop.f32.mrb[45].mxu1  ;;  %v3819_v0 = vmul.f32 %v5378_v17, %v3714_v15 }
 0xf9a   :  { %v3717_v62 = vpop.f32.mrb[46].mxu1 }
 0xf9b   :  { %v5140_v58 = vpop.f32.mrb[47].mxu1  ;;  %v3820_v7 = vmul.f32 %v5382_v63, %v3717_v62 }
 0xfa0   :  { %v3802_v28 = vpop.f32.mrb[48].mxu1 }
 0xfa1   :  { %v3823_v3 = vmul.f32 %v5380_v13, %v3802_v28  ;;  %v5151_v45 = vpop.f32.mrb[49].mxu1 }
 0xfa2   :  { %v3805_v6 = vpop.f32.mrb[50].mxu1 }
 0xfa3   :  { %v3841_v44 = vcombine.low %v3819_v0, %v3823_v3  ;;  %v3842_v2 = vcombine.high %v3819_v0, %v3823_v3  ;;  %v3824_v16 = vmul.f32 %v5384_v4, %v3805_v6  ;;  %v5152_v1 = vpop.f32.mrb[51].mxu1 }
 0xfa5   :  { %v3909_v18 = vcombine.low %v3820_v7, %v3824_v16  ;;  %v3910_v19 = vcombine.high %v3820_v7, %v3824_v16  ;;  %v3849_v38 = vrot.slane %v3841_v44, %v5599_v56  ;;  %v3856_v5 = vrot.slane %v3842_v2, %v5599_v56 }
 0xfa7   :  { %v3917_v52 = vrot.slane %v3909_v18, %v5599_v56  ;;  %v3924_v26 = vrot.slane %v3910_v19, %v5599_v56 }
 0xfbe   :  { %v3758_v21 = vpop.f32.mrb[28].mxu0 }
 0xfbf   :  { %v3821_v30 = vmul.f32 %v5388_v60, %v3758_v21  ;;  %v5145_v8 = vpop.f32.mrb[29].mxu0  ;;  %v5267_v60 = vld [vmem:[%s6537_s5 + $0x30] sm:$0xff]  }
 0xfc0   :  { %v3761_v54 = vpop.f32.mrb[30].mxu0  ;;  %5158 = vmatpush3.bf16.msra.mxu0 %v5267_v60 }
 0xfc1   :  { %v3825_v34 = vcombine.low %v3817_v29, %v3821_v30  ;;  %v3826_v36 = vcombine.high %v3817_v29, %v3821_v30  ;;  %v3822_v24 = vmul.f32 %v5392_v32, %v3761_v54  ;;  %v5146_v37 = vpop.f32.mrb[31].mxu0  ;;  %5159 = vmatprep.subr.bf16.mxu0 %v5442_v55 }
 0xfc3   :  { %v3833_v39 = vrot.slane %v3825_v34, %v5599_v56  ;;  %v3840_v40 = vrot.slane %v3826_v36, %v5599_v56  ;;  %v3893_v10 = vcombine.low %v3818_v59, %v3822_v24  ;;  %v3894_v43 = vcombine.high %v3818_v59, %v3822_v24 }
 0xfc5   :  { %v3857_v50 = vcombine.low %v3833_v39, %v3849_v38  ;;  %v3858_v11 = vcombine.high %v3833_v39, %v3849_v38  ;;  %v3873_v51 = vcombine.low %v3840_v40, %v3856_v5  ;;  %v3874_v41 = vcombine.high %v3840_v40, %v3856_v5 }
 0xfc6   :  { %v3901_v42 = vrot.slane %v3893_v10, %v5599_v56  ;;  %v3908_v46 = vrot.slane %v3894_v43, %v5599_v56 }
 0xfc7   :  { %v3865_v53 = vrot.slane %v3857_v50, %v5604_v61  ;;  %v3872_v47 = vrot.slane %v3858_v11, %v5604_v61  ;;  %v3881_v48 = vrot.slane %v3873_v51, %v5604_v61  ;;  %v3888_v14 = vrot.slane %v3874_v41, %v5604_v61  ;;  %v5268_v11 = vld [vmem:[%s6537_s5 + $0x38] sm:$0xff]  }
 0xfc8   :  { %v3925_v31 = vcombine.low %v3901_v42, %v3917_v52  ;;  %v3926_v57 = vcombine.high %v3901_v42, %v3917_v52  ;;  %v3941_v9 = vcombine.low %v3908_v46, %v3924_v26  ;;  %v3942_v15 = vcombine.high %v3908_v46, %v3924_v26  ;;  %5160 = vmatpush3.bf16.msra.mxu0 %v5268_v11  ;;  %v4878_v11 = vld [vmem:[%s6539_s7 + $0x1] ss:$0 sm:$0xff] }
 0xfc9   :  { %v3961_v12 = vcombine.low %v3865_v53, %v3872_v47  ;;  %v4857_v62 = vcombine.high %v3865_v53, %v3872_v47  ;;  %v3977_v58 = vcombine.low %v3881_v48, %v3888_v14  ;;  %v4858_v17 = vcombine.high %v3881_v48, %v3888_v14 }
 0xfca   :  { %v3933_v13 = vrot.slane %v3925_v31, %v5604_v61  ;;  %v3940_v28 = vrot.slane %v3926_v57, %v5604_v61  ;;  %v3949_v63 = vrot.slane %v3941_v9, %v5604_v61  ;;  %v3956_v0 = vrot.slane %v3942_v15, %v5604_v61 }
 0xfcb   :  { %v3968_v3 = vrot.slane %v3961_v12, %v5599_v56  ;;  %v3976_v45 = vrot.slane %v4857_v62, %v5599_v56  ;;  %v3984_v4 = vrot.slane %v3977_v58, %v5599_v56  ;;  %v3992_v6 = vrot.slane %v4858_v17, %v5599_v56 }
 0xfcc   :  { %v4029_v7 = vcombine.low %v3933_v13, %v3940_v28  ;;  %v4859_v44 = vcombine.high %v3933_v13, %v3940_v28  ;;  %v4045_v2 = vcombine.low %v3949_v63, %v3956_v0  ;;  %v4860_v16 = vcombine.high %v3949_v63, %v3956_v0  ;;  %v4870_v0 = vld [vmem:[%s6538_s6 + $0x1] ss:$0 sm:$0xff] }
 0xfcd   :  { %v3994_v1 = vcombine.high %v3968_v3, %v3976_v45  ;;  %v4010_v18 = vcombine.high %v3984_v4, %v3992_v6  ;;  %v3993_v19 = vcombine.low %v3968_v3, %v3976_v45  ;;  %v4009_v20 = vcombine.low %v3984_v4, %v3992_v6 }
 0xfce   :  { %v4036_v21 = vrot.slane %v4029_v7, %v5599_v56  ;;  %v4044_v25 = vrot.slane %v4859_v44, %v5599_v56  ;;  %v4052_v29 = vrot.slane %v4045_v2, %v5599_v56  ;;  %v4060_v30 = vrot.slane %v4860_v16, %v5599_v56 }
 0xfcf   :  { %v4008_v8 = vrot.slane %v3994_v1, %v5604_v61  ;;  %v4024_v32 = vrot.slane %v4010_v18, %v5604_v61  ;;  %v4001_v54 = vrot.slane %v3993_v19, %v5604_v61  ;;  %v4017_v59 = vrot.slane %v4009_v20, %v5604_v61 }
 0xfd0   :  { %v4062_v34 = vcombine.high %v4036_v21, %v4044_v25  ;;  %v4078_v36 = vcombine.high %v4052_v29, %v4060_v30  ;;  %v4061_v24 = vcombine.low %v4036_v21, %v4044_v25  ;;  %v4077_v37 = vcombine.low %v4052_v29, %v4060_v30 }
 0xfd1   :  { %v4027_v38 = vcombine.low %v4008_v8, %v4024_v32  ;;  %v4025_v5 = vcombine.low %v4001_v54, %v4017_v59  ;;  %v4026_v39 = vcombine.high %v4001_v54, %v4017_v59  ;;  %v4028_v40 = vcombine.high %v4008_v8, %v4024_v32  ;;  %v5271_v32 = vld [vmem:[%s6541_s9 + $0x44] ss:$8 sps:$4 sm:$0xff]   ;;  %v5269_v54 = vld [vmem:[%s6541_s9 + $0x40] ss:$8 sps:$4 sm:$0xff]   ;;  %v5274_v59 = vld [vmem:[%s6541_s9 + $0x54] ss:$8 sps:$4 sm:$0xff]  }
 0xfd2   :  { %v4076_v56 = vrot.slane %v4062_v34, %v5604_v61  ;;  %v4092_v10 = vrot.slane %v4078_v36, %v5604_v61  ;;  %v4069_v43 = vrot.slane %v4061_v24, %v5604_v61  ;;  %v4085_v50 = vrot.slane %v4077_v37, %v5604_v61  ;;  %4327 = vmatprep.subr.bf16.mxu1 %v5271_v32  ;;  %v5272_v34 = vld [vmem:[%s6541_s9 + $0x50] ss:$8 sps:$4 sm:$0xff]   ;;  %v5275_v36 = vld [vmem:[%s6541_s9 + $0x60] ss:$8 sps:$4 sm:$0xff]   ;;  %v5277_v24 = vld [vmem:[%s6541_s9 + $0x64] ss:$8 sps:$4 sm:$0xff]  }
 0xfd3   :  { %4328 = vmatpush1.bf16.msra.mxu1 %v5269_v54  ;;  %v5280_v37 = vld [vmem:[%s6541_s9 + $0x74] ss:$8 sps:$4 sm:$0xff]  }
 0xfd4   :  { %v4095_v51 = vcombine.low %v4076_v56, %v4092_v10  ;;  %v4094_v41 = vcombine.high %v4069_v43, %v4085_v50  ;;  %v4093_v52 = vcombine.low %v4069_v43, %v4085_v50  ;;  %v4096_v55 = vcombine.high %v4076_v56, %v4092_v10  ;;  %4329 = vmatprep.subr.bf16.mxu1 %v5274_v59 }
 0xfd6   :  { %v5199_v26 = vpack.i.bf16 %v4095_v51, %v4027_v38  ;;  %v5194_v42 = vpack.i.bf16 %v4094_v41, %v4026_v39  ;;  %v5204_v46 = vpack.i.bf16 %v4096_v55, %v4028_v40  ;;  %v5278_v38 = vld [vmem:[%s6541_s9 + $0x70] ss:$8 sps:$4 sm:$0xff]  }
 0xfd7   :  { %4330 = vmatpush1.bf16.msra.mxu1 %v5272_v34 }
 0xfd8   :  { %5200 = vrot.lane.b32.xlu0 %v5199_v26, %s5444_s19  ;;  %5195 = vrot.lane.b32.xlu1 %v5194_v42, %s5445_s20  ;;  %v4879_v26 = vld [vmem:[%s6540_s8 + $0x1] ss:$0 sm:$0xff] }
 0xfd9   :  { %4331 = vmatprep.subr.bf16.mxu1 %v5277_v24 }
 0xfdb   :  { %4332 = vmatpush1.bf16.msra.mxu1 %v5275_v36 }
 0xfdc   :  { %5205 = vrot.lane.b32.xlu1 %v5204_v46, %s6556_s25  ;;  %4333 = vmatprep.subr.bf16.mxu1 %v5280_v37 }
 0xfdf   :  { %4334 = vmatpush1.bf16.msra.mxu1 %v5278_v38 }
0x104a   :  { %v5201_v53 = vpop.permute.xlu0 %5200  ;;  %v5196_v61 = vpop.permute.xlu1 %5195 }
0x104b   :  { %v5198_v47 = vunpack.i.h.bf16 %v5196_v61  ;;  %v5197_v48 = vunpack.i.l.bf16 %v5196_v61  ;;  %v5203_v14 = vunpack.i.h.bf16 %v5201_v53  ;;  %v5202_v31 = vunpack.i.l.bf16 %v5201_v53 }
0x104d   :  { %v4121_v57 = vsel %vm1097_vm2, %v4025_v5, %v5197_v48  ;;  %v4122_v9 = vsel %vm1097_vm2, %v4093_v52, %v5198_v47  ;;  %v5281_v47 = vld [vmem:[%s6543_s11 + $0xc0] sm:$0xff]  }
0x104e   :  { %v5206_v15 = vpop.permute.xlu1 %5205  ;;  %v4123_v58 = vsel %vm1868_vm8, %v4121_v57, %v5202_v31  ;;  %v4124_v17 = vsel %vm1868_vm8, %v4122_v9, %v5203_v14  ;;  %v5282_v48 = vld [vmem:[%s6543_s11 + $0x80] sm:$0xff]   ;;  %5023 = vmatprep.subr.bf16.mxu0 %v5281_v47  ;;  %v5283_v14 = vld [vmem:[%s6543_s11 + $0xc8] sm:$0xff]   ;;  %v5286_v57 = vld [vmem:[%s6543_s11 + $0x90] sm:$0xff]  }
0x104f   :  { %v5208_v12 = vunpack.i.h.bf16 %v5206_v15  ;;  %v5207_v62 = vunpack.i.l.bf16 %v5206_v15  ;;  %v5284_v31 = vld [vmem:[%s6543_s11 + $0x88] sm:$0xff]   ;;  %v5287_v9 = vld [vmem:[%s6543_s11 + $0xd8] sm:$0xff]  }
0x1050   :  { %v5288_v15 = vld [vmem:[%s6543_s11 + $0x98] sm:$0xff]  }
0x1051   :  { %v4125_v13 = vsel %vm1871_vm9, %v4123_v58, %v5207_v62  ;;  %v4126_v28 = vsel %vm1871_vm9, %v4124_v17, %v5208_v12  ;;  %v5289_v12 = vld [vmem:[%s6543_s11 + $0xe0] sm:$0xff]   ;;  %v5291_v58 = vld [vmem:[%s6543_s11 + $0xe8] sm:$0xff]  }
0x1052   :  { %v4127_v63 = vpack.c.bf16 %v4126_v28, %v4125_v13  ;;  %v5290_v62 = vld [vmem:[%s6543_s11 + $0xa0] sm:$0xff]   ;;  %v5292_v17 = vld [vmem:[%s6543_s11 + $0xa8] sm:$0xff]   ;;  %v5293_v13 = vld [vmem:[%s6543_s11 + $0xf0] sm:$0xff]  }
0x1053   :  { %v5294_v28 = vld [vmem:[%s6543_s11 + $0xb0] sm:$0xff]  }
0x1054   :  { %5162 = vmatmul.mubr.msk.bf16.vlgmr.msra.gmra.mrb[32].mxu0 %vm70_vm0, %v4127_v63  ;;  %v5295_v63 = vld [vmem:[%s6543_s11 + $0xf8] sm:$0xff]  }
0x1055   :  { %5024 = vmatpush3.bf16.msra.mxu0 %v5282_v48 }
0x1056   :  { %5025 = vmatprep.subr.bf16.mxu0 %v5283_v14 }
0x1059   :  { %5026 = vmatpush3.bf16.msra.mxu0 %v5284_v31 }
0x1127   :  { %v4206_v3 = vpop.f32.mrb[32].mxu0 }
0x1128   :  { %v4207_v45 = vadd.f32 %v4870_v0, %v4206_v3  ;;  %v5163_v4 = vpop.f32.mrb[33].mxu0  ;;  %v4888_v3 = vld [vmem:[%s6542_s10 + $0x2] sm:$0x3] }
0x1129   :  { %v4209_v6 = vpop.f32.mrb[34].mxu0  ;;  %v4281_v4 = vrot.slane %v4888_v3, %v2021_v27 }
0x112a   :  { %v6379_v7 = vadd.f32 %v4207_v45, %v6031_v33  ;;  %v4210_v44 = vadd.f32 %v4870_v0, %v4209_v6  ;;  %v5164_v2 = vpop.f32.mrb[35].mxu0  ;;  %v5296_v0 = vld [vmem:[%s6543_s11 + $0xb8] sm:$0xff]   ;;  %v4277_v45 = vrot.slane %v4888_v3, %v2017_v23 }
0x112c   :  { %v6382_v16 = vadd.f32 %v4210_v44, %v6034_v35  ;;  %v4219_v1 = vsel %vm70_vm0, %v6379_v7, 0.0 }
0x112d   :  { %4220 = vadd.xlane.f32.xlu1 %v4219_v1 }
0x112e   :  { %v4222_v18 = vsel %vm70_vm0, %v6382_v16, 0.0 }
0x112f   :  { %4223 = vadd.xlane.f32.xlu0 %v4222_v18 }
0x11ba   :  { %v4221_v19 = vpop.xlane.xlu1 %4220 }
0x11bb   :  { %v4225_v20 = vmul.f32 0.015625, %v4221_v19 }
0x11bc   :  { %v4224_v60 = vpop.xlane.xlu0 %4223 }
0x11bd   :  { %v4227_v21 = vsub.f32 %v6379_v7, %v4225_v20  ;;  %v4226_v33 = vmul.f32 0.015625, %v4224_v60 }
0x11bf   :  { %v4228_v25 = vsub.f32 %v6382_v16, %v4226_v33  ;;  %v4229_v29 = vmul.f32 %v4227_v21, %v4227_v21 }
0x11c1   :  { %v4231_v35 = vsel %vm70_vm0, %v4229_v29, 0.0  ;;  %v4230_v30 = vmul.f32 %v4228_v25, %v4228_v25 }
0x11c2   :  { %4232 = vadd.xlane.f32.xlu0 %v4231_v35 }
0x11c3   :  { %v4234_v8 = vsel %vm70_vm0, %v4230_v30, 0.0 }
0x11c4   :  { %4235 = vadd.xlane.f32.xlu1 %v4234_v8 }
0x124f   :  { %v4233_v5 = vpop.xlane.xlu0 %4232 }
0x1250   :  { %v4237_v39 = vmul.f32 0.015625, %v4233_v5 }
0x1251   :  { %v4236_v40 = vpop.xlane.xlu1 %4235 }
0x1252   :  { %v4239_v56 = vadd.f32 1e-05, %v4237_v39  ;;  %v4238_v10 = vmul.f32 0.015625, %v4236_v40 }
0x1254   :  { %5393 = vrsqrt.f32 %v4239_v56  ;;  %v4240_v43 = vadd.f32 1e-05, %v4238_v10 }
0x1256   :  { %5395 = vrsqrt.f32 %v4240_v43 }
0x125e   :  { %v5394_v50 = vpop.eup %5393 }
0x125f   :  { %v4243_v51 = vmul.f32 %v5394_v50, %v4227_v21 }
0x1260   :  { %v5396_v41 = vpop.eup %5395 }
0x1261   :  { %v4251_v52 = vmul.f32 %v4878_v11, %v4243_v51  ;;  %v4244_v55 = vmul.f32 %v5396_v41, %v4228_v25 }
0x1263   :  { %v4252_v42 = vmul.f32 %v4878_v11, %v4244_v55  ;;  %v4259_v46 = vadd.f32 %v4879_v26, %v4251_v52 }
0x1265   :  { %v4260_v53 = vadd.f32 %v4879_v26, %v4252_v42 }
0x1267   :  { %v4261_v61 = vpack.c.bf16 %v4260_v53, %v4259_v46 }
0x1269   :  { %4897 = vmatmul.mubr.msk.bf16.vlgmr.msra.gmra.mrb[52].mxu1 %vm70_vm0, %v4261_v61 }
0x126a   :  { %4716 = vmatprep.mubr.bf16.mxu1 %v5435_v22  ;;  %v5285_v22 = vld [vmem:[%s6543_s11 + $0xd0] sm:$0xff]  }
0x126b   :  { %5027 = vmatprep.subr.bf16.mxu0 %v5285_v22  ;;  %v4931_v22 = vld [vmem:[%s6544_s12 + $0x1] ss:$0 sm:$0xff] }
0x126c   :  { %5028 = vmatpush3.bf16.msra.mxu0 %v5286_v57 }
0x126d   :  { %5029 = vmatprep.subr.bf16.mxu0 %v5287_v9 }
0x1270   :  { %5030 = vmatpush3.bf16.msra.mxu0 %v5288_v15 }
0x1271   :  { %5031 = vmatprep.subr.bf16.mxu0 %v5289_v12 }
0x1274   :  { %5032 = vmatpush3.bf16.msra.mxu0 %v5290_v62 }
0x1275   :  { %5033 = vmatprep.subr.bf16.mxu0 %v5291_v58 }
0x1278   :  { %5034 = vmatpush3.bf16.msra.mxu0 %v5292_v17 }
0x1279   :  { %5035 = vmatprep.subr.bf16.mxu0 %v5293_v13 }
0x127c   :  { %5036 = vmatpush3.bf16.msra.mxu0 %v5294_v28 }
0x127d   :  { %5037 = vmatprep.subr.bf16.mxu0 %v5295_v63 }
0x1280   :  { %5038 = vmatpush3.bf16.msra.mxu0 %v5296_v0 }
0x133c   :  { %v4361_v6 = vpop.f32.mrb[52].mxu1 }
0x133d   :  { %v4362_v44 = vadd.f32 %v4361_v6, %v4277_v45  ;;  %v4363_v2 = vpop.f32.mrb[53].mxu1 }
0x133e   :  { %v4364_v1 = vadd.f32 %v4363_v2, %v4281_v4  ;;  %v4365_v18 = vpop.f32.mrb[54].mxu1 }
0x133f   :  { %v4374_v19 = vmul.f32 0.044715, %v4362_v44  ;;  %v4366_v20 = vadd.f32 %v4365_v18, %v4277_v45  ;;  %v4367_v60 = vpop.f32.mrb[55].mxu1  ;;  %v4370_v51 = vmul.f32 0.5, %v4362_v44 }
0x1340   :  { %v4375_v21 = vmul.f32 0.044715, %v4364_v1  ;;  %v4368_v33 = vadd.f32 %v4367_v60, %v4281_v4  ;;  %v4371_v55 = vmul.f32 0.5, %v4364_v1  ;;  %v5302_v60 = vld [vmem:[%s6547_s15 + $0x14] ss:$8 sps:$4 sm:$0xff]  }
0x1341   :  { %v4378_v25 = vmul.f32 %v4374_v19, %v4362_v44  ;;  %v4376_v29 = vmul.f32 0.044715, %v4366_v20  ;;  %v4372_v41 = vmul.f32 0.5, %v4366_v20 }
0x1342   :  { %v4379_v35 = vmul.f32 %v4375_v21, %v4364_v1  ;;  %v4377_v30 = vmul.f32 0.044715, %v4368_v33  ;;  %v4373_v26 = vmul.f32 0.5, %v4368_v33  ;;  %v5300_v21 = vld [vmem:[%s6547_s15 + $0x10] ss:$8 sps:$4 sm:$0xff]  }
0x1343   :  { %v4382_v8 = vmul.f32 %v4378_v25, %v4362_v44  ;;  %v4380_v32 = vmul.f32 %v4376_v29, %v4366_v20  ;;  %v5305_v25 = vld [vmem:[%s6547_s15 + $0x24] ss:$8 sps:$4 sm:$0xff]   ;;  %v5308_v29 = vld [vmem:[%s6547_s15 + $0x34] ss:$8 sps:$4 sm:$0xff]  }
0x1344   :  { %v4383_v23 = vmul.f32 %v4379_v35, %v4364_v1  ;;  %v4381_v54 = vmul.f32 %v4377_v30, %v4368_v33  ;;  %v5306_v35 = vld [vmem:[%s6547_s15 + $0x30] ss:$8 sps:$4 sm:$0xff]  }
0x1345   :  { %v4386_v49 = vadd.f32 %v4382_v8, %v4362_v44  ;;  %v4384_v27 = vmul.f32 %v4380_v32, %v4366_v20 }
0x1346   :  { %v4385_v59 = vmul.f32 %v4381_v54, %v4368_v33  ;;  %v4387_v34 = vadd.f32 %v4383_v23, %v4364_v1 }
0x1347   :  { %v4390_v36 = vmul.f32 0.7978846, %v4386_v49  ;;  %v4388_v24 = vadd.f32 %v4384_v27, %v4366_v20  ;;  %v5297_v20 = vld [vmem:[%s6547_s15] ss:$8 sps:$4 sm:$0xff]  }
0x1348   :  { %v4389_v37 = vadd.f32 %v4385_v59, %v4368_v33  ;;  %v4391_v38 = vmul.f32 0.7978846, %v4387_v34  ;;  %v5303_v33 = vld [vmem:[%s6547_s15 + $0x20] ss:$8 sps:$4 sm:$0xff]  }
0x1349   :  { %5397 = vtanh.f32 %v4390_v36  ;;  %v4392_v5 = vmul.f32 0.7978846, %v4388_v24  ;;  %v4948_v59 = vld [vmem:[%s6545_s13] ss:$0 sm:$0xff]  ;;  %s5411_s13 = scalar_lea.vmem %s4737_s28, 512 }
0x134a   :  { %v4393_v39 = vmul.f32 0.7978846, %v4389_v37  ;;  %5399 = vtanh.f32 %v4391_v38  ;;  %v4949_v38 = vld [vmem:[%s6546_s14] ss:$0 sm:$0xff]  ;;  %p5412_p0 = scmp.ne.s32.totalorder %s4737_s28, %s5411_s13  ;;  %p5417_p2 = scmp.lt.s32.totalorder %s5411_s13, %s5411_s13 }
0x134b   :  { %5401 = vtanh.f32 %v4392_v5 }
0x134c   :  { %5403 = vtanh.f32 %v4393_v39  ;;  %p5418_p3 = por %p5417_p2, %p5416_p1 }
0x134e   :  { %p5419_p4 = pnand %p5418_p3, %p5412_p0 }
0x1353   :  { %v5398_v40 = vpop.eup %5397 }
0x1354   :  { %v5400_v56 = vpop.eup %5399  ;;  %v4398_v10 = vadd.f32 1.0, %v5398_v40 }
0x1355   :  { %v5402_v43 = vpop.eup %5401  ;;  %v4399_v50 = vadd.f32 1.0, %v5400_v56 }
0x1356   :  { %v5404_v11 = vpop.eup %5403  ;;  %v4400_v52 = vadd.f32 1.0, %v5402_v43  ;;  %v4402_v46 = vmul.f32 %v4398_v10, %v4370_v51 }
0x1357   :  { %v4401_v42 = vadd.f32 1.0, %v5404_v11  ;;  %v4403_v61 = vmul.f32 %v4399_v50, %v4371_v55 }
0x1358   :  { %v4404_v53 = vmul.f32 %v4400_v52, %v4372_v41 }
0x1359   :  { %v4405_v47 = vmul.f32 %v4401_v42, %v4373_v26 }
0x135a   :  { %v4406_v48 = vpack.c.bf16 %v4404_v53, %v4402_v46 }
0x135b   :  { %v4407_v14 = vpack.c.bf16 %v4405_v47, %v4403_v61 }
0x135d   :  { %4577 = vmatprep.mubr.bf16.mxu0 %v4407_v14 }
0x135e   :  { %4578 = vmatmul.mubr.bf16.vlgmr.msra.gmra.mrb[36].mxu0 %v4406_v48 }
0x1431   :  { %v5039_v31 = vpop.f32.mrb[36].mxu0 }
0x1432   :  { %v5040_v57 = vpop.f32.mrb[37].mxu0 }
0x1433   :  { %v5041_v9 = vadd.f32 %v5040_v57, %v5039_v31  ;;  %v5042_v15 = vpop.f32.mrb[38].mxu0 }
0x1434   :  { %v5043_v12 = vpop.f32.mrb[39].mxu0 }
0x1435   :  { %v4580_v62 = vadd.f32 %v5041_v9, %v4931_v22  ;;  %v5044_v58 = vadd.f32 %v5043_v12, %v5042_v15 }
0x1437   :  { %v4583_v17 = vadd.f32 %v5044_v58, %v4931_v22  ;;  %v4586_v13 = vadd.f32 %v4580_v62, %v6379_v7 }
0x1439   :  { %v4590_v28 = vsel %vm70_vm0, %v4586_v13, 0.0  ;;  %v4587_v63 = vadd.f32 %v4583_v17, %v6382_v16  ;;  %v5299_v16 = vld [vmem:[%s6547_s15 + $0x4] ss:$8 sps:$4 sm:$0xff]  }
0x143a   :  { %4591 = vadd.xlane.f32.xlu0 %v4590_v28  ;;  %4684 = vmatprep.subr.bf16.mxu1 %v5299_v16 }
0x143b   :  { %v4593_v0 = vsel %vm70_vm0, %v4587_v63, 0.0  ;;  %4685 = vmatpush1.bf16.msra.mxu1 %v5297_v20 }
0x143c   :  { %4594 = vadd.xlane.f32.xlu1 %v4593_v0  ;;  %4686 = vmatprep.subr.bf16.mxu1 %v5302_v60 }
0x143f   :  { %4687 = vmatpush1.bf16.msra.mxu1 %v5300_v21 }
0x1440   :  { %4688 = vmatprep.subr.bf16.mxu1 %v5305_v25 }
0x1443   :  { %4689 = vmatpush1.bf16.msra.mxu1 %v5303_v33 }
0x1444   :  { %4690 = vmatprep.subr.bf16.mxu1 %v5308_v29 }
0x1447   :  { %4691 = vmatpush1.bf16.msra.mxu1 %v5306_v35 }
0x14c7   :  { %v4592_v3 = vpop.xlane.xlu0 %4591 }
0x14c8   :  { %v4596_v45 = vmul.f32 0.015625, %v4592_v3 }
0x14c9   :  { %v4595_v4 = vpop.xlane.xlu1 %4594 }
0x14ca   :  { %v4598_v6 = vsub.f32 %v4586_v13, %v4596_v45  ;;  %v4597_v44 = vmul.f32 0.015625, %v4595_v4 }
0x14cc   :  { %v4599_v2 = vsub.f32 %v4587_v63, %v4597_v44  ;;  %v4600_v1 = vmul.f32 %v4598_v6, %v4598_v6 }
0x14ce   :  { %v4602_v18 = vsel %vm70_vm0, %v4600_v1, 0.0  ;;  %v4601_v19 = vmul.f32 %v4599_v2, %v4599_v2 }
0x14cf   :  { %4603 = vadd.xlane.f32.xlu0 %v4602_v18 }
0x14d0   :  { %v4605_v7 = vsel %vm70_vm0, %v4601_v19, 0.0 }
0x14d1   :  { %4606 = vadd.xlane.f32.xlu1 %v4605_v7 }
0x155c   :  { %v4604_v30 = vpop.xlane.xlu0 %4603 }
0x155d   :  { %v4608_v8 = vmul.f32 0.015625, %v4604_v30 }
0x155e   :  { %v4607_v32 = vpop.xlane.xlu1 %4606 }
0x155f   :  { %v4610_v23 = vadd.f32 1e-05, %v4608_v8  ;;  %v4609_v54 = vmul.f32 0.015625, %v4607_v32 }
0x1561   :  { %5405 = vrsqrt.f32 %v4610_v23  ;;  %v4611_v49 = vadd.f32 1e-05, %v4609_v54 }
0x1563   :  { %5407 = vrsqrt.f32 %v4611_v49 }
0x156b   :  { %v5406_v27 = vpop.eup %5405 }
0x156c   :  { %v4614_v34 = vmul.f32 %v5406_v27, %v4598_v6 }
0x156d   :  { %v5408_v36 = vpop.eup %5407 }
0x156e   :  { %v4622_v24 = vmul.f32 %v4948_v59, %v4614_v34  ;;  %v4615_v37 = vmul.f32 %v5408_v36, %v4599_v2 }
0x1570   :  { %v4623_v5 = vmul.f32 %v4948_v59, %v4615_v37  ;;  %v4630_v39 = vadd.f32 %v4949_v38, %v4622_v24 }
0x1572   :  { %v4631_v40 = vadd.f32 %v4949_v38, %v4623_v5 }
0x1574   :  { %v4632_v56 = vpack.c.bf16 %v4631_v40, %v4630_v39 }
0x1576   :  { %4958 = vmatmul.mubr.msk.bf16.vlgmr.msra.gmra.mrb[56].mxu1 %vm70_vm0, %v4632_v56 }
0x1649   :  { %v4718_v10 = vpop.f32.mrb[56].mxu1 }
0x164a   :  { %4727 = vst [vmem:[#allocation4] sm:$0xff] %v4718_v10  ;;  %v4720_v43 = vpop.f32.mrb[57].mxu1 }
0x164b   :  { %4728 = vst [vmem:[#allocation4 + $0x8] sm:$0xff] %v4720_v43  ;;  %v4722_v50 = vpop.f32.mrb[58].mxu1 }
0x164c   :  { %4729 = vst [vmem:[#allocation4 + $0x10] sm:$0xff] %v4722_v50  ;;  %v4724_v11 = vpop.f32.mrb[59].mxu1 }
0x164d   :  { %4730 = vst [vmem:[#allocation4 + $0x18] sm:$0xff] %v4724_v11 }
0x164e   :  { %5422 = shalt.err (!%p5419_p4)
}
0x164f   :  { %s5423_s22 = scalar_lea.hbm %s6548_s16, 512 }
0x1650   :  { %p5424_p5 = scmp.ne.s32.totalorder %s6548_s16, %s5423_s22  ;;  %p5427_p6 = scmp.lt.u32.totalorder %s5423_s22, %s6548_s16 }
0x1652   :  { %p5429_p7 = pnand %p5427_p6, %p5424_p5 }
0x1654   :  { %5432 = shalt.err (!%p5429_p7)
}
0x1655   :  { %s5448_s23 = smov 256  }
0x1656   :  { %4742 = dma.vmem_to_hbm [thread:$0]  %s4737_s28, 512, %s6548_s16, [#allocation5], %s5448_s23, %s5448_s23, %s5445_s20  }
0x1657   :  { %5433 = dma.done.wait [#allocation5], 512  }
0x1658   :  { %5434 = vsyncadd [#allocation5], 4294966784 }
0x1659   :  { %4746 = vsyncpa [#allocation5], 1 }

</bundles_post_ra>
